<compile_context>
chip_gen: v7x
topology: tpu7x:2x2x1
jax: 0.10.0
libtpu: 0.0.40
codegen_flags: <defaults>
</compile_context>

<pallas_src>
import jax
import jax.numpy as jnp
from jax.experimental import pallas as pl
from jax.experimental.pallas import tpu as pltpu

# ----------------------------- tiny BERT config ------------------------------
VOCAB = 100
TYPE_VOCAB = 2
MAX_POS = 16
HIDDEN = 32
NHEADS = 4
DH = HIDDEN // NHEADS
INTER = 64
NLAYERS = 2
NUM_LABELS = 3
BATCH = 2
SEQ = 8

_LN_EPS = 1e-12
_ATTN_SCALE = 1.0 / (DH ** 0.5)


# ------------------------------ fused kernel ---------------------------------
def _bert_fused_kernel(
    emb_ref, mask_ref,
    emb_ln_g_ref, emb_ln_b_ref,
    wqkv_ref, bqkv_ref, wo_ref, bo_ref,
    ln1_g_ref, ln1_b_ref,
    w1_ref, b1_ref, w2_ref, b2_ref,
    ln2_g_ref, ln2_b_ref,
    pool_w_ref, pool_b_ref, cls_w_ref, cls_b_ref,
    logits_ref,
):
    B, S = BATCH, SEQ

    def layernorm(h, g, b):
        mean = jnp.mean(h, axis=-1, keepdims=True)
        var = jnp.mean((h - mean) ** 2, axis=-1, keepdims=True)
        return (h - mean) * jax.lax.rsqrt(var + _LN_EPS) * g + b

    def gelu(y):
        # tanh-approx GELU (HF BERT uses erf-GELU; numerically very close).
        return 0.5 * y * (1.0 + jnp.tanh(
            0.7978845608028654 * (y + 0.044715 * y * y * y)))

    # Embedding LayerNorm (no fake zero residual).
    x = layernorm(emb_ref[...], emb_ln_g_ref[...], emb_ln_b_ref[...])   # (B*S, H)

    # HF-style additive mask built in-register from the (B, S) attention mask.
    addmask = (1.0 - mask_ref[...]) * -10000.0                           # (B, S)

    for l in range(NLAYERS):
        # ---- fused QKV projection: one (16,32)x(32,96) MXU pass ----
        qkv = jnp.dot(x, wqkv_ref[l], preferred_element_type=jnp.float32)
        qkv = qkv + bqkv_ref[l]                                          # (B*S, 3H)

        # ---- multi-head attention, fully in VMEM/registers ----
        ctx_heads = []
        for h in range(NHEADS):
            q_h = qkv[:, h * DH:(h + 1) * DH] * _ATTN_SCALE              # (B*S, DH)
            k_h = qkv[:, HIDDEN + h * DH:HIDDEN + (h + 1) * DH]
            v_h = qkv[:, 2 * HIDDEN + h * DH:2 * HIDDEN + (h + 1) * DH]
            ctx_b = []
            for b in range(B):
                qb = q_h[b * S:(b + 1) * S, :]                           # (S, DH)
                kb = k_h[b * S:(b + 1) * S, :]
                vb = v_h[b * S:(b + 1) * S, :]
                # scores = q @ k^T (contract last dims, no explicit transpose)
                s = jax.lax.dot_general(
                    qb, kb, (((1,), (1,)), ((), ())),
                    preferred_element_type=jnp.float32)                  # (S, S)
                s = s + addmask[b:b + 1, :]                              # mask keys
                m = jnp.max(s, axis=-1, keepdims=True)
                p = jnp.exp(s - m)
                denom = jnp.sum(p, axis=-1, keepdims=True)
                p = p * pl.reciprocal(denom, approx=True)
                ctx_b.append(jnp.dot(p, vb,
                                     preferred_element_type=jnp.float32))
            ctx_heads.append(jnp.concatenate(ctx_b, axis=0))             # (B*S, DH)
        ctx = jnp.concatenate(ctx_heads, axis=-1)                        # (B*S, H)

        # ---- attention output projection + residual + LN1 ----
        attn_out = jnp.dot(ctx, wo_ref[l], preferred_element_type=jnp.float32)
        attn_out = attn_out + bo_ref[l]
        x = layernorm(attn_out + x, ln1_g_ref[l], ln1_b_ref[l])

        # ---- feed-forward + residual + LN2 ----
        inter = jnp.dot(x, w1_ref[l], preferred_element_type=jnp.float32)
        inter = gelu(inter + b1_ref[l])
        ffn_out = jnp.dot(inter, w2_ref[l], preferred_element_type=jnp.float32)
        ffn_out = ffn_out + b2_ref[l]
        x = layernorm(ffn_out + x, ln2_g_ref[l], ln2_b_ref[l])

    # ---- pooler (CLS token of each sequence) + classifier ----
    cls_tok = jnp.concatenate([x[b * S:b * S + 1, :] for b in range(B)], axis=0)
    pooled = jnp.tanh(
        jnp.dot(cls_tok, pool_w_ref[...], preferred_element_type=jnp.float32)
        + pool_b_ref[...])
    logits_ref[...] = (
        jnp.dot(pooled, cls_w_ref[...], preferred_element_type=jnp.float32)
        + cls_b_ref[...])


def _full_block(shape):
    zeros = (0,) * len(shape)
    return pl.BlockSpec(shape, lambda i, z=zeros: z)


# ----------------------------- parameter creation ----------------------------
def init_params(key):
    keys = iter(jax.random.split(key, 64))

    def normal(shape):
        return 0.02 * jax.random.normal(next(keys), shape, dtype=jnp.float32)

    def stack(make):
        return jnp.stack([make() for _ in range(NLAYERS)], axis=0)

    return {
        "word_emb": normal((VOCAB, HIDDEN)),
        "pos_emb": normal((MAX_POS, HIDDEN)),
        "type_emb": normal((TYPE_VOCAB, HIDDEN)),
        "emb_ln_g": jnp.ones((1, HIDDEN), jnp.float32),
        "emb_ln_b": jnp.zeros((1, HIDDEN), jnp.float32),
        # per-layer weights stacked on a leading NLAYERS axis; Q|K|V fused.
        "wqkv": stack(lambda: normal((HIDDEN, 3 * HIDDEN))),
        "bqkv": jnp.zeros((NLAYERS, 1, 3 * HIDDEN), jnp.float32),
        "wo": stack(lambda: normal((HIDDEN, HIDDEN))),
        "bo": jnp.zeros((NLAYERS, 1, HIDDEN), jnp.float32),
        "ln1_g": jnp.ones((NLAYERS, 1, HIDDEN), jnp.float32),
        "ln1_b": jnp.zeros((NLAYERS, 1, HIDDEN), jnp.float32),
        "w1": stack(lambda: normal((HIDDEN, INTER))),
        "b1": jnp.zeros((NLAYERS, 1, INTER), jnp.float32),
        "w2": stack(lambda: normal((INTER, HIDDEN))),
        "b2": jnp.zeros((NLAYERS, 1, HIDDEN), jnp.float32),
        "ln2_g": jnp.ones((NLAYERS, 1, HIDDEN), jnp.float32),
        "ln2_b": jnp.zeros((NLAYERS, 1, HIDDEN), jnp.float32),
        "pool_w": normal((HIDDEN, HIDDEN)),
        "pool_b": jnp.zeros((1, HIDDEN), jnp.float32),
        "cls_w": normal((HIDDEN, NUM_LABELS)),
        "cls_b": jnp.zeros((1, NUM_LABELS), jnp.float32),
    }


# --------------------------------- forward -----------------------------------
def rumor_detection_forward(params, input_ids, attention_mask, token_type_ids):
    """Equivalent of RumorDetectionModel.forward -> BERT sequence-classification logits."""
    B, S = input_ids.shape

    # Embedding gathers kept in plain JAX glue (data-dependent row gather).
    pos_ids = jnp.arange(S, dtype=jnp.int32)
    emb = (params["word_emb"][input_ids]
           + params["pos_emb"][pos_ids][None, :, :]
           + params["type_emb"][token_type_ids])                # (B, S, H)
    emb = emb.reshape(B * S, HIDDEN).astype(jnp.float32)
    mask_f = attention_mask.astype(jnp.float32)                 # (B, S)

    inputs = (
        emb, mask_f,
        params["emb_ln_g"], params["emb_ln_b"],
        params["wqkv"], params["bqkv"], params["wo"], params["bo"],
        params["ln1_g"], params["ln1_b"],
        params["w1"], params["b1"], params["w2"], params["b2"],
        params["ln2_g"], params["ln2_b"],
        params["pool_w"], params["pool_b"],
        params["cls_w"], params["cls_b"],
    )

    logits = pl.pallas_call(
        _bert_fused_kernel,
        out_shape=jax.ShapeDtypeStruct((B, NUM_LABELS), jnp.float32),
        grid=(1,),
        in_specs=[_full_block(a.shape) for a in inputs],
        out_specs=_full_block((B, NUM_LABELS)),
        compiler_params=pltpu.CompilerParams(
            dimension_semantics=("arbitrary",)),
    )(*inputs)
    return logits  # (B, NUM_LABELS)


# ----------------------------------- main -------------------------------------
if __name__ == "__main__":
    key = jax.random.PRNGKey(0)
    pkey, ikey, tkey = jax.random.split(key, 3)

    params = init_params(pkey)

    input_ids = jax.random.randint(ikey, (BATCH, SEQ), 0, VOCAB, dtype=jnp.int32)
    token_type_ids = jax.random.randint(tkey, (BATCH, SEQ), 0, TYPE_VOCAB, dtype=jnp.int32)
    # first sequence fully valid, second sequence has 2 padded positions
    attention_mask = jnp.array(
        [[1] * SEQ, [1] * (SEQ - 2) + [0, 0]], dtype=jnp.int32
    )

    fwd = jax.jit(rumor_detection_forward)
    logits = fwd(params, input_ids, attention_mask, token_type_ids)
    jax.block_until_ready(logits)
    assert logits.shape == (BATCH, NUM_LABELS)
    print("KERNEL_OK")
</pallas_src>

<mosaic_0001>
module attributes {stable_mosaic.version = 11 : i64} {
  func.func @_bert_fused_kernel(%arg0: i32, %arg1: memref<16x32xf32, #tpu.memory_space<vmem>>, %arg2: memref<2x8xf32, #tpu.memory_space<vmem>>, %arg3: memref<1x32xf32, #tpu.memory_space<vmem>>, %arg4: memref<1x32xf32, #tpu.memory_space<vmem>>, %arg5: memref<2x32x96xf32, #tpu.memory_space<vmem>>, %arg6: memref<2x1x96xf32, #tpu.memory_space<vmem>>, %arg7: memref<2x32x32xf32, #tpu.memory_space<vmem>>, %arg8: memref<2x1x32xf32, #tpu.memory_space<vmem>>, %arg9: memref<2x1x32xf32, #tpu.memory_space<vmem>>, %arg10: memref<2x1x32xf32, #tpu.memory_space<vmem>>, %arg11: memref<2x32x64xf32, #tpu.memory_space<vmem>>, %arg12: memref<2x1x64xf32, #tpu.memory_space<vmem>>, %arg13: memref<2x64x32xf32, #tpu.memory_space<vmem>>, %arg14: memref<2x1x32xf32, #tpu.memory_space<vmem>>, %arg15: memref<2x1x32xf32, #tpu.memory_space<vmem>>, %arg16: memref<2x1x32xf32, #tpu.memory_space<vmem>>, %arg17: memref<32x32xf32, #tpu.memory_space<vmem>>, %arg18: memref<1x32xf32, #tpu.memory_space<vmem>>, %arg19: memref<32x3xf32, #tpu.memory_space<vmem>>, %arg20: memref<1x3xf32, #tpu.memory_space<vmem>>, %arg21: memref<2x3xf32, #tpu.memory_space<vmem>>) attributes {dimension_semantics = [#tpu.dimension_semantics<arbitrary>], iteration_bounds = array<i64: 1>, scalar_prefetch = 0 : i64, scratch_operands = 0 : i64, tpu.core_type = #tpu.core_type<tc>, window_params = [{pipeline_mode = #tpu.pipeline_mode<synchronous>, transform_indices = @transform_0, window_bounds = array<i64: 16, 32>}, {pipeline_mode = #tpu.pipeline_mode<synchronous>, transform_indices = @transform_1, window_bounds = array<i64: 2, 8>}, {pipeline_mode = #tpu.pipeline_mode<synchronous>, transform_indices = @transform_2, window_bounds = array<i64: 1, 32>}, {pipeline_mode = #tpu.pipeline_mode<synchronous>, transform_indices = @transform_3, window_bounds = array<i64: 1, 32>}, {pipeline_mode = #tpu.pipeline_mode<synchronous>, transform_indices = @transform_4, window_bounds = array<i64: 2, 32, 96>}, {pipeline_mode = #tpu.pipeline_mode<synchronous>, transform_indices = @transform_5, window_bounds = array<i64: 2, 1, 96>}, {pipeline_mode = #tpu.pipeline_mode<synchronous>, transform_indices = @transform_6, window_bounds = array<i64: 2, 32, 32>}, {pipeline_mode = #tpu.pipeline_mode<synchronous>, transform_indices = @transform_7, window_bounds = array<i64: 2, 1, 32>}, {pipeline_mode = #tpu.pipeline_mode<synchronous>, transform_indices = @transform_8, window_bounds = array<i64: 2, 1, 32>}, {pipeline_mode = #tpu.pipeline_mode<synchronous>, transform_indices = @transform_9, window_bounds = array<i64: 2, 1, 32>}, {pipeline_mode = #tpu.pipeline_mode<synchronous>, transform_indices = @transform_10, window_bounds = array<i64: 2, 32, 64>}, {pipeline_mode = #tpu.pipeline_mode<synchronous>, transform_indices = @transform_11, window_bounds = array<i64: 2, 1, 64>}, {pipeline_mode = #tpu.pipeline_mode<synchronous>, transform_indices = @transform_12, window_bounds = array<i64: 2, 64, 32>}, {pipeline_mode = #tpu.pipeline_mode<synchronous>, transform_indices = @transform_13, window_bounds = array<i64: 2, 1, 32>}, {pipeline_mode = #tpu.pipeline_mode<synchronous>, transform_indices = @transform_14, window_bounds = array<i64: 2, 1, 32>}, {pipeline_mode = #tpu.pipeline_mode<synchronous>, transform_indices = @transform_15, window_bounds = array<i64: 2, 1, 32>}, {pipeline_mode = #tpu.pipeline_mode<synchronous>, transform_indices = @transform_16, window_bounds = array<i64: 32, 32>}, {pipeline_mode = #tpu.pipeline_mode<synchronous>, transform_indices = @transform_17, window_bounds = array<i64: 1, 32>}, {pipeline_mode = #tpu.pipeline_mode<synchronous>, transform_indices = @transform_18, window_bounds = array<i64: 32, 3>}, {pipeline_mode = #tpu.pipeline_mode<synchronous>, transform_indices = @transform_19, window_bounds = array<i64: 1, 3>}, {pipeline_mode = #tpu.pipeline_mode<synchronous>, transform_indices = @transform_20, window_bounds = array<i64: 2, 3>}]} {
    %c0 = arith.constant 0 : index
    %c0_0 = arith.constant 0 : index
    %0 = vector.load %arg1[%c0, %c0_0] : memref<16x32xf32, #tpu.memory_space<vmem>>, vector<16x32xf32>
    %c0_1 = arith.constant 0 : index
    %c0_2 = arith.constant 0 : index
    %1 = vector.load %arg3[%c0_1, %c0_2] : memref<1x32xf32, #tpu.memory_space<vmem>>, vector<1x32xf32>
    %c0_3 = arith.constant 0 : index
    %c0_4 = arith.constant 0 : index
    %2 = vector.load %arg4[%c0_3, %c0_4] : memref<1x32xf32, #tpu.memory_space<vmem>>, vector<1x32xf32>
    %cst = arith.constant dense<0.000000e+00> : vector<16xf32>
    %3 = vector.multi_reduction <add>, %0, %cst [1] : vector<16x32xf32> to vector<16xf32>
    %4 = vector.shape_cast %3 : vector<16xf32> to vector<16x1xf32>
    %cst_5 = arith.constant 3.200000e+01 : f32
    %5 = vector.broadcast %cst_5 : f32 to vector<16x1xf32>
    %6 = arith.divf %4, %5 : vector<16x1xf32>
    %7 = vector.broadcast %6 : vector<16x1xf32> to vector<16x32xf32>
    %8 = arith.subf %0, %7 : vector<16x32xf32>
    %9 = arith.mulf %8, %8 : vector<16x32xf32>
    %cst_6 = arith.constant dense<0.000000e+00> : vector<16xf32>
    %10 = vector.multi_reduction <add>, %9, %cst_6 [1] : vector<16x32xf32> to vector<16xf32>
    %11 = vector.shape_cast %10 : vector<16xf32> to vector<16x1xf32>
    %cst_7 = arith.constant 3.200000e+01 : f32
    %12 = vector.broadcast %cst_7 : f32 to vector<16x1xf32>
    %13 = arith.divf %11, %12 : vector<16x1xf32>
    %14 = vector.broadcast %6 : vector<16x1xf32> to vector<16x32xf32>
    %15 = arith.subf %0, %14 : vector<16x32xf32>
    %cst_8 = arith.constant 9.99999996E-13 : f32
    %16 = vector.broadcast %cst_8 : f32 to vector<16x1xf32>
    %17 = arith.addf %13, %16 : vector<16x1xf32>
    %18 = math.rsqrt %17 : vector<16x1xf32>
    %19 = vector.broadcast %18 : vector<16x1xf32> to vector<16x32xf32>
    %20 = arith.mulf %15, %19 : vector<16x32xf32>
    %21 = vector.broadcast %1 : vector<1x32xf32> to vector<16x32xf32>
    %22 = arith.mulf %20, %21 : vector<16x32xf32>
    %23 = vector.broadcast %2 : vector<1x32xf32> to vector<16x32xf32>
    %24 = arith.addf %22, %23 : vector<16x32xf32>
    %c0_9 = arith.constant 0 : index
    %c0_10 = arith.constant 0 : index
    %25 = vector.load %arg2[%c0_9, %c0_10] : memref<2x8xf32, #tpu.memory_space<vmem>>, vector<2x8xf32>
    %cst_11 = arith.constant 1.000000e+00 : f32
    %26 = vector.broadcast %cst_11 : f32 to vector<2x8xf32>
    %27 = arith.subf %26, %25 : vector<2x8xf32>
    %cst_12 = arith.constant -1.000000e+04 : f32
    %28 = vector.broadcast %cst_12 : f32 to vector<2x8xf32>
    %29 = arith.mulf %27, %28 : vector<2x8xf32>
    %c0_13 = arith.constant 0 : index
    %c0_14 = arith.constant 0 : index
    %c0_15 = arith.constant 0 : index
    %30 = vector.load %arg5[%c0_13, %c0_14, %c0_15] : memref<2x32x96xf32, #tpu.memory_space<vmem>>, vector<1x32x96xf32>
    %31 = vector.shape_cast %30 : vector<1x32x96xf32> to vector<32x96xf32>
    %cst_16 = arith.constant dense<0.000000e+00> : vector<16x96xf32>
    %32 = tpu.matmul %24, %31, %cst_16 {dimension_numbers = #tpu.dot_dimension_numbers<[1], [0], [0], [1], [0, 0, 1, 1], [], []>} : vector<16x32xf32>, vector<32x96xf32>, vector<16x96xf32> -> vector<16x96xf32>
    %c0_17 = arith.constant 0 : index
    %c0_18 = arith.constant 0 : index
    %c0_19 = arith.constant 0 : index
    %33 = vector.load %arg6[%c0_17, %c0_18, %c0_19] : memref<2x1x96xf32, #tpu.memory_space<vmem>>, vector<1x1x96xf32>
    %34 = vector.shape_cast %33 : vector<1x1x96xf32> to vector<1x96xf32>
    %35 = vector.broadcast %34 : vector<1x96xf32> to vector<16x96xf32>
    %36 = arith.addf %32, %35 : vector<16x96xf32>
    %37 = vector.extract_strided_slice %36 {offsets = [0, 0], sizes = [16, 8], strides = [1, 1]} : vector<16x96xf32> to vector<16x8xf32>
    %cst_20 = arith.constant 0.353553385 : f32
    %38 = vector.broadcast %cst_20 : f32 to vector<16x8xf32>
    %39 = arith.mulf %37, %38 : vector<16x8xf32>
    %40 = vector.extract_strided_slice %36 {offsets = [0, 32], sizes = [16, 8], strides = [1, 1]} : vector<16x96xf32> to vector<16x8xf32>
    %41 = vector.extract_strided_slice %36 {offsets = [0, 64], sizes = [16, 8], strides = [1, 1]} : vector<16x96xf32> to vector<16x8xf32>
    %42 = vector.extract_strided_slice %39 {offsets = [0, 0], sizes = [8, 8], strides = [1, 1]} : vector<16x8xf32> to vector<8x8xf32>
    %43 = vector.extract_strided_slice %40 {offsets = [0, 0], sizes = [8, 8], strides = [1, 1]} : vector<16x8xf32> to vector<8x8xf32>
    %44 = vector.extract_strided_slice %41 {offsets = [0, 0], sizes = [8, 8], strides = [1, 1]} : vector<16x8xf32> to vector<8x8xf32>
    %cst_21 = arith.constant dense<0.000000e+00> : vector<8x8xf32>
    %45 = tpu.matmul %42, %43, %cst_21 {dimension_numbers = #tpu.dot_dimension_numbers<[1], [1], [0], [0], [0, 0, 1, 0], [], []>} : vector<8x8xf32>, vector<8x8xf32>, vector<8x8xf32> -> vector<8x8xf32>
    %46 = vector.extract_strided_slice %29 {offsets = [0, 0], sizes = [1, 8], strides = [1, 1]} : vector<2x8xf32> to vector<1x8xf32>
    %47 = vector.broadcast %46 : vector<1x8xf32> to vector<8x8xf32>
    %48 = arith.addf %45, %47 : vector<8x8xf32>
    %cst_22 = arith.constant dense<0xFF800000> : vector<8xf32>
    %49 = vector.multi_reduction <maximumf>, %48, %cst_22 [1] : vector<8x8xf32> to vector<8xf32>
    %50 = vector.shape_cast %49 : vector<8xf32> to vector<8x1xf32>
    %51 = vector.broadcast %50 : vector<8x1xf32> to vector<8x8xf32>
    %52 = arith.subf %48, %51 : vector<8x8xf32>
    %53 = math.exp %52 : vector<8x8xf32>
    %cst_23 = arith.constant dense<0.000000e+00> : vector<8xf32>
    %54 = vector.multi_reduction <add>, %53, %cst_23 [1] : vector<8x8xf32> to vector<8xf32>
    %55 = vector.shape_cast %54 : vector<8xf32> to vector<8x1xf32>
    %56 = tpu.reciprocal %55 {approx = true} : vector<8x1xf32> -> vector<8x1xf32>
    %57 = vector.broadcast %56 : vector<8x1xf32> to vector<8x8xf32>
    %58 = arith.mulf %53, %57 : vector<8x8xf32>
    %cst_24 = arith.constant dense<0.000000e+00> : vector<8x8xf32>
    %59 = tpu.matmul %58, %44, %cst_24 {dimension_numbers = #tpu.dot_dimension_numbers<[1], [0], [0], [1], [0, 0, 1, 1], [], []>} : vector<8x8xf32>, vector<8x8xf32>, vector<8x8xf32> -> vector<8x8xf32>
    %60 = vector.extract_strided_slice %39 {offsets = [8, 0], sizes = [8, 8], strides = [1, 1]} : vector<16x8xf32> to vector<8x8xf32>
    %61 = vector.extract_strided_slice %40 {offsets = [8, 0], sizes = [8, 8], strides = [1, 1]} : vector<16x8xf32> to vector<8x8xf32>
    %62 = vector.extract_strided_slice %41 {offsets = [8, 0], sizes = [8, 8], strides = [1, 1]} : vector<16x8xf32> to vector<8x8xf32>
    %cst_25 = arith.constant dense<0.000000e+00> : vector<8x8xf32>
    %63 = tpu.matmul %60, %61, %cst_25 {dimension_numbers = #tpu.dot_dimension_numbers<[1], [1], [0], [0], [0, 0, 1, 0], [], []>} : vector<8x8xf32>, vector<8x8xf32>, vector<8x8xf32> -> vector<8x8xf32>
    %64 = vector.extract_strided_slice %29 {offsets = [1, 0], sizes = [1, 8], strides = [1, 1]} : vector<2x8xf32> to vector<1x8xf32>
    %65 = vector.broadcast %64 : vector<1x8xf32> to vector<8x8xf32>
    %66 = arith.addf %63, %65 : vector<8x8xf32>
    %cst_26 = arith.constant dense<0xFF800000> : vector<8xf32>
    %67 = vector.multi_reduction <maximumf>, %66, %cst_26 [1] : vector<8x8xf32> to vector<8xf32>
    %68 = vector.shape_cast %67 : vector<8xf32> to vector<8x1xf32>
    %69 = vector.broadcast %68 : vector<8x1xf32> to vector<8x8xf32>
    %70 = arith.subf %66, %69 : vector<8x8xf32>
    %71 = math.exp %70 : vector<8x8xf32>
    %cst_27 = arith.constant dense<0.000000e+00> : vector<8xf32>
    %72 = vector.multi_reduction <add>, %71, %cst_27 [1] : vector<8x8xf32> to vector<8xf32>
    %73 = vector.shape_cast %72 : vector<8xf32> to vector<8x1xf32>
    %74 = tpu.reciprocal %73 {approx = true} : vector<8x1xf32> -> vector<8x1xf32>
    %75 = vector.broadcast %74 : vector<8x1xf32> to vector<8x8xf32>
    %76 = arith.mulf %71, %75 : vector<8x8xf32>
    %cst_28 = arith.constant dense<0.000000e+00> : vector<8x8xf32>
    %77 = tpu.matmul %76, %62, %cst_28 {dimension_numbers = #tpu.dot_dimension_numbers<[1], [0], [0], [1], [0, 0, 1, 1], [], []>} : vector<8x8xf32>, vector<8x8xf32>, vector<8x8xf32> -> vector<8x8xf32>
    %78 = tpu.concatenate %59, %77 in 0 : vector<8x8xf32>, vector<8x8xf32> -> vector<16x8xf32>
    %79 = vector.extract_strided_slice %36 {offsets = [0, 8], sizes = [16, 8], strides = [1, 1]} : vector<16x96xf32> to vector<16x8xf32>
    %cst_29 = arith.constant 0.353553385 : f32
    %80 = vector.broadcast %cst_29 : f32 to vector<16x8xf32>
    %81 = arith.mulf %79, %80 : vector<16x8xf32>
    %82 = vector.extract_strided_slice %36 {offsets = [0, 40], sizes = [16, 8], strides = [1, 1]} : vector<16x96xf32> to vector<16x8xf32>
    %83 = vector.extract_strided_slice %36 {offsets = [0, 72], sizes = [16, 8], strides = [1, 1]} : vector<16x96xf32> to vector<16x8xf32>
    %84 = vector.extract_strided_slice %81 {offsets = [0, 0], sizes = [8, 8], strides = [1, 1]} : vector<16x8xf32> to vector<8x8xf32>
    %85 = vector.extract_strided_slice %82 {offsets = [0, 0], sizes = [8, 8], strides = [1, 1]} : vector<16x8xf32> to vector<8x8xf32>
    %86 = vector.extract_strided_slice %83 {offsets = [0, 0], sizes = [8, 8], strides = [1, 1]} : vector<16x8xf32> to vector<8x8xf32>
    %cst_30 = arith.constant dense<0.000000e+00> : vector<8x8xf32>
    %87 = tpu.matmul %84, %85, %cst_30 {dimension_numbers = #tpu.dot_dimension_numbers<[1], [1], [0], [0], [0, 0, 1, 0], [], []>} : vector<8x8xf32>, vector<8x8xf32>, vector<8x8xf32> -> vector<8x8xf32>
    %88 = vector.extract_strided_slice %29 {offsets = [0, 0], sizes = [1, 8], strides = [1, 1]} : vector<2x8xf32> to vector<1x8xf32>
    %89 = vector.broadcast %88 : vector<1x8xf32> to vector<8x8xf32>
    %90 = arith.addf %87, %89 : vector<8x8xf32>
    %cst_31 = arith.constant dense<0xFF800000> : vector<8xf32>
    %91 = vector.multi_reduction <maximumf>, %90, %cst_31 [1] : vector<8x8xf32> to vector<8xf32>
    %92 = vector.shape_cast %91 : vector<8xf32> to vector<8x1xf32>
    %93 = vector.broadcast %92 : vector<8x1xf32> to vector<8x8xf32>
    %94 = arith.subf %90, %93 : vector<8x8xf32>
    %95 = math.exp %94 : vector<8x8xf32>
    %cst_32 = arith.constant dense<0.000000e+00> : vector<8xf32>
    %96 = vector.multi_reduction <add>, %95, %cst_32 [1] : vector<8x8xf32> to vector<8xf32>
    %97 = vector.shape_cast %96 : vector<8xf32> to vector<8x1xf32>
    %98 = tpu.reciprocal %97 {approx = true} : vector<8x1xf32> -> vector<8x1xf32>
    %99 = vector.broadcast %98 : vector<8x1xf32> to vector<8x8xf32>
    %100 = arith.mulf %95, %99 : vector<8x8xf32>
    %cst_33 = arith.constant dense<0.000000e+00> : vector<8x8xf32>
    %101 = tpu.matmul %100, %86, %cst_33 {dimension_numbers = #tpu.dot_dimension_numbers<[1], [0], [0], [1], [0, 0, 1, 1], [], []>} : vector<8x8xf32>, vector<8x8xf32>, vector<8x8xf32> -> vector<8x8xf32>
    %102 = vector.extract_strided_slice %81 {offsets = [8, 0], sizes = [8, 8], strides = [1, 1]} : vector<16x8xf32> to vector<8x8xf32>
    %103 = vector.extract_strided_slice %82 {offsets = [8, 0], sizes = [8, 8], strides = [1, 1]} : vector<16x8xf32> to vector<8x8xf32>
    %104 = vector.extract_strided_slice %83 {offsets = [8, 0], sizes = [8, 8], strides = [1, 1]} : vector<16x8xf32> to vector<8x8xf32>
    %cst_34 = arith.constant dense<0.000000e+00> : vector<8x8xf32>
    %105 = tpu.matmul %102, %103, %cst_34 {dimension_numbers = #tpu.dot_dimension_numbers<[1], [1], [0], [0], [0, 0, 1, 0], [], []>} : vector<8x8xf32>, vector<8x8xf32>, vector<8x8xf32> -> vector<8x8xf32>
    %106 = vector.extract_strided_slice %29 {offsets = [1, 0], sizes = [1, 8], strides = [1, 1]} : vector<2x8xf32> to vector<1x8xf32>
    %107 = vector.broadcast %106 : vector<1x8xf32> to vector<8x8xf32>
    %108 = arith.addf %105, %107 : vector<8x8xf32>
    %cst_35 = arith.constant dense<0xFF800000> : vector<8xf32>
    %109 = vector.multi_reduction <maximumf>, %108, %cst_35 [1] : vector<8x8xf32> to vector<8xf32>
    %110 = vector.shape_cast %109 : vector<8xf32> to vector<8x1xf32>
    %111 = vector.broadcast %110 : vector<8x1xf32> to vector<8x8xf32>
    %112 = arith.subf %108, %111 : vector<8x8xf32>
    %113 = math.exp %112 : vector<8x8xf32>
    %cst_36 = arith.constant dense<0.000000e+00> : vector<8xf32>
    %114 = vector.multi_reduction <add>, %113, %cst_36 [1] : vector<8x8xf32> to vector<8xf32>
    %115 = vector.shape_cast %114 : vector<8xf32> to vector<8x1xf32>
    %116 = tpu.reciprocal %115 {approx = true} : vector<8x1xf32> -> vector<8x1xf32>
    %117 = vector.broadcast %116 : vector<8x1xf32> to vector<8x8xf32>
    %118 = arith.mulf %113, %117 : vector<8x8xf32>
    %cst_37 = arith.constant dense<0.000000e+00> : vector<8x8xf32>
    %119 = tpu.matmul %118, %104, %cst_37 {dimension_numbers = #tpu.dot_dimension_numbers<[1], [0], [0], [1], [0, 0, 1, 1], [], []>} : vector<8x8xf32>, vector<8x8xf32>, vector<8x8xf32> -> vector<8x8xf32>
    %120 = tpu.concatenate %101, %119 in 0 : vector<8x8xf32>, vector<8x8xf32> -> vector<16x8xf32>
    %121 = vector.extract_strided_slice %36 {offsets = [0, 16], sizes = [16, 8], strides = [1, 1]} : vector<16x96xf32> to vector<16x8xf32>
    %cst_38 = arith.constant 0.353553385 : f32
    %122 = vector.broadcast %cst_38 : f32 to vector<16x8xf32>
    %123 = arith.mulf %121, %122 : vector<16x8xf32>
    %124 = vector.extract_strided_slice %36 {offsets = [0, 48], sizes = [16, 8], strides = [1, 1]} : vector<16x96xf32> to vector<16x8xf32>
    %125 = vector.extract_strided_slice %36 {offsets = [0, 80], sizes = [16, 8], strides = [1, 1]} : vector<16x96xf32> to vector<16x8xf32>
    %126 = vector.extract_strided_slice %123 {offsets = [0, 0], sizes = [8, 8], strides = [1, 1]} : vector<16x8xf32> to vector<8x8xf32>
    %127 = vector.extract_strided_slice %124 {offsets = [0, 0], sizes = [8, 8], strides = [1, 1]} : vector<16x8xf32> to vector<8x8xf32>
    %128 = vector.extract_strided_slice %125 {offsets = [0, 0], sizes = [8, 8], strides = [1, 1]} : vector<16x8xf32> to vector<8x8xf32>
    %cst_39 = arith.constant dense<0.000000e+00> : vector<8x8xf32>
    %129 = tpu.matmul %126, %127, %cst_39 {dimension_numbers = #tpu.dot_dimension_numbers<[1], [1], [0], [0], [0, 0, 1, 0], [], []>} : vector<8x8xf32>, vector<8x8xf32>, vector<8x8xf32> -> vector<8x8xf32>
    %130 = vector.extract_strided_slice %29 {offsets = [0, 0], sizes = [1, 8], strides = [1, 1]} : vector<2x8xf32> to vector<1x8xf32>
    %131 = vector.broadcast %130 : vector<1x8xf32> to vector<8x8xf32>
    %132 = arith.addf %129, %131 : vector<8x8xf32>
    %cst_40 = arith.constant dense<0xFF800000> : vector<8xf32>
    %133 = vector.multi_reduction <maximumf>, %132, %cst_40 [1] : vector<8x8xf32> to vector<8xf32>
    %134 = vector.shape_cast %133 : vector<8xf32> to vector<8x1xf32>
    %135 = vector.broadcast %134 : vector<8x1xf32> to vector<8x8xf32>
    %136 = arith.subf %132, %135 : vector<8x8xf32>
    %137 = math.exp %136 : vector<8x8xf32>
    %cst_41 = arith.constant dense<0.000000e+00> : vector<8xf32>
    %138 = vector.multi_reduction <add>, %137, %cst_41 [1] : vector<8x8xf32> to vector<8xf32>
    %139 = vector.shape_cast %138 : vector<8xf32> to vector<8x1xf32>
    %140 = tpu.reciprocal %139 {approx = true} : vector<8x1xf32> -> vector<8x1xf32>
    %141 = vector.broadcast %140 : vector<8x1xf32> to vector<8x8xf32>
    %142 = arith.mulf %137, %141 : vector<8x8xf32>
    %cst_42 = arith.constant dense<0.000000e+00> : vector<8x8xf32>
    %143 = tpu.matmul %142, %128, %cst_42 {dimension_numbers = #tpu.dot_dimension_numbers<[1], [0], [0], [1], [0, 0, 1, 1], [], []>} : vector<8x8xf32>, vector<8x8xf32>, vector<8x8xf32> -> vector<8x8xf32>
    %144 = vector.extract_strided_slice %123 {offsets = [8, 0], sizes = [8, 8], strides = [1, 1]} : vector<16x8xf32> to vector<8x8xf32>
    %145 = vector.extract_strided_slice %124 {offsets = [8, 0], sizes = [8, 8], strides = [1, 1]} : vector<16x8xf32> to vector<8x8xf32>
    %146 = vector.extract_strided_slice %125 {offsets = [8, 0], sizes = [8, 8], strides = [1, 1]} : vector<16x8xf32> to vector<8x8xf32>
    %cst_43 = arith.constant dense<0.000000e+00> : vector<8x8xf32>
    %147 = tpu.matmul %144, %145, %cst_43 {dimension_numbers = #tpu.dot_dimension_numbers<[1], [1], [0], [0], [0, 0, 1, 0], [], []>} : vector<8x8xf32>, vector<8x8xf32>, vector<8x8xf32> -> vector<8x8xf32>
    %148 = vector.extract_strided_slice %29 {offsets = [1, 0], sizes = [1, 8], strides = [1, 1]} : vector<2x8xf32> to vector<1x8xf32>
    %149 = vector.broadcast %148 : vector<1x8xf32> to vector<8x8xf32>
    %150 = arith.addf %147, %149 : vector<8x8xf32>
    %cst_44 = arith.constant dense<0xFF800000> : vector<8xf32>
    %151 = vector.multi_reduction <maximumf>, %150, %cst_44 [1] : vector<8x8xf32> to vector<8xf32>
    %152 = vector.shape_cast %151 : vector<8xf32> to vector<8x1xf32>
    %153 = vector.broadcast %152 : vector<8x1xf32> to vector<8x8xf32>
    %154 = arith.subf %150, %153 : vector<8x8xf32>
    %155 = math.exp %154 : vector<8x8xf32>
    %cst_45 = arith.constant dense<0.000000e+00> : vector<8xf32>
    %156 = vector.multi_reduction <add>, %155, %cst_45 [1] : vector<8x8xf32> to vector<8xf32>
    %157 = vector.shape_cast %156 : vector<8xf32> to vector<8x1xf32>
    %158 = tpu.reciprocal %157 {approx = true} : vector<8x1xf32> -> vector<8x1xf32>
    %159 = vector.broadcast %158 : vector<8x1xf32> to vector<8x8xf32>
    %160 = arith.mulf %155, %159 : vector<8x8xf32>
    %cst_46 = arith.constant dense<0.000000e+00> : vector<8x8xf32>
    %161 = tpu.matmul %160, %146, %cst_46 {dimension_numbers = #tpu.dot_dimension_numbers<[1], [0], [0], [1], [0, 0, 1, 1], [], []>} : vector<8x8xf32>, vector<8x8xf32>, vector<8x8xf32> -> vector<8x8xf32>
    %162 = tpu.concatenate %143, %161 in 0 : vector<8x8xf32>, vector<8x8xf32> -> vector<16x8xf32>
    %163 = vector.extract_strided_slice %36 {offsets = [0, 24], sizes = [16, 8], strides = [1, 1]} : vector<16x96xf32> to vector<16x8xf32>
    %cst_47 = arith.constant 0.353553385 : f32
    %164 = vector.broadcast %cst_47 : f32 to vector<16x8xf32>
    %165 = arith.mulf %163, %164 : vector<16x8xf32>
    %166 = vector.extract_strided_slice %36 {offsets = [0, 56], sizes = [16, 8], strides = [1, 1]} : vector<16x96xf32> to vector<16x8xf32>
    %167 = vector.extract_strided_slice %36 {offsets = [0, 88], sizes = [16, 8], strides = [1, 1]} : vector<16x96xf32> to vector<16x8xf32>
    %168 = vector.extract_strided_slice %165 {offsets = [0, 0], sizes = [8, 8], strides = [1, 1]} : vector<16x8xf32> to vector<8x8xf32>
    %169 = vector.extract_strided_slice %166 {offsets = [0, 0], sizes = [8, 8], strides = [1, 1]} : vector<16x8xf32> to vector<8x8xf32>
    %170 = vector.extract_strided_slice %167 {offsets = [0, 0], sizes = [8, 8], strides = [1, 1]} : vector<16x8xf32> to vector<8x8xf32>
    %cst_48 = arith.constant dense<0.000000e+00> : vector<8x8xf32>
    %171 = tpu.matmul %168, %169, %cst_48 {dimension_numbers = #tpu.dot_dimension_numbers<[1], [1], [0], [0], [0, 0, 1, 0], [], []>} : vector<8x8xf32>, vector<8x8xf32>, vector<8x8xf32> -> vector<8x8xf32>
    %172 = vector.extract_strided_slice %29 {offsets = [0, 0], sizes = [1, 8], strides = [1, 1]} : vector<2x8xf32> to vector<1x8xf32>
    %173 = vector.broadcast %172 : vector<1x8xf32> to vector<8x8xf32>
    %174 = arith.addf %171, %173 : vector<8x8xf32>
    %cst_49 = arith.constant dense<0xFF800000> : vector<8xf32>
    %175 = vector.multi_reduction <maximumf>, %174, %cst_49 [1] : vector<8x8xf32> to vector<8xf32>
    %176 = vector.shape_cast %175 : vector<8xf32> to vector<8x1xf32>
    %177 = vector.broadcast %176 : vector<8x1xf32> to vector<8x8xf32>
    %178 = arith.subf %174, %177 : vector<8x8xf32>
    %179 = math.exp %178 : vector<8x8xf32>
    %cst_50 = arith.constant dense<0.000000e+00> : vector<8xf32>
    %180 = vector.multi_reduction <add>, %179, %cst_50 [1] : vector<8x8xf32> to vector<8xf32>
    %181 = vector.shape_cast %180 : vector<8xf32> to vector<8x1xf32>
    %182 = tpu.reciprocal %181 {approx = true} : vector<8x1xf32> -> vector<8x1xf32>
    %183 = vector.broadcast %182 : vector<8x1xf32> to vector<8x8xf32>
    %184 = arith.mulf %179, %183 : vector<8x8xf32>
    %cst_51 = arith.constant dense<0.000000e+00> : vector<8x8xf32>
    %185 = tpu.matmul %184, %170, %cst_51 {dimension_numbers = #tpu.dot_dimension_numbers<[1], [0], [0], [1], [0, 0, 1, 1], [], []>} : vector<8x8xf32>, vector<8x8xf32>, vector<8x8xf32> -> vector<8x8xf32>
    %186 = vector.extract_strided_slice %165 {offsets = [8, 0], sizes = [8, 8], strides = [1, 1]} : vector<16x8xf32> to vector<8x8xf32>
    %187 = vector.extract_strided_slice %166 {offsets = [8, 0], sizes = [8, 8], strides = [1, 1]} : vector<16x8xf32> to vector<8x8xf32>
    %188 = vector.extract_strided_slice %167 {offsets = [8, 0], sizes = [8, 8], strides = [1, 1]} : vector<16x8xf32> to vector<8x8xf32>
    %cst_52 = arith.constant dense<0.000000e+00> : vector<8x8xf32>
    %189 = tpu.matmul %186, %187, %cst_52 {dimension_numbers = #tpu.dot_dimension_numbers<[1], [1], [0], [0], [0, 0, 1, 0], [], []>} : vector<8x8xf32>, vector<8x8xf32>, vector<8x8xf32> -> vector<8x8xf32>
    %190 = vector.extract_strided_slice %29 {offsets = [1, 0], sizes = [1, 8], strides = [1, 1]} : vector<2x8xf32> to vector<1x8xf32>
    %191 = vector.broadcast %190 : vector<1x8xf32> to vector<8x8xf32>
    %192 = arith.addf %189, %191 : vector<8x8xf32>
    %cst_53 = arith.constant dense<0xFF800000> : vector<8xf32>
    %193 = vector.multi_reduction <maximumf>, %192, %cst_53 [1] : vector<8x8xf32> to vector<8xf32>
    %194 = vector.shape_cast %193 : vector<8xf32> to vector<8x1xf32>
    %195 = vector.broadcast %194 : vector<8x1xf32> to vector<8x8xf32>
    %196 = arith.subf %192, %195 : vector<8x8xf32>
    %197 = math.exp %196 : vector<8x8xf32>
    %cst_54 = arith.constant dense<0.000000e+00> : vector<8xf32>
    %198 = vector.multi_reduction <add>, %197, %cst_54 [1] : vector<8x8xf32> to vector<8xf32>
    %199 = vector.shape_cast %198 : vector<8xf32> to vector<8x1xf32>
    %200 = tpu.reciprocal %199 {approx = true} : vector<8x1xf32> -> vector<8x1xf32>
    %201 = vector.broadcast %200 : vector<8x1xf32> to vector<8x8xf32>
    %202 = arith.mulf %197, %201 : vector<8x8xf32>
    %cst_55 = arith.constant dense<0.000000e+00> : vector<8x8xf32>
    %203 = tpu.matmul %202, %188, %cst_55 {dimension_numbers = #tpu.dot_dimension_numbers<[1], [0], [0], [1], [0, 0, 1, 1], [], []>} : vector<8x8xf32>, vector<8x8xf32>, vector<8x8xf32> -> vector<8x8xf32>
    %204 = tpu.concatenate %185, %203 in 0 : vector<8x8xf32>, vector<8x8xf32> -> vector<16x8xf32>
    %205 = tpu.concatenate %78, %120, %162, %204 in 1 : vector<16x8xf32>, vector<16x8xf32>, vector<16x8xf32>, vector<16x8xf32> -> vector<16x32xf32>
    %c0_56 = arith.constant 0 : index
    %c0_57 = arith.constant 0 : index
    %c0_58 = arith.constant 0 : index
    %206 = vector.load %arg7[%c0_56, %c0_57, %c0_58] : memref<2x32x32xf32, #tpu.memory_space<vmem>>, vector<1x32x32xf32>
    %207 = vector.shape_cast %206 : vector<1x32x32xf32> to vector<32x32xf32>
    %cst_59 = arith.constant dense<0.000000e+00> : vector<16x32xf32>
    %208 = tpu.matmul %205, %207, %cst_59 {dimension_numbers = #tpu.dot_dimension_numbers<[1], [0], [0], [1], [0, 0, 1, 1], [], []>} : vector<16x32xf32>, vector<32x32xf32>, vector<16x32xf32> -> vector<16x32xf32>
    %c0_60 = arith.constant 0 : index
    %c0_61 = arith.constant 0 : index
    %c0_62 = arith.constant 0 : index
    %209 = vector.load %arg8[%c0_60, %c0_61, %c0_62] : memref<2x1x32xf32, #tpu.memory_space<vmem>>, vector<1x1x32xf32>
    %210 = vector.shape_cast %209 : vector<1x1x32xf32> to vector<1x32xf32>
    %211 = vector.broadcast %210 : vector<1x32xf32> to vector<16x32xf32>
    %212 = arith.addf %208, %211 : vector<16x32xf32>
    %213 = arith.addf %212, %24 : vector<16x32xf32>
    %c0_63 = arith.constant 0 : index
    %c0_64 = arith.constant 0 : index
    %c0_65 = arith.constant 0 : index
    %214 = vector.load %arg9[%c0_63, %c0_64, %c0_65] : memref<2x1x32xf32, #tpu.memory_space<vmem>>, vector<1x1x32xf32>
    %215 = vector.shape_cast %214 : vector<1x1x32xf32> to vector<1x32xf32>
    %c0_66 = arith.constant 0 : index
    %c0_67 = arith.constant 0 : index
    %c0_68 = arith.constant 0 : index
    %216 = vector.load %arg10[%c0_66, %c0_67, %c0_68] : memref<2x1x32xf32, #tpu.memory_space<vmem>>, vector<1x1x32xf32>
    %217 = vector.shape_cast %216 : vector<1x1x32xf32> to vector<1x32xf32>
    %cst_69 = arith.constant dense<0.000000e+00> : vector<16xf32>
    %218 = vector.multi_reduction <add>, %213, %cst_69 [1] : vector<16x32xf32> to vector<16xf32>
    %219 = vector.shape_cast %218 : vector<16xf32> to vector<16x1xf32>
    %cst_70 = arith.constant 3.200000e+01 : f32
    %220 = vector.broadcast %cst_70 : f32 to vector<16x1xf32>
    %221 = arith.divf %219, %220 : vector<16x1xf32>
    %222 = vector.broadcast %221 : vector<16x1xf32> to vector<16x32xf32>
    %223 = arith.subf %213, %222 : vector<16x32xf32>
    %224 = arith.mulf %223, %223 : vector<16x32xf32>
    %cst_71 = arith.constant dense<0.000000e+00> : vector<16xf32>
    %225 = vector.multi_reduction <add>, %224, %cst_71 [1] : vector<16x32xf32> to vector<16xf32>
    %226 = vector.shape_cast %225 : vector<16xf32> to vector<16x1xf32>
    %cst_72 = arith.constant 3.200000e+01 : f32
    %227 = vector.broadcast %cst_72 : f32 to vector<16x1xf32>
    %228 = arith.divf %226, %227 : vector<16x1xf32>
    %229 = vector.broadcast %221 : vector<16x1xf32> to vector<16x32xf32>
    %230 = arith.subf %213, %229 : vector<16x32xf32>
    %cst_73 = arith.constant 9.99999996E-13 : f32
    %231 = vector.broadcast %cst_73 : f32 to vector<16x1xf32>
    %232 = arith.addf %228, %231 : vector<16x1xf32>
    %233 = math.rsqrt %232 : vector<16x1xf32>
    %234 = vector.broadcast %233 : vector<16x1xf32> to vector<16x32xf32>
    %235 = arith.mulf %230, %234 : vector<16x32xf32>
    %236 = vector.broadcast %215 : vector<1x32xf32> to vector<16x32xf32>
    %237 = arith.mulf %235, %236 : vector<16x32xf32>
    %238 = vector.broadcast %217 : vector<1x32xf32> to vector<16x32xf32>
    %239 = arith.addf %237, %238 : vector<16x32xf32>
    %c0_74 = arith.constant 0 : index
    %c0_75 = arith.constant 0 : index
    %c0_76 = arith.constant 0 : index
    %240 = vector.load %arg11[%c0_74, %c0_75, %c0_76] : memref<2x32x64xf32, #tpu.memory_space<vmem>>, vector<1x32x64xf32>
    %241 = vector.shape_cast %240 : vector<1x32x64xf32> to vector<32x64xf32>
    %cst_77 = arith.constant dense<0.000000e+00> : vector<16x64xf32>
    %242 = tpu.matmul %239, %241, %cst_77 {dimension_numbers = #tpu.dot_dimension_numbers<[1], [0], [0], [1], [0, 0, 1, 1], [], []>} : vector<16x32xf32>, vector<32x64xf32>, vector<16x64xf32> -> vector<16x64xf32>
    %c0_78 = arith.constant 0 : index
    %c0_79 = arith.constant 0 : index
    %c0_80 = arith.constant 0 : index
    %243 = vector.load %arg12[%c0_78, %c0_79, %c0_80] : memref<2x1x64xf32, #tpu.memory_space<vmem>>, vector<1x1x64xf32>
    %244 = vector.shape_cast %243 : vector<1x1x64xf32> to vector<1x64xf32>
    %245 = vector.broadcast %244 : vector<1x64xf32> to vector<16x64xf32>
    %246 = arith.addf %242, %245 : vector<16x64xf32>
    %cst_81 = arith.constant 5.000000e-01 : f32
    %247 = vector.broadcast %cst_81 : f32 to vector<16x64xf32>
    %248 = arith.mulf %247, %246 : vector<16x64xf32>
    %cst_82 = arith.constant 4.471500e-02 : f32
    %249 = vector.broadcast %cst_82 : f32 to vector<16x64xf32>
    %250 = arith.mulf %249, %246 : vector<16x64xf32>
    %251 = arith.mulf %250, %246 : vector<16x64xf32>
    %252 = arith.mulf %251, %246 : vector<16x64xf32>
    %253 = arith.addf %246, %252 : vector<16x64xf32>
    %cst_83 = arith.constant 0.797884583 : f32
    %254 = vector.broadcast %cst_83 : f32 to vector<16x64xf32>
    %255 = arith.mulf %254, %253 : vector<16x64xf32>
    %256 = math.tanh %255 : vector<16x64xf32>
    %cst_84 = arith.constant 1.000000e+00 : f32
    %257 = vector.broadcast %cst_84 : f32 to vector<16x64xf32>
    %258 = arith.addf %257, %256 : vector<16x64xf32>
    %259 = arith.mulf %248, %258 : vector<16x64xf32>
    %c0_85 = arith.constant 0 : index
    %c0_86 = arith.constant 0 : index
    %c0_87 = arith.constant 0 : index
    %260 = vector.load %arg13[%c0_85, %c0_86, %c0_87] : memref<2x64x32xf32, #tpu.memory_space<vmem>>, vector<1x64x32xf32>
    %261 = vector.shape_cast %260 : vector<1x64x32xf32> to vector<64x32xf32>
    %cst_88 = arith.constant dense<0.000000e+00> : vector<16x32xf32>
    %262 = tpu.matmul %259, %261, %cst_88 {dimension_numbers = #tpu.dot_dimension_numbers<[1], [0], [0], [1], [0, 0, 1, 1], [], []>} : vector<16x64xf32>, vector<64x32xf32>, vector<16x32xf32> -> vector<16x32xf32>
    %c0_89 = arith.constant 0 : index
    %c0_90 = arith.constant 0 : index
    %c0_91 = arith.constant 0 : index
    %263 = vector.load %arg14[%c0_89, %c0_90, %c0_91] : memref<2x1x32xf32, #tpu.memory_space<vmem>>, vector<1x1x32xf32>
    %264 = vector.shape_cast %263 : vector<1x1x32xf32> to vector<1x32xf32>
    %265 = vector.broadcast %264 : vector<1x32xf32> to vector<16x32xf32>
    %266 = arith.addf %262, %265 : vector<16x32xf32>
    %267 = arith.addf %266, %239 : vector<16x32xf32>
    %c0_92 = arith.constant 0 : index
    %c0_93 = arith.constant 0 : index
    %c0_94 = arith.constant 0 : index
    %268 = vector.load %arg15[%c0_92, %c0_93, %c0_94] : memref<2x1x32xf32, #tpu.memory_space<vmem>>, vector<1x1x32xf32>
    %269 = vector.shape_cast %268 : vector<1x1x32xf32> to vector<1x32xf32>
    %c0_95 = arith.constant 0 : index
    %c0_96 = arith.constant 0 : index
    %c0_97 = arith.constant 0 : index
    %270 = vector.load %arg16[%c0_95, %c0_96, %c0_97] : memref<2x1x32xf32, #tpu.memory_space<vmem>>, vector<1x1x32xf32>
    %271 = vector.shape_cast %270 : vector<1x1x32xf32> to vector<1x32xf32>
    %cst_98 = arith.constant dense<0.000000e+00> : vector<16xf32>
    %272 = vector.multi_reduction <add>, %267, %cst_98 [1] : vector<16x32xf32> to vector<16xf32>
    %273 = vector.shape_cast %272 : vector<16xf32> to vector<16x1xf32>
    %cst_99 = arith.constant 3.200000e+01 : f32
    %274 = vector.broadcast %cst_99 : f32 to vector<16x1xf32>
    %275 = arith.divf %273, %274 : vector<16x1xf32>
    %276 = vector.broadcast %275 : vector<16x1xf32> to vector<16x32xf32>
    %277 = arith.subf %267, %276 : vector<16x32xf32>
    %278 = arith.mulf %277, %277 : vector<16x32xf32>
    %cst_100 = arith.constant dense<0.000000e+00> : vector<16xf32>
    %279 = vector.multi_reduction <add>, %278, %cst_100 [1] : vector<16x32xf32> to vector<16xf32>
    %280 = vector.shape_cast %279 : vector<16xf32> to vector<16x1xf32>
    %cst_101 = arith.constant 3.200000e+01 : f32
    %281 = vector.broadcast %cst_101 : f32 to vector<16x1xf32>
    %282 = arith.divf %280, %281 : vector<16x1xf32>
    %283 = vector.broadcast %275 : vector<16x1xf32> to vector<16x32xf32>
    %284 = arith.subf %267, %283 : vector<16x32xf32>
    %cst_102 = arith.constant 9.99999996E-13 : f32
    %285 = vector.broadcast %cst_102 : f32 to vector<16x1xf32>
    %286 = arith.addf %282, %285 : vector<16x1xf32>
    %287 = math.rsqrt %286 : vector<16x1xf32>
    %288 = vector.broadcast %287 : vector<16x1xf32> to vector<16x32xf32>
    %289 = arith.mulf %284, %288 : vector<16x32xf32>
    %290 = vector.broadcast %269 : vector<1x32xf32> to vector<16x32xf32>
    %291 = arith.mulf %289, %290 : vector<16x32xf32>
    %292 = vector.broadcast %271 : vector<1x32xf32> to vector<16x32xf32>
    %293 = arith.addf %291, %292 : vector<16x32xf32>
    %c1 = arith.constant 1 : index
    %c0_103 = arith.constant 0 : index
    %c0_104 = arith.constant 0 : index
    %294 = vector.load %arg5[%c1, %c0_103, %c0_104] : memref<2x32x96xf32, #tpu.memory_space<vmem>>, vector<1x32x96xf32>
    %295 = vector.shape_cast %294 : vector<1x32x96xf32> to vector<32x96xf32>
    %cst_105 = arith.constant dense<0.000000e+00> : vector<16x96xf32>
    %296 = tpu.matmul %293, %295, %cst_105 {dimension_numbers = #tpu.dot_dimension_numbers<[1], [0], [0], [1], [0, 0, 1, 1], [], []>} : vector<16x32xf32>, vector<32x96xf32>, vector<16x96xf32> -> vector<16x96xf32>
    %c1_106 = arith.constant 1 : index
    %c0_107 = arith.constant 0 : index
    %c0_108 = arith.constant 0 : index
    %297 = vector.load %arg6[%c1_106, %c0_107, %c0_108] : memref<2x1x96xf32, #tpu.memory_space<vmem>>, vector<1x1x96xf32>
    %298 = vector.shape_cast %297 : vector<1x1x96xf32> to vector<1x96xf32>
    %299 = vector.broadcast %298 : vector<1x96xf32> to vector<16x96xf32>
    %300 = arith.addf %296, %299 : vector<16x96xf32>
    %301 = vector.extract_strided_slice %300 {offsets = [0, 0], sizes = [16, 8], strides = [1, 1]} : vector<16x96xf32> to vector<16x8xf32>
    %cst_109 = arith.constant 0.353553385 : f32
    %302 = vector.broadcast %cst_109 : f32 to vector<16x8xf32>
    %303 = arith.mulf %301, %302 : vector<16x8xf32>
    %304 = vector.extract_strided_slice %300 {offsets = [0, 32], sizes = [16, 8], strides = [1, 1]} : vector<16x96xf32> to vector<16x8xf32>
    %305 = vector.extract_strided_slice %300 {offsets = [0, 64], sizes = [16, 8], strides = [1, 1]} : vector<16x96xf32> to vector<16x8xf32>
    %306 = vector.extract_strided_slice %303 {offsets = [0, 0], sizes = [8, 8], strides = [1, 1]} : vector<16x8xf32> to vector<8x8xf32>
    %307 = vector.extract_strided_slice %304 {offsets = [0, 0], sizes = [8, 8], strides = [1, 1]} : vector<16x8xf32> to vector<8x8xf32>
    %308 = vector.extract_strided_slice %305 {offsets = [0, 0], sizes = [8, 8], strides = [1, 1]} : vector<16x8xf32> to vector<8x8xf32>
    %cst_110 = arith.constant dense<0.000000e+00> : vector<8x8xf32>
    %309 = tpu.matmul %306, %307, %cst_110 {dimension_numbers = #tpu.dot_dimension_numbers<[1], [1], [0], [0], [0, 0, 1, 0], [], []>} : vector<8x8xf32>, vector<8x8xf32>, vector<8x8xf32> -> vector<8x8xf32>
    %310 = vector.extract_strided_slice %29 {offsets = [0, 0], sizes = [1, 8], strides = [1, 1]} : vector<2x8xf32> to vector<1x8xf32>
    %311 = vector.broadcast %310 : vector<1x8xf32> to vector<8x8xf32>
    %312 = arith.addf %309, %311 : vector<8x8xf32>
    %cst_111 = arith.constant dense<0xFF800000> : vector<8xf32>
    %313 = vector.multi_reduction <maximumf>, %312, %cst_111 [1] : vector<8x8xf32> to vector<8xf32>
    %314 = vector.shape_cast %313 : vector<8xf32> to vector<8x1xf32>
    %315 = vector.broadcast %314 : vector<8x1xf32> to vector<8x8xf32>
    %316 = arith.subf %312, %315 : vector<8x8xf32>
    %317 = math.exp %316 : vector<8x8xf32>
    %cst_112 = arith.constant dense<0.000000e+00> : vector<8xf32>
    %318 = vector.multi_reduction <add>, %317, %cst_112 [1] : vector<8x8xf32> to vector<8xf32>
    %319 = vector.shape_cast %318 : vector<8xf32> to vector<8x1xf32>
    %320 = tpu.reciprocal %319 {approx = true} : vector<8x1xf32> -> vector<8x1xf32>
    %321 = vector.broadcast %320 : vector<8x1xf32> to vector<8x8xf32>
    %322 = arith.mulf %317, %321 : vector<8x8xf32>
    %cst_113 = arith.constant dense<0.000000e+00> : vector<8x8xf32>
    %323 = tpu.matmul %322, %308, %cst_113 {dimension_numbers = #tpu.dot_dimension_numbers<[1], [0], [0], [1], [0, 0, 1, 1], [], []>} : vector<8x8xf32>, vector<8x8xf32>, vector<8x8xf32> -> vector<8x8xf32>
    %324 = vector.extract_strided_slice %303 {offsets = [8, 0], sizes = [8, 8], strides = [1, 1]} : vector<16x8xf32> to vector<8x8xf32>
    %325 = vector.extract_strided_slice %304 {offsets = [8, 0], sizes = [8, 8], strides = [1, 1]} : vector<16x8xf32> to vector<8x8xf32>
    %326 = vector.extract_strided_slice %305 {offsets = [8, 0], sizes = [8, 8], strides = [1, 1]} : vector<16x8xf32> to vector<8x8xf32>
    %cst_114 = arith.constant dense<0.000000e+00> : vector<8x8xf32>
    %327 = tpu.matmul %324, %325, %cst_114 {dimension_numbers = #tpu.dot_dimension_numbers<[1], [1], [0], [0], [0, 0, 1, 0], [], []>} : vector<8x8xf32>, vector<8x8xf32>, vector<8x8xf32> -> vector<8x8xf32>
    %328 = vector.extract_strided_slice %29 {offsets = [1, 0], sizes = [1, 8], strides = [1, 1]} : vector<2x8xf32> to vector<1x8xf32>
    %329 = vector.broadcast %328 : vector<1x8xf32> to vector<8x8xf32>
    %330 = arith.addf %327, %329 : vector<8x8xf32>
    %cst_115 = arith.constant dense<0xFF800000> : vector<8xf32>
    %331 = vector.multi_reduction <maximumf>, %330, %cst_115 [1] : vector<8x8xf32> to vector<8xf32>
    %332 = vector.shape_cast %331 : vector<8xf32> to vector<8x1xf32>
    %333 = vector.broadcast %332 : vector<8x1xf32> to vector<8x8xf32>
    %334 = arith.subf %330, %333 : vector<8x8xf32>
    %335 = math.exp %334 : vector<8x8xf32>
    %cst_116 = arith.constant dense<0.000000e+00> : vector<8xf32>
    %336 = vector.multi_reduction <add>, %335, %cst_116 [1] : vector<8x8xf32> to vector<8xf32>
    %337 = vector.shape_cast %336 : vector<8xf32> to vector<8x1xf32>
    %338 = tpu.reciprocal %337 {approx = true} : vector<8x1xf32> -> vector<8x1xf32>
    %339 = vector.broadcast %338 : vector<8x1xf32> to vector<8x8xf32>
    %340 = arith.mulf %335, %339 : vector<8x8xf32>
    %cst_117 = arith.constant dense<0.000000e+00> : vector<8x8xf32>
    %341 = tpu.matmul %340, %326, %cst_117 {dimension_numbers = #tpu.dot_dimension_numbers<[1], [0], [0], [1], [0, 0, 1, 1], [], []>} : vector<8x8xf32>, vector<8x8xf32>, vector<8x8xf32> -> vector<8x8xf32>
    %342 = tpu.concatenate %323, %341 in 0 : vector<8x8xf32>, vector<8x8xf32> -> vector<16x8xf32>
    %343 = vector.extract_strided_slice %300 {offsets = [0, 8], sizes = [16, 8], strides = [1, 1]} : vector<16x96xf32> to vector<16x8xf32>
    %cst_118 = arith.constant 0.353553385 : f32
    %344 = vector.broadcast %cst_118 : f32 to vector<16x8xf32>
    %345 = arith.mulf %343, %344 : vector<16x8xf32>
    %346 = vector.extract_strided_slice %300 {offsets = [0, 40], sizes = [16, 8], strides = [1, 1]} : vector<16x96xf32> to vector<16x8xf32>
    %347 = vector.extract_strided_slice %300 {offsets = [0, 72], sizes = [16, 8], strides = [1, 1]} : vector<16x96xf32> to vector<16x8xf32>
    %348 = vector.extract_strided_slice %345 {offsets = [0, 0], sizes = [8, 8], strides = [1, 1]} : vector<16x8xf32> to vector<8x8xf32>
    %349 = vector.extract_strided_slice %346 {offsets = [0, 0], sizes = [8, 8], strides = [1, 1]} : vector<16x8xf32> to vector<8x8xf32>
    %350 = vector.extract_strided_slice %347 {offsets = [0, 0], sizes = [8, 8], strides = [1, 1]} : vector<16x8xf32> to vector<8x8xf32>
    %cst_119 = arith.constant dense<0.000000e+00> : vector<8x8xf32>
    %351 = tpu.matmul %348, %349, %cst_119 {dimension_numbers = #tpu.dot_dimension_numbers<[1], [1], [0], [0], [0, 0, 1, 0], [], []>} : vector<8x8xf32>, vector<8x8xf32>, vector<8x8xf32> -> vector<8x8xf32>
    %352 = vector.extract_strided_slice %29 {offsets = [0, 0], sizes = [1, 8], strides = [1, 1]} : vector<2x8xf32> to vector<1x8xf32>
    %353 = vector.broadcast %352 : vector<1x8xf32> to vector<8x8xf32>
    %354 = arith.addf %351, %353 : vector<8x8xf32>
    %cst_120 = arith.constant dense<0xFF800000> : vector<8xf32>
    %355 = vector.multi_reduction <maximumf>, %354, %cst_120 [1] : vector<8x8xf32> to vector<8xf32>
    %356 = vector.shape_cast %355 : vector<8xf32> to vector<8x1xf32>
    %357 = vector.broadcast %356 : vector<8x1xf32> to vector<8x8xf32>
    %358 = arith.subf %354, %357 : vector<8x8xf32>
    %359 = math.exp %358 : vector<8x8xf32>
    %cst_121 = arith.constant dense<0.000000e+00> : vector<8xf32>
    %360 = vector.multi_reduction <add>, %359, %cst_121 [1] : vector<8x8xf32> to vector<8xf32>
    %361 = vector.shape_cast %360 : vector<8xf32> to vector<8x1xf32>
    %362 = tpu.reciprocal %361 {approx = true} : vector<8x1xf32> -> vector<8x1xf32>
    %363 = vector.broadcast %362 : vector<8x1xf32> to vector<8x8xf32>
    %364 = arith.mulf %359, %363 : vector<8x8xf32>
    %cst_122 = arith.constant dense<0.000000e+00> : vector<8x8xf32>
    %365 = tpu.matmul %364, %350, %cst_122 {dimension_numbers = #tpu.dot_dimension_numbers<[1], [0], [0], [1], [0, 0, 1, 1], [], []>} : vector<8x8xf32>, vector<8x8xf32>, vector<8x8xf32> -> vector<8x8xf32>
    %366 = vector.extract_strided_slice %345 {offsets = [8, 0], sizes = [8, 8], strides = [1, 1]} : vector<16x8xf32> to vector<8x8xf32>
    %367 = vector.extract_strided_slice %346 {offsets = [8, 0], sizes = [8, 8], strides = [1, 1]} : vector<16x8xf32> to vector<8x8xf32>
    %368 = vector.extract_strided_slice %347 {offsets = [8, 0], sizes = [8, 8], strides = [1, 1]} : vector<16x8xf32> to vector<8x8xf32>
    %cst_123 = arith.constant dense<0.000000e+00> : vector<8x8xf32>
    %369 = tpu.matmul %366, %367, %cst_123 {dimension_numbers = #tpu.dot_dimension_numbers<[1], [1], [0], [0], [0, 0, 1, 0], [], []>} : vector<8x8xf32>, vector<8x8xf32>, vector<8x8xf32> -> vector<8x8xf32>
    %370 = vector.extract_strided_slice %29 {offsets = [1, 0], sizes = [1, 8], strides = [1, 1]} : vector<2x8xf32> to vector<1x8xf32>
    %371 = vector.broadcast %370 : vector<1x8xf32> to vector<8x8xf32>
    %372 = arith.addf %369, %371 : vector<8x8xf32>
    %cst_124 = arith.constant dense<0xFF800000> : vector<8xf32>
    %373 = vector.multi_reduction <maximumf>, %372, %cst_124 [1] : vector<8x8xf32> to vector<8xf32>
    %374 = vector.shape_cast %373 : vector<8xf32> to vector<8x1xf32>
    %375 = vector.broadcast %374 : vector<8x1xf32> to vector<8x8xf32>
    %376 = arith.subf %372, %375 : vector<8x8xf32>
    %377 = math.exp %376 : vector<8x8xf32>
    %cst_125 = arith.constant dense<0.000000e+00> : vector<8xf32>
    %378 = vector.multi_reduction <add>, %377, %cst_125 [1] : vector<8x8xf32> to vector<8xf32>
    %379 = vector.shape_cast %378 : vector<8xf32> to vector<8x1xf32>
    %380 = tpu.reciprocal %379 {approx = true} : vector<8x1xf32> -> vector<8x1xf32>
    %381 = vector.broadcast %380 : vector<8x1xf32> to vector<8x8xf32>
    %382 = arith.mulf %377, %381 : vector<8x8xf32>
    %cst_126 = arith.constant dense<0.000000e+00> : vector<8x8xf32>
    %383 = tpu.matmul %382, %368, %cst_126 {dimension_numbers = #tpu.dot_dimension_numbers<[1], [0], [0], [1], [0, 0, 1, 1], [], []>} : vector<8x8xf32>, vector<8x8xf32>, vector<8x8xf32> -> vector<8x8xf32>
    %384 = tpu.concatenate %365, %383 in 0 : vector<8x8xf32>, vector<8x8xf32> -> vector<16x8xf32>
    %385 = vector.extract_strided_slice %300 {offsets = [0, 16], sizes = [16, 8], strides = [1, 1]} : vector<16x96xf32> to vector<16x8xf32>
    %cst_127 = arith.constant 0.353553385 : f32
    %386 = vector.broadcast %cst_127 : f32 to vector<16x8xf32>
    %387 = arith.mulf %385, %386 : vector<16x8xf32>
    %388 = vector.extract_strided_slice %300 {offsets = [0, 48], sizes = [16, 8], strides = [1, 1]} : vector<16x96xf32> to vector<16x8xf32>
    %389 = vector.extract_strided_slice %300 {offsets = [0, 80], sizes = [16, 8], strides = [1, 1]} : vector<16x96xf32> to vector<16x8xf32>
    %390 = vector.extract_strided_slice %387 {offsets = [0, 0], sizes = [8, 8], strides = [1, 1]} : vector<16x8xf32> to vector<8x8xf32>
    %391 = vector.extract_strided_slice %388 {offsets = [0, 0], sizes = [8, 8], strides = [1, 1]} : vector<16x8xf32> to vector<8x8xf32>
    %392 = vector.extract_strided_slice %389 {offsets = [0, 0], sizes = [8, 8], strides = [1, 1]} : vector<16x8xf32> to vector<8x8xf32>
    %cst_128 = arith.constant dense<0.000000e+00> : vector<8x8xf32>
    %393 = tpu.matmul %390, %391, %cst_128 {dimension_numbers = #tpu.dot_dimension_numbers<[1], [1], [0], [0], [0, 0, 1, 0], [], []>} : vector<8x8xf32>, vector<8x8xf32>, vector<8x8xf32> -> vector<8x8xf32>
    %394 = vector.extract_strided_slice %29 {offsets = [0, 0], sizes = [1, 8], strides = [1, 1]} : vector<2x8xf32> to vector<1x8xf32>
    %395 = vector.broadcast %394 : vector<1x8xf32> to vector<8x8xf32>
    %396 = arith.addf %393, %395 : vector<8x8xf32>
    %cst_129 = arith.constant dense<0xFF800000> : vector<8xf32>
    %397 = vector.multi_reduction <maximumf>, %396, %cst_129 [1] : vector<8x8xf32> to vector<8xf32>
    %398 = vector.shape_cast %397 : vector<8xf32> to vector<8x1xf32>
    %399 = vector.broadcast %398 : vector<8x1xf32> to vector<8x8xf32>
    %400 = arith.subf %396, %399 : vector<8x8xf32>
    %401 = math.exp %400 : vector<8x8xf32>
    %cst_130 = arith.constant dense<0.000000e+00> : vector<8xf32>
    %402 = vector.multi_reduction <add>, %401, %cst_130 [1] : vector<8x8xf32> to vector<8xf32>
    %403 = vector.shape_cast %402 : vector<8xf32> to vector<8x1xf32>
    %404 = tpu.reciprocal %403 {approx = true} : vector<8x1xf32> -> vector<8x1xf32>
    %405 = vector.broadcast %404 : vector<8x1xf32> to vector<8x8xf32>
    %406 = arith.mulf %401, %405 : vector<8x8xf32>
    %cst_131 = arith.constant dense<0.000000e+00> : vector<8x8xf32>
    %407 = tpu.matmul %406, %392, %cst_131 {dimension_numbers = #tpu.dot_dimension_numbers<[1], [0], [0], [1], [0, 0, 1, 1], [], []>} : vector<8x8xf32>, vector<8x8xf32>, vector<8x8xf32> -> vector<8x8xf32>
    %408 = vector.extract_strided_slice %387 {offsets = [8, 0], sizes = [8, 8], strides = [1, 1]} : vector<16x8xf32> to vector<8x8xf32>
    %409 = vector.extract_strided_slice %388 {offsets = [8, 0], sizes = [8, 8], strides = [1, 1]} : vector<16x8xf32> to vector<8x8xf32>
    %410 = vector.extract_strided_slice %389 {offsets = [8, 0], sizes = [8, 8], strides = [1, 1]} : vector<16x8xf32> to vector<8x8xf32>
    %cst_132 = arith.constant dense<0.000000e+00> : vector<8x8xf32>
    %411 = tpu.matmul %408, %409, %cst_132 {dimension_numbers = #tpu.dot_dimension_numbers<[1], [1], [0], [0], [0, 0, 1, 0], [], []>} : vector<8x8xf32>, vector<8x8xf32>, vector<8x8xf32> -> vector<8x8xf32>
    %412 = vector.extract_strided_slice %29 {offsets = [1, 0], sizes = [1, 8], strides = [1, 1]} : vector<2x8xf32> to vector<1x8xf32>
    %413 = vector.broadcast %412 : vector<1x8xf32> to vector<8x8xf32>
    %414 = arith.addf %411, %413 : vector<8x8xf32>
    %cst_133 = arith.constant dense<0xFF800000> : vector<8xf32>
    %415 = vector.multi_reduction <maximumf>, %414, %cst_133 [1] : vector<8x8xf32> to vector<8xf32>
    %416 = vector.shape_cast %415 : vector<8xf32> to vector<8x1xf32>
    %417 = vector.broadcast %416 : vector<8x1xf32> to vector<8x8xf32>
    %418 = arith.subf %414, %417 : vector<8x8xf32>
    %419 = math.exp %418 : vector<8x8xf32>
    %cst_134 = arith.constant dense<0.000000e+00> : vector<8xf32>
    %420 = vector.multi_reduction <add>, %419, %cst_134 [1] : vector<8x8xf32> to vector<8xf32>
    %421 = vector.shape_cast %420 : vector<8xf32> to vector<8x1xf32>
    %422 = tpu.reciprocal %421 {approx = true} : vector<8x1xf32> -> vector<8x1xf32>
    %423 = vector.broadcast %422 : vector<8x1xf32> to vector<8x8xf32>
    %424 = arith.mulf %419, %423 : vector<8x8xf32>
    %cst_135 = arith.constant dense<0.000000e+00> : vector<8x8xf32>
    %425 = tpu.matmul %424, %410, %cst_135 {dimension_numbers = #tpu.dot_dimension_numbers<[1], [0], [0], [1], [0, 0, 1, 1], [], []>} : vector<8x8xf32>, vector<8x8xf32>, vector<8x8xf32> -> vector<8x8xf32>
    %426 = tpu.concatenate %407, %425 in 0 : vector<8x8xf32>, vector<8x8xf32> -> vector<16x8xf32>
    %427 = vector.extract_strided_slice %300 {offsets = [0, 24], sizes = [16, 8], strides = [1, 1]} : vector<16x96xf32> to vector<16x8xf32>
    %cst_136 = arith.constant 0.353553385 : f32
    %428 = vector.broadcast %cst_136 : f32 to vector<16x8xf32>
    %429 = arith.mulf %427, %428 : vector<16x8xf32>
    %430 = vector.extract_strided_slice %300 {offsets = [0, 56], sizes = [16, 8], strides = [1, 1]} : vector<16x96xf32> to vector<16x8xf32>
    %431 = vector.extract_strided_slice %300 {offsets = [0, 88], sizes = [16, 8], strides = [1, 1]} : vector<16x96xf32> to vector<16x8xf32>
    %432 = vector.extract_strided_slice %429 {offsets = [0, 0], sizes = [8, 8], strides = [1, 1]} : vector<16x8xf32> to vector<8x8xf32>
    %433 = vector.extract_strided_slice %430 {offsets = [0, 0], sizes = [8, 8], strides = [1, 1]} : vector<16x8xf32> to vector<8x8xf32>
    %434 = vector.extract_strided_slice %431 {offsets = [0, 0], sizes = [8, 8], strides = [1, 1]} : vector<16x8xf32> to vector<8x8xf32>
    %cst_137 = arith.constant dense<0.000000e+00> : vector<8x8xf32>
    %435 = tpu.matmul %432, %433, %cst_137 {dimension_numbers = #tpu.dot_dimension_numbers<[1], [1], [0], [0], [0, 0, 1, 0], [], []>} : vector<8x8xf32>, vector<8x8xf32>, vector<8x8xf32> -> vector<8x8xf32>
    %436 = vector.extract_strided_slice %29 {offsets = [0, 0], sizes = [1, 8], strides = [1, 1]} : vector<2x8xf32> to vector<1x8xf32>
    %437 = vector.broadcast %436 : vector<1x8xf32> to vector<8x8xf32>
    %438 = arith.addf %435, %437 : vector<8x8xf32>
    %cst_138 = arith.constant dense<0xFF800000> : vector<8xf32>
    %439 = vector.multi_reduction <maximumf>, %438, %cst_138 [1] : vector<8x8xf32> to vector<8xf32>
    %440 = vector.shape_cast %439 : vector<8xf32> to vector<8x1xf32>
    %441 = vector.broadcast %440 : vector<8x1xf32> to vector<8x8xf32>
    %442 = arith.subf %438, %441 : vector<8x8xf32>
    %443 = math.exp %442 : vector<8x8xf32>
    %cst_139 = arith.constant dense<0.000000e+00> : vector<8xf32>
    %444 = vector.multi_reduction <add>, %443, %cst_139 [1] : vector<8x8xf32> to vector<8xf32>
    %445 = vector.shape_cast %444 : vector<8xf32> to vector<8x1xf32>
    %446 = tpu.reciprocal %445 {approx = true} : vector<8x1xf32> -> vector<8x1xf32>
    %447 = vector.broadcast %446 : vector<8x1xf32> to vector<8x8xf32>
    %448 = arith.mulf %443, %447 : vector<8x8xf32>
    %cst_140 = arith.constant dense<0.000000e+00> : vector<8x8xf32>
    %449 = tpu.matmul %448, %434, %cst_140 {dimension_numbers = #tpu.dot_dimension_numbers<[1], [0], [0], [1], [0, 0, 1, 1], [], []>} : vector<8x8xf32>, vector<8x8xf32>, vector<8x8xf32> -> vector<8x8xf32>
    %450 = vector.extract_strided_slice %429 {offsets = [8, 0], sizes = [8, 8], strides = [1, 1]} : vector<16x8xf32> to vector<8x8xf32>
    %451 = vector.extract_strided_slice %430 {offsets = [8, 0], sizes = [8, 8], strides = [1, 1]} : vector<16x8xf32> to vector<8x8xf32>
    %452 = vector.extract_strided_slice %431 {offsets = [8, 0], sizes = [8, 8], strides = [1, 1]} : vector<16x8xf32> to vector<8x8xf32>
    %cst_141 = arith.constant dense<0.000000e+00> : vector<8x8xf32>
    %453 = tpu.matmul %450, %451, %cst_141 {dimension_numbers = #tpu.dot_dimension_numbers<[1], [1], [0], [0], [0, 0, 1, 0], [], []>} : vector<8x8xf32>, vector<8x8xf32>, vector<8x8xf32> -> vector<8x8xf32>
    %454 = vector.extract_strided_slice %29 {offsets = [1, 0], sizes = [1, 8], strides = [1, 1]} : vector<2x8xf32> to vector<1x8xf32>
    %455 = vector.broadcast %454 : vector<1x8xf32> to vector<8x8xf32>
    %456 = arith.addf %453, %455 : vector<8x8xf32>
    %cst_142 = arith.constant dense<0xFF800000> : vector<8xf32>
    %457 = vector.multi_reduction <maximumf>, %456, %cst_142 [1] : vector<8x8xf32> to vector<8xf32>
    %458 = vector.shape_cast %457 : vector<8xf32> to vector<8x1xf32>
    %459 = vector.broadcast %458 : vector<8x1xf32> to vector<8x8xf32>
    %460 = arith.subf %456, %459 : vector<8x8xf32>
    %461 = math.exp %460 : vector<8x8xf32>
    %cst_143 = arith.constant dense<0.000000e+00> : vector<8xf32>
    %462 = vector.multi_reduction <add>, %461, %cst_143 [1] : vector<8x8xf32> to vector<8xf32>
    %463 = vector.shape_cast %462 : vector<8xf32> to vector<8x1xf32>
    %464 = tpu.reciprocal %463 {approx = true} : vector<8x1xf32> -> vector<8x1xf32>
    %465 = vector.broadcast %464 : vector<8x1xf32> to vector<8x8xf32>
    %466 = arith.mulf %461, %465 : vector<8x8xf32>
    %cst_144 = arith.constant dense<0.000000e+00> : vector<8x8xf32>
    %467 = tpu.matmul %466, %452, %cst_144 {dimension_numbers = #tpu.dot_dimension_numbers<[1], [0], [0], [1], [0, 0, 1, 1], [], []>} : vector<8x8xf32>, vector<8x8xf32>, vector<8x8xf32> -> vector<8x8xf32>
    %468 = tpu.concatenate %449, %467 in 0 : vector<8x8xf32>, vector<8x8xf32> -> vector<16x8xf32>
    %469 = tpu.concatenate %342, %384, %426, %468 in 1 : vector<16x8xf32>, vector<16x8xf32>, vector<16x8xf32>, vector<16x8xf32> -> vector<16x32xf32>
    %c1_145 = arith.constant 1 : index
    %c0_146 = arith.constant 0 : index
    %c0_147 = arith.constant 0 : index
    %470 = vector.load %arg7[%c1_145, %c0_146, %c0_147] : memref<2x32x32xf32, #tpu.memory_space<vmem>>, vector<1x32x32xf32>
    %471 = vector.shape_cast %470 : vector<1x32x32xf32> to vector<32x32xf32>
    %cst_148 = arith.constant dense<0.000000e+00> : vector<16x32xf32>
    %472 = tpu.matmul %469, %471, %cst_148 {dimension_numbers = #tpu.dot_dimension_numbers<[1], [0], [0], [1], [0, 0, 1, 1], [], []>} : vector<16x32xf32>, vector<32x32xf32>, vector<16x32xf32> -> vector<16x32xf32>
    %c1_149 = arith.constant 1 : index
    %c0_150 = arith.constant 0 : index
    %c0_151 = arith.constant 0 : index
    %473 = vector.load %arg8[%c1_149, %c0_150, %c0_151] : memref<2x1x32xf32, #tpu.memory_space<vmem>>, vector<1x1x32xf32>
    %474 = vector.shape_cast %473 : vector<1x1x32xf32> to vector<1x32xf32>
    %475 = vector.broadcast %474 : vector<1x32xf32> to vector<16x32xf32>
    %476 = arith.addf %472, %475 : vector<16x32xf32>
    %477 = arith.addf %476, %293 : vector<16x32xf32>
    %c1_152 = arith.constant 1 : index
    %c0_153 = arith.constant 0 : index
    %c0_154 = arith.constant 0 : index
    %478 = vector.load %arg9[%c1_152, %c0_153, %c0_154] : memref<2x1x32xf32, #tpu.memory_space<vmem>>, vector<1x1x32xf32>
    %479 = vector.shape_cast %478 : vector<1x1x32xf32> to vector<1x32xf32>
    %c1_155 = arith.constant 1 : index
    %c0_156 = arith.constant 0 : index
    %c0_157 = arith.constant 0 : index
    %480 = vector.load %arg10[%c1_155, %c0_156, %c0_157] : memref<2x1x32xf32, #tpu.memory_space<vmem>>, vector<1x1x32xf32>
    %481 = vector.shape_cast %480 : vector<1x1x32xf32> to vector<1x32xf32>
    %cst_158 = arith.constant dense<0.000000e+00> : vector<16xf32>
    %482 = vector.multi_reduction <add>, %477, %cst_158 [1] : vector<16x32xf32> to vector<16xf32>
    %483 = vector.shape_cast %482 : vector<16xf32> to vector<16x1xf32>
    %cst_159 = arith.constant 3.200000e+01 : f32
    %484 = vector.broadcast %cst_159 : f32 to vector<16x1xf32>
    %485 = arith.divf %483, %484 : vector<16x1xf32>
    %486 = vector.broadcast %485 : vector<16x1xf32> to vector<16x32xf32>
    %487 = arith.subf %477, %486 : vector<16x32xf32>
    %488 = arith.mulf %487, %487 : vector<16x32xf32>
    %cst_160 = arith.constant dense<0.000000e+00> : vector<16xf32>
    %489 = vector.multi_reduction <add>, %488, %cst_160 [1] : vector<16x32xf32> to vector<16xf32>
    %490 = vector.shape_cast %489 : vector<16xf32> to vector<16x1xf32>
    %cst_161 = arith.constant 3.200000e+01 : f32
    %491 = vector.broadcast %cst_161 : f32 to vector<16x1xf32>
    %492 = arith.divf %490, %491 : vector<16x1xf32>
    %493 = vector.broadcast %485 : vector<16x1xf32> to vector<16x32xf32>
    %494 = arith.subf %477, %493 : vector<16x32xf32>
    %cst_162 = arith.constant 9.99999996E-13 : f32
    %495 = vector.broadcast %cst_162 : f32 to vector<16x1xf32>
    %496 = arith.addf %492, %495 : vector<16x1xf32>
    %497 = math.rsqrt %496 : vector<16x1xf32>
    %498 = vector.broadcast %497 : vector<16x1xf32> to vector<16x32xf32>
    %499 = arith.mulf %494, %498 : vector<16x32xf32>
    %500 = vector.broadcast %479 : vector<1x32xf32> to vector<16x32xf32>
    %501 = arith.mulf %499, %500 : vector<16x32xf32>
    %502 = vector.broadcast %481 : vector<1x32xf32> to vector<16x32xf32>
    %503 = arith.addf %501, %502 : vector<16x32xf32>
    %c1_163 = arith.constant 1 : index
    %c0_164 = arith.constant 0 : index
    %c0_165 = arith.constant 0 : index
    %504 = vector.load %arg11[%c1_163, %c0_164, %c0_165] : memref<2x32x64xf32, #tpu.memory_space<vmem>>, vector<1x32x64xf32>
    %505 = vector.shape_cast %504 : vector<1x32x64xf32> to vector<32x64xf32>
    %cst_166 = arith.constant dense<0.000000e+00> : vector<16x64xf32>
    %506 = tpu.matmul %503, %505, %cst_166 {dimension_numbers = #tpu.dot_dimension_numbers<[1], [0], [0], [1], [0, 0, 1, 1], [], []>} : vector<16x32xf32>, vector<32x64xf32>, vector<16x64xf32> -> vector<16x64xf32>
    %c1_167 = arith.constant 1 : index
    %c0_168 = arith.constant 0 : index
    %c0_169 = arith.constant 0 : index
    %507 = vector.load %arg12[%c1_167, %c0_168, %c0_169] : memref<2x1x64xf32, #tpu.memory_space<vmem>>, vector<1x1x64xf32>
    %508 = vector.shape_cast %507 : vector<1x1x64xf32> to vector<1x64xf32>
    %509 = vector.broadcast %508 : vector<1x64xf32> to vector<16x64xf32>
    %510 = arith.addf %506, %509 : vector<16x64xf32>
    %cst_170 = arith.constant 5.000000e-01 : f32
    %511 = vector.broadcast %cst_170 : f32 to vector<16x64xf32>
    %512 = arith.mulf %511, %510 : vector<16x64xf32>
    %cst_171 = arith.constant 4.471500e-02 : f32
    %513 = vector.broadcast %cst_171 : f32 to vector<16x64xf32>
    %514 = arith.mulf %513, %510 : vector<16x64xf32>
    %515 = arith.mulf %514, %510 : vector<16x64xf32>
    %516 = arith.mulf %515, %510 : vector<16x64xf32>
    %517 = arith.addf %510, %516 : vector<16x64xf32>
    %cst_172 = arith.constant 0.797884583 : f32
    %518 = vector.broadcast %cst_172 : f32 to vector<16x64xf32>
    %519 = arith.mulf %518, %517 : vector<16x64xf32>
    %520 = math.tanh %519 : vector<16x64xf32>
    %cst_173 = arith.constant 1.000000e+00 : f32
    %521 = vector.broadcast %cst_173 : f32 to vector<16x64xf32>
    %522 = arith.addf %521, %520 : vector<16x64xf32>
    %523 = arith.mulf %512, %522 : vector<16x64xf32>
    %c1_174 = arith.constant 1 : index
    %c0_175 = arith.constant 0 : index
    %c0_176 = arith.constant 0 : index
    %524 = vector.load %arg13[%c1_174, %c0_175, %c0_176] : memref<2x64x32xf32, #tpu.memory_space<vmem>>, vector<1x64x32xf32>
    %525 = vector.shape_cast %524 : vector<1x64x32xf32> to vector<64x32xf32>
    %cst_177 = arith.constant dense<0.000000e+00> : vector<16x32xf32>
    %526 = tpu.matmul %523, %525, %cst_177 {dimension_numbers = #tpu.dot_dimension_numbers<[1], [0], [0], [1], [0, 0, 1, 1], [], []>} : vector<16x64xf32>, vector<64x32xf32>, vector<16x32xf32> -> vector<16x32xf32>
    %c1_178 = arith.constant 1 : index
    %c0_179 = arith.constant 0 : index
    %c0_180 = arith.constant 0 : index
    %527 = vector.load %arg14[%c1_178, %c0_179, %c0_180] : memref<2x1x32xf32, #tpu.memory_space<vmem>>, vector<1x1x32xf32>
    %528 = vector.shape_cast %527 : vector<1x1x32xf32> to vector<1x32xf32>
    %529 = vector.broadcast %528 : vector<1x32xf32> to vector<16x32xf32>
    %530 = arith.addf %526, %529 : vector<16x32xf32>
    %531 = arith.addf %530, %503 : vector<16x32xf32>
    %c1_181 = arith.constant 1 : index
    %c0_182 = arith.constant 0 : index
    %c0_183 = arith.constant 0 : index
    %532 = vector.load %arg15[%c1_181, %c0_182, %c0_183] : memref<2x1x32xf32, #tpu.memory_space<vmem>>, vector<1x1x32xf32>
    %533 = vector.shape_cast %532 : vector<1x1x32xf32> to vector<1x32xf32>
    %c1_184 = arith.constant 1 : index
    %c0_185 = arith.constant 0 : index
    %c0_186 = arith.constant 0 : index
    %534 = vector.load %arg16[%c1_184, %c0_185, %c0_186] : memref<2x1x32xf32, #tpu.memory_space<vmem>>, vector<1x1x32xf32>
    %535 = vector.shape_cast %534 : vector<1x1x32xf32> to vector<1x32xf32>
    %cst_187 = arith.constant dense<0.000000e+00> : vector<16xf32>
    %536 = vector.multi_reduction <add>, %531, %cst_187 [1] : vector<16x32xf32> to vector<16xf32>
    %537 = vector.shape_cast %536 : vector<16xf32> to vector<16x1xf32>
    %cst_188 = arith.constant 3.200000e+01 : f32
    %538 = vector.broadcast %cst_188 : f32 to vector<16x1xf32>
    %539 = arith.divf %537, %538 : vector<16x1xf32>
    %540 = vector.broadcast %539 : vector<16x1xf32> to vector<16x32xf32>
    %541 = arith.subf %531, %540 : vector<16x32xf32>
    %542 = arith.mulf %541, %541 : vector<16x32xf32>
    %cst_189 = arith.constant dense<0.000000e+00> : vector<16xf32>
    %543 = vector.multi_reduction <add>, %542, %cst_189 [1] : vector<16x32xf32> to vector<16xf32>
    %544 = vector.shape_cast %543 : vector<16xf32> to vector<16x1xf32>
    %cst_190 = arith.constant 3.200000e+01 : f32
    %545 = vector.broadcast %cst_190 : f32 to vector<16x1xf32>
    %546 = arith.divf %544, %545 : vector<16x1xf32>
    %547 = vector.broadcast %539 : vector<16x1xf32> to vector<16x32xf32>
    %548 = arith.subf %531, %547 : vector<16x32xf32>
    %cst_191 = arith.constant 9.99999996E-13 : f32
    %549 = vector.broadcast %cst_191 : f32 to vector<16x1xf32>
    %550 = arith.addf %546, %549 : vector<16x1xf32>
    %551 = math.rsqrt %550 : vector<16x1xf32>
    %552 = vector.broadcast %551 : vector<16x1xf32> to vector<16x32xf32>
    %553 = arith.mulf %548, %552 : vector<16x32xf32>
    %554 = vector.broadcast %533 : vector<1x32xf32> to vector<16x32xf32>
    %555 = arith.mulf %553, %554 : vector<16x32xf32>
    %556 = vector.broadcast %535 : vector<1x32xf32> to vector<16x32xf32>
    %557 = arith.addf %555, %556 : vector<16x32xf32>
    %558 = vector.extract_strided_slice %557 {offsets = [0, 0], sizes = [1, 32], strides = [1, 1]} : vector<16x32xf32> to vector<1x32xf32>
    %559 = vector.extract_strided_slice %557 {offsets = [8, 0], sizes = [1, 32], strides = [1, 1]} : vector<16x32xf32> to vector<1x32xf32>
    %560 = tpu.concatenate %558, %559 in 0 : vector<1x32xf32>, vector<1x32xf32> -> vector<2x32xf32>
    %c0_192 = arith.constant 0 : index
    %c0_193 = arith.constant 0 : index
    %561 = vector.load %arg17[%c0_192, %c0_193] : memref<32x32xf32, #tpu.memory_space<vmem>>, vector<32x32xf32>
    %cst_194 = arith.constant dense<0.000000e+00> : vector<2x32xf32>
    %562 = tpu.matmul %560, %561, %cst_194 {dimension_numbers = #tpu.dot_dimension_numbers<[1], [0], [0], [1], [0, 0, 1, 1], [], []>} : vector<2x32xf32>, vector<32x32xf32>, vector<2x32xf32> -> vector<2x32xf32>
    %c0_195 = arith.constant 0 : index
    %c0_196 = arith.constant 0 : index
    %563 = vector.load %arg18[%c0_195, %c0_196] : memref<1x32xf32, #tpu.memory_space<vmem>>, vector<1x32xf32>
    %564 = vector.broadcast %563 : vector<1x32xf32> to vector<2x32xf32>
    %565 = arith.addf %562, %564 : vector<2x32xf32>
    %566 = math.tanh %565 : vector<2x32xf32>
    %c0_197 = arith.constant 0 : index
    %c0_198 = arith.constant 0 : index
    %567 = vector.load %arg19[%c0_197, %c0_198] : memref<32x3xf32, #tpu.memory_space<vmem>>, vector<32x3xf32>
    %cst_199 = arith.constant dense<0.000000e+00> : vector<2x3xf32>
    %568 = tpu.matmul %566, %567, %cst_199 {dimension_numbers = #tpu.dot_dimension_numbers<[1], [0], [0], [1], [0, 0, 1, 1], [], []>} : vector<2x32xf32>, vector<32x3xf32>, vector<2x3xf32> -> vector<2x3xf32>
    %c0_200 = arith.constant 0 : index
    %c0_201 = arith.constant 0 : index
    %569 = vector.load %arg20[%c0_200, %c0_201] : memref<1x3xf32, #tpu.memory_space<vmem>>, vector<1x3xf32>
    %570 = vector.broadcast %569 : vector<1x3xf32> to vector<2x3xf32>
    %571 = arith.addf %568, %570 : vector<2x3xf32>
    %c0_202 = arith.constant 0 : index
    %c0_203 = arith.constant 0 : index
    %572 = vector.load %arg21[%c0_202, %c0_203] : memref<2x3xf32, #tpu.memory_space<vmem>>, vector<2x3xf32>
    tpu.vector_store %arg21[%c0_202, %c0_203], %571 {strides = array<i32>} : memref<2x3xf32, #tpu.memory_space<vmem>>, vector<2x3xf32>,
    return
  }
  func.func @transform_0(%arg0: i32) -> (i32, i32) {
    %c0_i32 = arith.constant 0 : i32
    %c0_i32_0 = arith.constant 0 : i32
    %c0_i32_1 = arith.constant 0 : i32
    return %c0_i32, %c0_i32_0 : i32, i32
  }
  func.func @transform_1(%arg0: i32) -> (i32, i32) {
    %c0_i32 = arith.constant 0 : i32
    %c0_i32_0 = arith.constant 0 : i32
    %c0_i32_1 = arith.constant 0 : i32
    return %c0_i32, %c0_i32_0 : i32, i32
  }
  func.func @transform_2(%arg0: i32) -> (i32, i32) {
    %c0_i32 = arith.constant 0 : i32
    %c0_i32_0 = arith.constant 0 : i32
    %c0_i32_1 = arith.constant 0 : i32
    return %c0_i32, %c0_i32_0 : i32, i32
  }
  func.func @transform_3(%arg0: i32) -> (i32, i32) {
    %c0_i32 = arith.constant 0 : i32
    %c0_i32_0 = arith.constant 0 : i32
    %c0_i32_1 = arith.constant 0 : i32
    return %c0_i32, %c0_i32_0 : i32, i32
  }
  func.func @transform_4(%arg0: i32) -> (i32, i32, i32) {
    %c0_i32 = arith.constant 0 : i32
    %c0_i32_0 = arith.constant 0 : i32
    %c0_i32_1 = arith.constant 0 : i32
    %c0_i32_2 = arith.constant 0 : i32
    return %c0_i32, %c0_i32_0, %c0_i32_1 : i32, i32, i32
  }
  func.func @transform_5(%arg0: i32) -> (i32, i32, i32) {
    %c0_i32 = arith.constant 0 : i32
    %c0_i32_0 = arith.constant 0 : i32
    %c0_i32_1 = arith.constant 0 : i32
    %c0_i32_2 = arith.constant 0 : i32
    return %c0_i32, %c0_i32_0, %c0_i32_1 : i32, i32, i32
  }
  func.func @transform_6(%arg0: i32) -> (i32, i32, i32) {
    %c0_i32 = arith.constant 0 : i32
    %c0_i32_0 = arith.constant 0 : i32
    %c0_i32_1 = arith.constant 0 : i32
    %c0_i32_2 = arith.constant 0 : i32
    return %c0_i32, %c0_i32_0, %c0_i32_1 : i32, i32, i32
  }
  func.func @transform_7(%arg0: i32) -> (i32, i32, i32) {
    %c0_i32 = arith.constant 0 : i32
    %c0_i32_0 = arith.constant 0 : i32
    %c0_i32_1 = arith.constant 0 : i32
    %c0_i32_2 = arith.constant 0 : i32
    return %c0_i32, %c0_i32_0, %c0_i32_1 : i32, i32, i32
  }
  func.func @transform_8(%arg0: i32) -> (i32, i32, i32) {
    %c0_i32 = arith.constant 0 : i32
    %c0_i32_0 = arith.constant 0 : i32
    %c0_i32_1 = arith.constant 0 : i32
    %c0_i32_2 = arith.constant 0 : i32
    return %c0_i32, %c0_i32_0, %c0_i32_1 : i32, i32, i32
  }
  func.func @transform_9(%arg0: i32) -> (i32, i32, i32) {
    %c0_i32 = arith.constant 0 : i32
    %c0_i32_0 = arith.constant 0 : i32
    %c0_i32_1 = arith.constant 0 : i32
    %c0_i32_2 = arith.constant 0 : i32
    return %c0_i32, %c0_i32_0, %c0_i32_1 : i32, i32, i32
  }
  func.func @transform_10(%arg0: i32) -> (i32, i32, i32) {
    %c0_i32 = arith.constant 0 : i32
    %c0_i32_0 = arith.constant 0 : i32
    %c0_i32_1 = arith.constant 0 : i32
    %c0_i32_2 = arith.constant 0 : i32
    return %c0_i32, %c0_i32_0, %c0_i32_1 : i32, i32, i32
  }
  func.func @transform_11(%arg0: i32) -> (i32, i32, i32) {
    %c0_i32 = arith.constant 0 : i32
    %c0_i32_0 = arith.constant 0 : i32
    %c0_i32_1 = arith.constant 0 : i32
    %c0_i32_2 = arith.constant 0 : i32
    return %c0_i32, %c0_i32_0, %c0_i32_1 : i32, i32, i32
  }
  func.func @transform_12(%arg0: i32) -> (i32, i32, i32) {
    %c0_i32 = arith.constant 0 : i32
    %c0_i32_0 = arith.constant 0 : i32
    %c0_i32_1 = arith.constant 0 : i32
    %c0_i32_2 = arith.constant 0 : i32
    return %c0_i32, %c0_i32_0, %c0_i32_1 : i32, i32, i32
  }
  func.func @transform_13(%arg0: i32) -> (i32, i32, i32) {
    %c0_i32 = arith.constant 0 : i32
    %c0_i32_0 = arith.constant 0 : i32
    %c0_i32_1 = arith.constant 0 : i32
    %c0_i32_2 = arith.constant 0 : i32
    return %c0_i32, %c0_i32_0, %c0_i32_1 : i32, i32, i32
  }
  func.func @transform_14(%arg0: i32) -> (i32, i32, i32) {
    %c0_i32 = arith.constant 0 : i32
    %c0_i32_0 = arith.constant 0 : i32
    %c0_i32_1 = arith.constant 0 : i32
    %c0_i32_2 = arith.constant 0 : i32
    return %c0_i32, %c0_i32_0, %c0_i32_1 : i32, i32, i32
  }
  func.func @transform_15(%arg0: i32) -> (i32, i32, i32) {
    %c0_i32 = arith.constant 0 : i32
    %c0_i32_0 = arith.constant 0 : i32
    %c0_i32_1 = arith.constant 0 : i32
    %c0_i32_2 = arith.constant 0 : i32
    return %c0_i32, %c0_i32_0, %c0_i32_1 : i32, i32, i32
  }
  func.func @transform_16(%arg0: i32) -> (i32, i32) {
    %c0_i32 = arith.constant 0 : i32
    %c0_i32_0 = arith.constant 0 : i32
    %c0_i32_1 = arith.constant 0 : i32
    return %c0_i32, %c0_i32_0 : i32, i32
  }
  func.func @transform_17(%arg0: i32) -> (i32, i32) {
    %c0_i32 = arith.constant 0 : i32
    %c0_i32_0 = arith.constant 0 : i32
    %c0_i32_1 = arith.constant 0 : i32
    return %c0_i32, %c0_i32_0 : i32, i32
  }
  func.func @transform_18(%arg0: i32) -> (i32, i32) {
    %c0_i32 = arith.constant 0 : i32
    %c0_i32_0 = arith.constant 0 : i32
    %c0_i32_1 = arith.constant 0 : i32
    return %c0_i32, %c0_i32_0 : i32, i32
  }
  func.func @transform_19(%arg0: i32) -> (i32, i32) {
    %c0_i32 = arith.constant 0 : i32
    %c0_i32_0 = arith.constant 0 : i32
    %c0_i32_1 = arith.constant 0 : i32
    return %c0_i32, %c0_i32_0 : i32, i32
  }
  func.func @transform_20(%arg0: i32) -> (i32, i32) {
    %c0_i32 = arith.constant 0 : i32
    %c0_i32_0 = arith.constant 0 : i32
    %c0_i32_1 = arith.constant 0 : i32
    return %c0_i32, %c0_i32_0 : i32, i32
  }
}

</mosaic_0001>

<bundles_post_ra>
// kernel: rumor_detection_forward.1
= control target key start
LH: loop header
LB: loop body
LE: loop exit
PB: predicated region body
PF: predicated region fallthrough
CT: control target
= control target key end

     0   :  { %s5515_s0 = inlined_call_operand.vmem [shape: f32[16,32], index: 0, kind: input, shape index: {}]   ;;  %s5516_s1 = inlined_call_operand.vmem [shape: f32[2,8], index: 1, kind: input, shape index: {}]   ;;  %s5517_s2 = inlined_call_operand.vmem [shape: f32[1,32], index: 2, kind: input, shape index: {}]   ;;  %s5518_s3 = inlined_call_operand.vmem [shape: f32[1,32], index: 3, kind: input, shape index: {}]   ;;  %s5519_s4 = inlined_call_operand.vmem [shape: f32[2,32,96], index: 4, kind: input, shape index: {}]   ;;  %s5520_s5 = inlined_call_operand.vmem [shape: f32[2,1,96], index: 5, kind: input, shape index: {}]   ;;  %s5521_s6 = inlined_call_operand.vmem [shape: f32[2,32,32], index: 6, kind: input, shape index: {}]   ;;  %s5522_s7 = inlined_call_operand.vmem [shape: f32[2,1,32], index: 7, kind: input, shape index: {}]   ;;  %s5523_s8 = inlined_call_operand.vmem [shape: f32[2,1,32], index: 8, kind: input, shape index: {}]   ;;  %s5524_s9 = inlined_call_operand.vmem [shape: f32[2,1,32], index: 9, kind: input, shape index: {}]   ;;  %s5525_s10 = inlined_call_operand.vmem [shape: f32[2,32,64], index: 10, kind: input, shape index: {}]   ;;  %s5526_s11 = inlined_call_operand.vmem [shape: f32[2,1,64], index: 11, kind: input, shape index: {}]   ;;  %s5527_s12 = inlined_call_operand.vmem [shape: f32[2,64,32], index: 12, kind: input, shape index: {}]   ;;  %s5528_s13 = inlined_call_operand.vmem [shape: f32[2,1,32], index: 13, kind: input, shape index: {}]   ;;  %s5529_s14 = inlined_call_operand.vmem [shape: f32[2,1,32], index: 14, kind: input, shape index: {}]   ;;  %s5530_s15 = inlined_call_operand.vmem [shape: f32[2,1,32], index: 15, kind: input, shape index: {}]   ;;  %s5531_s16 = inlined_call_operand.vmem [shape: f32[32,32], index: 16, kind: input, shape index: {}]   ;;  %s5532_s17 = inlined_call_operand.vmem [shape: f32[1,32], index: 17, kind: input, shape index: {}]   ;;  %s5533_s18 = inlined_call_operand.vmem [shape: f32[32,3], index: 18, kind: input, shape index: {}]   ;;  %s5534_s19 = inlined_call_operand.vmem [shape: f32[1,3], index: 19, kind: input, shape index: {}]   ;;  %s5535_s20 = inlined_call_operand.hbm [shape: f32[2,3], index: 20, kind: output, shape index: {}]  }
   0x1   :  { %5558 = sst [smem:[#allocation5_spill]] %s5515_s0 }
   0x2   :  { %5559 = sst [smem:[#allocation6_spill]] %s5516_s1 }
   0x3   :  { %5560 = sst [smem:[#allocation7_spill]] %s5517_s2 }
   0x4   :  { %5561 = sst [smem:[#allocation8_spill]] %s5518_s3 }
   0x5   :  { %5562 = sst [smem:[#allocation9_spill]] %s5519_s4 }
   0x6   :  { %s5563_s23 = sld [smem:[#allocation5_spill]]  ;;  %vm70_vm0 = vcmask 261120  }
   0xc   :  { %v66_v0 = vld [vmem:[%s5563_s23] sm:$0xff]  ;;  %v67_v1 = vld [vmem:[%s5563_s23 + $0x8] sm:$0xff] }
   0xd   :  { %25 = vsyncpa [#allocation3], 0  ;;  %v71_v2 = vsel %vm70_vm0, %v66_v0, 0.0  ;;  %v74_v3 = vsel %vm70_vm0, %v67_v1, 0.0  ;;  %s5564_s26 = sld [smem:[#allocation9_spill]]  ;;  %s5565_s22 = sld [smem:[#allocation7_spill]]  ;;  %v211_v58 = vlaneseq }
   0xe   :  { %72 = vadd.xlane.f32.xlu0 %v71_v2  ;;  %s5566_s2 = sld [smem:[#allocation8_spill]]  ;;  %v4757_v36 = vmov 0.0   ;;  %vm4758_vm1 = vmmov 0   ;;  %v4001_v37 = vld [vmem:[%s5520_s5] ss:$0 sm:$0xff]  ;;  %s4759_s27 = smov 96  }
   0xf   :  { %4254 = vmatprep.subr.mxu1 %v4757_v36  ;;  %4256 = vmatprep.mubr.msk.f32.mxu1 %vm4758_vm1, %v4757_v36  ;;  %s4760_s28 = smov 88   ;;  %s4761_s4 = smov 120   ;;  %vm218_vm2 = vcmask 64512   ;;  %v212_v61 = vshrl.u32 %v211_v58, 7  ;;  %vm1566_vm3 = vcmask 130048   ;;  %vm1569_vm4 = vcmask 195584  }
  0x10   :  { %s4762_s29 = smov 80   ;;  %s5556_s30 = smov 112   ;;  %vm1835_vm5 = vcmask 523264   ;;  %vm3812_vm6 = vcmask 1040384   ;;  %vm3983_vm7 = vcmask 17408  }
  0x11   :  { %s5550_s0 = smov 72   ;;  %s5546_s21 = smov 104   ;;  %v383_v63 = vsub.s32 1, %v212_v61 }
  0x12   :  { %75 = vadd.xlane.f32.xlu0 %v74_v3  ;;  %s5567_s23 = sld [smem:[#allocation6_spill]]  ;;  %s5544_s24 = smov 64  }
  0x13   :  { %v117_v14 = vld [vmem:[%s5564_s26] sm:$0xff]  ;;  %v118_v15 = vld [vmem:[%s5564_s26 + $0x8] sm:$0xff]  ;;  %v119_v16 = vld [vmem:[%s5564_s26 + $0x10] sm:$0xff]  ;;  %s5540_s25 = smov 48   ;;  %s5538_s3 = smov 40  }
  0x14   :  { %v4529_v17 = vpack.c.bf16 %v118_v15, %v117_v14  ;;  %v120_v18 = vld [vmem:[%s5564_s26 + $0x18] sm:$0xff]  ;;  %v3999_v27 = vld [vmem:[%s5565_s22] ss:$0 sm:$0xff]  ;;  %s5548_s1 = smov 8   ;;  %s5554_s22 = smov 16  }
  0x15   :  { %v4533_v19 = vpack.c.bf16 %v120_v18, %v119_v16  ;;  %v4000_v29 = vld [vmem:[%s5566_s2] ss:$0 sm:$0xff]  ;;  %s5542_s2 = smov 56  }
  0x16   :  { %4530 = vmatprep.subr.bf16.mxu0 %v4529_v17 }
  0x17   :  { %4532 = vmatpush3.bf16.msra.mxu0 %v4529_v17 }
  0x18   :  { %4534 = vmatprep.subr.bf16.mxu0 %v4533_v19  ;;  %v114_v59 = vld [vmem:[%s5567_s23] sm:$0x3] }
  0x19   :  { %v115_v60 = vsub.f32 1.0, %v114_v59 }
  0x1b   :  { %4536 = vmatpush3.bf16.msra.mxu0 %v4533_v19  ;;  %v116_v62 = vmul.f32 -10000.0, %v115_v60 }
  0x1c   :  { %4264 = vmatprep.subr.mxu0 %v4757_v36 }
  0x9b   :  { %v73_v4 = vpop.xlane.xlu0 %72 }
  0x9c   :  { %v78_v5 = vmul.f32 0.03125, %v73_v4 }
  0x9e   :  { %v80_v6 = vsub.f32 %v66_v0, %v78_v5  ;;  %v213_v0 = vsub.s32 0, %v212_v61 }
  0x9f   :  { %v76_v7 = vpop.xlane.xlu0 %75 }
  0xa0   :  { %v79_v8 = vmul.f32 0.03125, %v76_v7  ;;  %v82_v9 = vmul.f32 %v80_v6, %v80_v6  ;;  %v4995_v2 = vrot.slane %v116_v62, %v213_v0 }
  0xa2   :  { %v81_v10 = vsub.f32 %v67_v1, %v79_v8  ;;  %v84_v11 = vsel %vm70_vm0, %v82_v9, 0.0  ;;  %v4993_v1 = vrot.slane %v116_v62, %v383_v63 }
  0xa3   :  { %85 = vadd.xlane.f32.xlu1 %v84_v11 }
  0xa4   :  { %v83_v12 = vmul.f32 %v81_v10, %v81_v10 }
  0xa6   :  { %v87_v13 = vsel %vm70_vm0, %v83_v12, 0.0 }
  0xa7   :  { %88 = vadd.xlane.f32.xlu1 %v87_v13 }
 0x130   :  { %v86_v20 = vpop.xlane.xlu1 %85 }
 0x131   :  { %v90_v21 = vmul.f32 0.03125, %v86_v20 }
 0x133   :  { %v92_v22 = vadd.f32 1e-12, %v90_v21 }
 0x134   :  { %v89_v23 = vpop.xlane.xlu1 %88 }
 0x135   :  { %4639 = vrsqrt.f32 %v92_v22  ;;  %v91_v24 = vmul.f32 0.03125, %v89_v23 }
 0x137   :  { %v93_v25 = vadd.f32 1e-12, %v91_v24 }
 0x139   :  { %4641 = vrsqrt.f32 %v93_v25 }
 0x13f   :  { %v4640_v26 = vpop.eup %4639 }
 0x140   :  { %v96_v28 = vmul.f32 %v4640_v26, %v80_v6 }
 0x142   :  { %v104_v30 = vmul.f32 %v3999_v27, %v96_v28 }
 0x143   :  { %v4642_v31 = vpop.eup %4641 }
 0x144   :  { %v97_v32 = vmul.f32 %v4642_v31, %v81_v10  ;;  %v4908_v33 = vadd.f32 %v4000_v29, %v104_v30 }
 0x146   :  { %v105_v34 = vmul.f32 %v3999_v27, %v97_v32  ;;  %4251 = vmatprep.mubr.msk.f32.mxu0 %vm70_vm0, %v4908_v33 }
 0x148   :  { %v4912_v35 = vadd.f32 %v4000_v29, %v105_v34 }
 0x14a   :  { %4252 = vmatmul.mubr.msk.f32.vlgmr.msra.gmra.mrb[0].mxu0 %vm70_vm0, %v4912_v35 }
 0x14b   :  { %4266 = vmatprep.mubr.msk.f32.mxu0 %vm4758_vm1, %v4757_v36 }
 0x21d   :  { %v4253_v38 = vpop.f32.mrb[0].mxu0 }
 0x21e   :  { %v4925_v39 = vadd.f32 %v4253_v38, %v4001_v37  ;;  %v200_v40 = vpop.f32.mrb[1].mxu0 }
 0x21f   :  { %v4927_v41 = vadd.f32 %v4001_v37, %v200_v40 }
 0x220   :  { %386 = vrot.lane.b32.xlu1 %v4925_v39, %s4759_s27  ;;  %v210_v43 = vmul.f32 0.35355338, %v4925_v39 }
 0x221   :  { %216 = vrot.lane.b32.xlu0 %v4927_v41, %s4759_s27  ;;  %v209_v42 = vmul.f32 0.35355338, %v4927_v41 }
 0x224   :  { %552 = vrot.lane.b32.xlu1 %v4927_v41, %s4760_s28 }
 0x225   :  { %717 = vrot.lane.b32.xlu0 %v4925_v39, %s4760_s28 }
 0x228   :  { %550 = vrot.lane.b32.xlu1 %v209_v42, %s4761_s4 }
 0x229   :  { %882 = vrot.lane.b32.xlu0 %v4927_v41, %s4762_s29 }
 0x22c   :  { %715 = vrot.lane.b32.xlu1 %v210_v43, %s4761_s4 }
 0x22d   :  { %1047 = vrot.lane.b32.xlu0 %v4925_v39, %s4762_s29 }
 0x230   :  { %880 = vrot.lane.b32.xlu1 %v209_v42, %s5556_s30 }
 0x231   :  { %1212 = vrot.lane.b32.xlu0 %v4927_v41, %s5550_s0 }
 0x234   :  { %1045 = vrot.lane.b32.xlu1 %v210_v43, %s5556_s30  ;;  %s5576_s30 = smov 16  }
 0x235   :  { %1377 = vrot.lane.b32.xlu0 %v4925_v39, %s5550_s0 }
 0x238   :  { %1210 = vrot.lane.b32.xlu1 %v209_v42, %s5546_s21 }
 0x23c   :  { %1375 = vrot.lane.b32.xlu1 %v210_v43, %s5546_s21  ;;  %s5573_s21 = smov 48  }
 0x292   :  { %v387_v44 = vpop.permute.xlu1 %386 }
 0x293   :  { %4265 = vmatpush3.xpose.msk.msra.mxu0 %vm218_vm2, %v387_v44  ;;  %v217_v45 = vpop.permute.xlu0 %216 }
 0x294   :  { %4255 = vmatpush3.xpose.msk.msra.mxu1 %vm218_vm2, %v217_v45  ;;  %4274 = vmatprep.subr.mxu0 %v4757_v36 }
 0x295   :  { %4259 = vmatprep.subr.mxu1 %v4757_v36 }
 0x296   :  { %4267 = vmatmul.mubr.msk.f32.vlgmr.msra.gmra.mrb[2].mxu0 %vm218_vm2, %v210_v43  ;;  %v553_v46 = vpop.permute.xlu1 %552 }
 0x297   :  { %4275 = vmatpush3.xpose.msk.msra.mxu0 %vm218_vm2, %v553_v46  ;;  %v718_v47 = vpop.permute.xlu0 %717  ;;  %4257 = vmatmul.mubr.msk.f32.vlgmr.msra.gmra.mrb[0].mxu1 %vm218_vm2, %v209_v42 }
 0x298   :  { %4276 = vmatprep.mubr.msk.f32.mxu0 %vm4758_vm1, %v4757_v36  ;;  %4284 = vmatprep.subr.mxu0 %v4757_v36 }
 0x299   :  { %4261 = vmatprep.mubr.msk.f32.mxu1 %vm4758_vm1, %v4757_v36 }
 0x29a   :  { %v551_v48 = vpop.permute.xlu1 %550 }
 0x29b   :  { %v883_v49 = vpop.permute.xlu0 %882  ;;  %4277 = vmatmul.mubr.msk.f32.vlgmr.msra.gmra.mrb[4].mxu0 %vm218_vm2, %v551_v48 }
 0x29c   :  { %4285 = vmatpush3.xpose.msk.msra.mxu0 %vm218_vm2, %v718_v47  ;;  %4286 = vmatprep.mubr.msk.f32.mxu0 %vm4758_vm1, %v4757_v36 }
 0x29d   :  { %4294 = vmatprep.subr.mxu0 %v4757_v36 }
 0x29e   :  { %v716_v50 = vpop.permute.xlu1 %715 }
 0x29f   :  { %v1048_v51 = vpop.permute.xlu0 %1047  ;;  %4287 = vmatmul.mubr.msk.f32.vlgmr.msra.gmra.mrb[6].mxu0 %vm218_vm2, %v716_v50 }
 0x2a0   :  { %4295 = vmatpush3.xpose.msk.msra.mxu0 %vm218_vm2, %v883_v49  ;;  %4296 = vmatprep.mubr.msk.f32.mxu0 %vm4758_vm1, %v4757_v36 }
 0x2a1   :  { %4304 = vmatprep.subr.mxu0 %v4757_v36 }
 0x2a2   :  { %v881_v52 = vpop.permute.xlu1 %880 }
 0x2a3   :  { %4297 = vmatmul.mubr.msk.f32.vlgmr.msra.gmra.mrb[8].mxu0 %vm218_vm2, %v881_v52  ;;  %v1213_v53 = vpop.permute.xlu0 %1212 }
 0x2a4   :  { %4305 = vmatpush3.xpose.msk.msra.mxu0 %vm218_vm2, %v1048_v51  ;;  %4306 = vmatprep.mubr.msk.f32.mxu0 %vm4758_vm1, %v4757_v36 }
 0x2a5   :  { %4314 = vmatprep.subr.mxu0 %v4757_v36 }
 0x2a6   :  { %v1046_v54 = vpop.permute.xlu1 %1045 }
 0x2a7   :  { %4307 = vmatmul.mubr.msk.f32.vlgmr.msra.gmra.mrb[10].mxu0 %vm218_vm2, %v1046_v54  ;;  %v1378_v56 = vpop.permute.xlu0 %1377 }
 0x2a8   :  { %4315 = vmatpush3.xpose.msk.msra.mxu0 %vm218_vm2, %v1213_v53  ;;  %4316 = vmatprep.mubr.msk.f32.mxu0 %vm4758_vm1, %v4757_v36 }
 0x2a9   :  { %4324 = vmatprep.subr.mxu0 %v4757_v36 }
 0x2aa   :  { %v1211_v55 = vpop.permute.xlu1 %1210 }
 0x2ab   :  { %4317 = vmatmul.mubr.msk.f32.vlgmr.msra.gmra.mrb[12].mxu0 %vm218_vm2, %v1211_v55 }
 0x2ac   :  { %4325 = vmatpush3.xpose.msk.msra.mxu0 %vm218_vm2, %v1378_v56  ;;  %4326 = vmatprep.mubr.msk.f32.mxu0 %vm4758_vm1, %v4757_v36 }
 0x2ae   :  { %v1376_v57 = vpop.permute.xlu1 %1375 }
 0x2af   :  { %4327 = vmatmul.mubr.msk.f32.vlgmr.msra.gmra.mrb[14].mxu0 %vm218_vm2, %v1376_v57 }
 0x369   :  { %v459_v3 = vpop.f32.mrb[2].mxu0 }
 0x36a   :  { %v460_v4 = vadd.f32 %v459_v3, %v4993_v1  ;;  %v290_v5 = vpop.f32.mrb[0].mxu1  ;;  %v4268_v6 = vpop.f32.mrb[3].mxu0 }
 0x36b   :  { %v291_v7 = vadd.f32 %v290_v5, %v4995_v2  ;;  %v4258_v8 = vpop.f32.mrb[1].mxu1 }
 0x36c   :  { %v463_v9 = vsel %vm218_vm2, %v460_v4, -inf }
 0x36d   :  { %464 = vmax.xlane.f32.xlu1 %v463_v9  ;;  %v294_v10 = vsel %vm218_vm2, %v291_v7, -inf }
 0x36e   :  { %v624_v11 = vpop.f32.mrb[4].mxu0  ;;  %295 = vmax.xlane.f32.xlu0 %v294_v10 }
 0x36f   :  { %v625_v12 = vadd.f32 %v624_v11, %v4995_v2  ;;  %v4278_v13 = vpop.f32.mrb[5].mxu0 }
 0x371   :  { %v628_v14 = vsel %vm218_vm2, %v625_v12, -inf }
 0x372   :  { %v789_v15 = vpop.f32.mrb[6].mxu0  ;;  %629 = vmax.xlane.f32.xlu0 %v628_v14 }
 0x373   :  { %v790_v16 = vadd.f32 %v789_v15, %v4993_v1  ;;  %v4288_v17 = vpop.f32.mrb[7].mxu0 }
 0x375   :  { %v793_v18 = vsel %vm218_vm2, %v790_v16, -inf }
 0x376   :  { %v954_v19 = vpop.f32.mrb[8].mxu0  ;;  %794 = vmax.xlane.f32.xlu0 %v793_v18 }
 0x377   :  { %v955_v20 = vadd.f32 %v954_v19, %v4995_v2  ;;  %v4298_v21 = vpop.f32.mrb[9].mxu0 }
 0x379   :  { %v958_v22 = vsel %vm218_vm2, %v955_v20, -inf }
 0x37a   :  { %v1119_v23 = vpop.f32.mrb[10].mxu0  ;;  %959 = vmax.xlane.f32.xlu0 %v958_v22 }
 0x37b   :  { %v5008_v24 = vadd.f32 %v1119_v23, %v4993_v1  ;;  %v4308_v25 = vpop.f32.mrb[11].mxu0 }
 0x37d   :  { %v1123_v26 = vsel %vm218_vm2, %v5008_v24, -inf }
 0x37e   :  { %1124 = vmax.xlane.f32.xlu1 %v1123_v26  ;;  %v1284_v27 = vpop.f32.mrb[12].mxu0 }
 0x37f   :  { %v1285_v28 = vadd.f32 %v1284_v27, %v4995_v2  ;;  %v4318_v29 = vpop.f32.mrb[13].mxu0 }
 0x381   :  { %v1288_v30 = vsel %vm218_vm2, %v1285_v28, -inf }
 0x382   :  { %v1449_v31 = vpop.f32.mrb[14].mxu0  ;;  %1289 = vmax.xlane.f32.xlu0 %v1288_v30 }
 0x383   :  { %v4328_v32 = vpop.f32.mrb[15].mxu0  ;;  %v1450_v34 = vadd.f32 %v1449_v31, %v4993_v1 }
 0x385   :  { %v1453_v37 = vsel %vm218_vm2, %v1450_v34, -inf }
 0x38f   :  { %305 = vrot.lane.b32.xlu1 %v4927_v41, %s5544_s24 }
 0x3b3   :  { %1454 = vmax.xlane.f32.xlu1 %v1453_v37 }
 0x3fa   :  { %v465_v38 = vpop.xlane.xlu1 %464 }
 0x3fb   :  { %v466_v40 = vsub.f32 %v460_v4, %v465_v38  ;;  %v296_v42 = vpop.xlane.xlu0 %295 }
 0x3fc   :  { %v297_v43 = vsub.f32 %v291_v7, %v296_v42 }
 0x3fd   :  { %v467_v44 = vmul.f32 1.442695, %v466_v40 }
 0x3fe   :  { %v298_v45 = vmul.f32 1.442695, %v297_v43 }
 0x3ff   :  { %4643 = vpow2.f32 %v467_v44  ;;  %v630_v52 = vpop.xlane.xlu0 %629 }
 0x400   :  { %4645 = vpow2.f32 %v298_v45  ;;  %v631_v54 = vsub.f32 %v625_v12, %v630_v52 }
 0x402   :  { %v632_v56 = vmul.f32 1.442695, %v631_v54 }
 0x403   :  { %v795_v53 = vpop.xlane.xlu0 %794 }
 0x404   :  { %v796_v59 = vsub.f32 %v790_v16, %v795_v53  ;;  %4647 = vpow2.f32 %v632_v56 }
 0x406   :  { %v797_v62 = vmul.f32 1.442695, %v796_v59 }
 0x407   :  { %v960_v55 = vpop.xlane.xlu0 %959 }
 0x408   :  { %v961_v57 = vsub.f32 %v955_v20, %v960_v55 }
 0x409   :  { %v5018_v46 = vpop.eup %4643 }
 0x40a   :  { %v5020_v47 = vpop.eup %4645  ;;  %v469_v48 = vsel %vm218_vm2, %v5018_v46, 0.0  ;;  %v962_v60 = vmul.f32 1.442695, %v961_v57 }
 0x40b   :  { %470 = vadd.xlane.f32.xlu1 %v469_v48  ;;  %v1125_v49 = vpop.xlane.xlu1 %1124  ;;  %v300_v50 = vsel %vm218_vm2, %v5020_v47, 0.0 }
 0x40c   :  { %301 = vadd.xlane.f32.xlu0 %v300_v50  ;;  %4649 = vpow2.f32 %v962_v60  ;;  %v1126_v15 = vsub.f32 %v5008_v24, %v1125_v49 }
 0x40d   :  { %4651 = vpow2.f32 %v797_v62 }
 0x40e   :  { %v4648_v0 = vpop.eup %4647  ;;  %v1127_v16 = vmul.f32 1.442695, %v1126_v15 }
 0x40f   :  { %v306_v51 = vpop.permute.xlu1 %305  ;;  %v1290_v58 = vpop.xlane.xlu0 %1289  ;;  %v634_v4 = vsel %vm218_vm2, %v4648_v0, 0.0 }
 0x410   :  { %4260 = vmatpush3.msra.mxu1 %v306_v51  ;;  %v1291_v61 = vsub.f32 %v1285_v28, %v1290_v58 }
 0x411   :  { %4269 = vmatprep.subr.mxu1 %v4757_v36 }
 0x412   :  { %v1292_v63 = vmul.f32 1.442695, %v1291_v61 }
 0x414   :  { %4653 = vpow2.f32 %v1292_v63  ;;  %v1572_v63 = vld [vmem:[%s5521_s6] sm:$0xff] }
 0x416   :  { %v5036_v5 = vpop.eup %4649 }
 0x417   :  { %v4652_v8 = vpop.eup %4651  ;;  %v964_v9 = vsel %vm218_vm2, %v5036_v5, 0.0 }
 0x418   :  { %v799_v11 = vsel %vm218_vm2, %v4652_v8, 0.0 }
 0x41c   :  { %639 = vrot.lane.b32.xlu1 %v4927_v41, %s5542_s2 }
 0x41e   :  { %v5040_v10 = vpop.eup %4653 }
 0x41f   :  { %v1294_v12 = vsel %vm218_vm2, %v5040_v10, 0.0 }
 0x420   :  { %804 = vrot.lane.b32.xlu1 %v4925_v39, %s5542_s2  ;;  %s5552_s2 = smov 24  }
 0x422   :  { %474 = vrot.lane.b32.xlu0 %v4925_v39, %s5544_s24  ;;  %s5574_s24 = smov 40  }
 0x424   :  { %969 = vrot.lane.b32.xlu1 %v4927_v41, %s5540_s25 }
 0x440   :  { %v1455_v3 = vpop.xlane.xlu1 %1454 }
 0x441   :  { %v1456_v6 = vsub.f32 %v1450_v34, %v1455_v3  ;;  %635 = vadd.xlane.f32.xlu0 %v634_v4  ;;  %v1574_v4 = vld [vmem:[%s5521_s6 + $0x10] sm:$0xff] }
 0x443   :  { %v1457_v7 = vmul.f32 1.442695, %v1456_v6 }
 0x445   :  { %4655 = vpow2.f32 %v1457_v7  ;;  %965 = vadd.xlane.f32.xlu0 %v964_v9 }
 0x446   :  { %4657 = vpow2.f32 %v1127_v16 }
 0x448   :  { %800 = vadd.xlane.f32.xlu1 %v799_v11 }
 0x449   :  { %1295 = vadd.xlane.f32.xlu0 %v1294_v12 }
 0x44f   :  { %v5045_v13 = vpop.eup %4655 }
 0x450   :  { %v1459_v14 = vsel %vm218_vm2, %v5045_v13, 0.0  ;;  %v4658_v17 = vpop.eup %4657 }
 0x451   :  { %1460 = vadd.xlane.f32.xlu0 %v1459_v14  ;;  %v1129_v18 = vsel %vm218_vm2, %v4658_v17, 0.0 }
 0x459   :  { %1134 = vrot.lane.b32.xlu1 %v4925_v39, %s5540_s25  ;;  %s5575_s25 = smov 8  }
 0x467   :  { %1299 = vrot.lane.b32.xlu0 %v4927_v41, %s5538_s3 }
 0x47d   :  { %1130 = vadd.xlane.f32.xlu1 %v1129_v18 }
 0x48e   :  { %1464 = vrot.lane.b32.xlu1 %v4925_v39, %s5538_s3 }
 0x498   :  { %v471_v19 = vpop.xlane.xlu1 %470 }
 0x499   :  { %v302_v20 = vpop.xlane.xlu0 %301 }
 0x49a   :  { %4659 = vrcp.f32 %v302_v20 }
 0x49b   :  { %4661 = vrcp.f32 %v471_v19 }
 0x49c   :  { %v640_v39 = vpop.permute.xlu1 %639 }
 0x49d   :  { %v475_v24 = vpop.permute.xlu0 %474 }
 0x4a0   :  { %v805_v25 = vpop.permute.xlu1 %804 }
 0x4a4   :  { %v4660_v21 = vpop.eup %4659  ;;  %v970_v27 = vpop.permute.xlu1 %969 }
 0x4a5   :  { %v304_v22 = vmul.f32 %v4660_v21, %v5020_v47  ;;  %v4662_v23 = vpop.eup %4661 }
 0x4a6   :  { %v473_v41 = vmul.f32 %v4662_v23, %v5018_v46 }
 0x4a7   :  { %4262 = vmatmul.mubr.msk.f32.vlgmr.msra.gmra.mrb[2].mxu1 %vm218_vm2, %v304_v22 }
 0x4a8   :  { %4270 = vmatpush3.msra.mxu1 %v475_v24  ;;  %4271 = vmatprep.mubr.msk.f32.mxu1 %vm4758_vm1, %v4757_v36 }
 0x4a9   :  { %4279 = vmatprep.subr.mxu1 %v4757_v36 }
 0x4ab   :  { %4272 = vmatmul.mubr.msk.f32.vlgmr.msra.gmra.mrb[4].mxu1 %vm218_vm2, %v473_v41  ;;  %v4028_v41 = vld [vmem:[%s5522_s7] ss:$0 sm:$0xff] }
 0x4ac   :  { %4280 = vmatpush3.msra.mxu1 %v640_v39  ;;  %4281 = vmatprep.mubr.msk.f32.mxu1 %vm4758_vm1, %v4757_v36 }
 0x4ad   :  { %4289 = vmatprep.subr.mxu1 %v4757_v36 }
 0x4ce   :  { %v636_v26 = vpop.xlane.xlu0 %635 }
 0x4cf   :  { %4663 = vrcp.f32 %v636_v26 }
 0x4d2   :  { %v966_v28 = vpop.xlane.xlu0 %965 }
 0x4d5   :  { %v801_v29 = vpop.xlane.xlu1 %800 }
 0x4d6   :  { %4665 = vrcp.f32 %v801_v29  ;;  %v1296_v42 = vpop.xlane.xlu0 %1295 }
 0x4d7   :  { %4667 = vrcp.f32 %v966_v28 }
 0x4d9   :  { %v4664_v30 = vpop.eup %4663  ;;  %v1135_v40 = vpop.permute.xlu1 %1134 }
 0x4da   :  { %v638_v31 = vmul.f32 %v4664_v30, %v4648_v0  ;;  %v1573_v0 = vld [vmem:[%s5521_s6 + $0x8] sm:$0xff] }
 0x4db   :  { %v4537_v3 = vpack.c.bf16 %v1573_v0, %v1572_v63 }
 0x4dc   :  { %4282 = vmatmul.mubr.msk.f32.vlgmr.msra.gmra.mrb[6].mxu1 %vm218_vm2, %v638_v31 }
 0x4dd   :  { %4290 = vmatpush3.msra.mxu1 %v805_v25  ;;  %4291 = vmatprep.mubr.msk.f32.mxu1 %vm4758_vm1, %v4757_v36 }
 0x4de   :  { %4299 = vmatprep.subr.mxu1 %v4757_v36  ;;  %v1461_v44 = vpop.xlane.xlu0 %1460  ;;  %4538 = vmatprep.subr.bf16.mxu0 %v4537_v3 }
 0x4df   :  { %4540 = vmatpush3.bf16.msra.mxu0 %v4537_v3 }
 0x4e0   :  { %v4666_v32 = vpop.eup %4665 }
 0x4e1   :  { %v803_v34 = vmul.f32 %v4666_v32, %v4652_v8  ;;  %v4668_v37 = vpop.eup %4667 }
 0x4e2   :  { %v968_v38 = vmul.f32 %v4668_v37, %v5036_v5  ;;  %v1300_v48 = vpop.permute.xlu0 %1299  ;;  %v1575_v5 = vld [vmem:[%s5521_s6 + $0x18] sm:$0xff] }
 0x4e3   :  { %4292 = vmatmul.mubr.msk.f32.vlgmr.msra.gmra.mrb[8].mxu1 %vm218_vm2, %v803_v34  ;;  %v4541_v6 = vpack.c.bf16 %v1575_v5, %v1574_v4  ;;  %v1820_v5 = vld [vmem:[%s5527_s12] sm:$0xff] }
 0x4e4   :  { %4300 = vmatpush3.msra.mxu1 %v970_v27  ;;  %4301 = vmatprep.mubr.msk.f32.mxu1 %vm4758_vm1, %v4757_v36 }
 0x4e5   :  { %4309 = vmatprep.subr.mxu1 %v4757_v36  ;;  %4542 = vmatprep.subr.bf16.mxu0 %v4541_v6 }
 0x4e6   :  { %4544 = vmatpush3.bf16.msra.mxu0 %v4541_v6  ;;  %v1821_v6 = vld [vmem:[%s5527_s12 + $0x8] sm:$0xff] }
 0x4e7   :  { %4302 = vmatmul.mubr.msk.f32.vlgmr.msra.gmra.mrb[10].mxu1 %vm218_vm2, %v968_v38 }
 0x4e8   :  { %4310 = vmatpush3.msra.mxu1 %v1135_v40  ;;  %4311 = vmatprep.mubr.msk.f32.mxu1 %vm4758_vm1, %v4757_v36 }
 0x4e9   :  { %4319 = vmatprep.subr.mxu1 %v4757_v36 }
 0x50a   :  { %v1131_v43 = vpop.xlane.xlu1 %1130 }
 0x50b   :  { %4669 = vrcp.f32 %v1131_v43 }
 0x50c   :  { %4671 = vrcp.f32 %v1296_v42 }
 0x50d   :  { %4673 = vrcp.f32 %v1461_v44 }
 0x50e   :  { %v1465_v51 = vpop.permute.xlu1 %1464 }
 0x515   :  { %v4670_v45 = vpop.eup %4669 }
 0x516   :  { %v1133_v46 = vmul.f32 %v4670_v45, %v4658_v17  ;;  %v4672_v47 = vpop.eup %4671 }
 0x517   :  { %v1298_v49 = vmul.f32 %v4672_v47, %v5040_v10  ;;  %v4674_v50 = vpop.eup %4673 }
 0x518   :  { %4312 = vmatmul.mubr.msk.f32.vlgmr.msra.gmra.mrb[12].mxu1 %vm218_vm2, %v1133_v46  ;;  %v1463_v52 = vmul.f32 %v4674_v50, %v5045_v13  ;;  %v1711_v46 = vld [vmem:[%s5525_s10 + $0x8] sm:$0xff] }
 0x519   :  { %4320 = vmatpush3.msra.mxu1 %v1300_v48  ;;  %4321 = vmatprep.mubr.msk.f32.mxu1 %vm4758_vm1, %v4757_v36  ;;  %v1712_v48 = vld [vmem:[%s5525_s10 + $0x10] sm:$0xff] }
 0x51a   :  { %4329 = vmatprep.subr.mxu1 %v4757_v36 }
 0x51c   :  { %4322 = vmatmul.mubr.msk.f32.vlgmr.msra.gmra.mrb[14].mxu1 %vm218_vm2, %v1298_v49  ;;  %v1713_v49 = vld [vmem:[%s5525_s10 + $0x18] sm:$0xff] }
 0x51d   :  { %4330 = vmatpush3.msra.mxu1 %v1465_v51  ;;  %4331 = vmatprep.mubr.msk.f32.mxu1 %vm4758_vm1, %v4757_v36  ;;  %v4549_v50 = vpack.c.bf16 %v1713_v49, %v1712_v48 }
 0x520   :  { %4332 = vmatmul.mubr.msk.f32.vlgmr.msra.gmra.mrb[16].mxu1 %vm218_vm2, %v1463_v52 }
 0x57a   :  { %v377_v53 = vpop.f32.mrb[2].mxu1 }
 0x57b   :  { %v4263_v54 = vpop.f32.mrb[3].mxu1 }
 0x57e   :  { %v546_v55 = vpop.f32.mrb[4].mxu1 }
 0x57f   :  { %v4273_v56 = vpop.f32.mrb[5].mxu1 }
 0x5af   :  { %v711_v57 = vpop.f32.mrb[6].mxu1 }
 0x5b0   :  { %1542 = vrot.lane.b32.xlu0 %v711_v57, %s5548_s1  ;;  %v4283_v58 = vpop.f32.mrb[7].mxu1 }
 0x5b1   :  { %v4031_v58 = vld [vmem:[%s5523_s8] ss:$0 sm:$0xff] }
 0x5b6   :  { %v876_v59 = vpop.f32.mrb[8].mxu1 }
 0x5b7   :  { %1544 = vrot.lane.b32.xlu1 %v876_v59, %s5548_s1  ;;  %v4293_v60 = vpop.f32.mrb[9].mxu1 }
 0x5b8   :  { %v4032_v60 = vld [vmem:[%s5524_s9] ss:$0 sm:$0xff] }
 0x5ba   :  { %v1041_v61 = vpop.f32.mrb[10].mxu1 }
 0x5bb   :  { %1550 = vrot.lane.b32.xlu0 %v1041_v61, %s5554_s22  ;;  %v4303_v62 = vpop.f32.mrb[11].mxu1 }
 0x5eb   :  { %v1206_v7 = vpop.f32.mrb[12].mxu1 }
 0x5ec   :  { %1552 = vrot.lane.b32.xlu1 %v1206_v7, %s5554_s22  ;;  %v4313_v8 = vpop.f32.mrb[13].mxu1  ;;  %v4553_v7 = vpack.c.bf16 %v1821_v6, %v1820_v5 }
 0x5ed   :  { %v1822_v8 = vld [vmem:[%s5527_s12 + $0x10] sm:$0xff] }
 0x5ee   :  { %4554 = vmatprep.subr.bf16.mxu0 %v4553_v7 }
 0x5ef   :  { %v1371_v9 = vpop.f32.mrb[14].mxu1 }
 0x5f0   :  { %1558 = vrot.lane.b32.xlu0 %v1371_v9, %s5552_s2  ;;  %v4323_v10 = vpop.f32.mrb[15].mxu1  ;;  %v1823_v9 = vld [vmem:[%s5527_s12 + $0x18] sm:$0xff] }
 0x5f1   :  { %v4557_v10 = vpack.c.bf16 %v1823_v9, %v1822_v8 }
 0x5f3   :  { %v1536_v11 = vpop.f32.mrb[16].mxu1 }
 0x5f4   :  { %1560 = vrot.lane.b32.xlu1 %v1536_v11, %s5552_s2  ;;  %v4333_v12 = vpop.f32.mrb[17].mxu1  ;;  %v1824_v11 = vld [vmem:[%s5527_s12 + $0x20] sm:$0xff] }
 0x5f5   :  { %v1825_v12 = vld [vmem:[%s5527_s12 + $0x28] sm:$0xff] }
 0x622   :  { %v1543_v13 = vpop.permute.xlu0 %1542 }
 0x623   :  { %v1564_v16 = vsel %vm218_vm2, %v377_v53, %v1543_v13  ;;  %v4561_v13 = vpack.c.bf16 %v1825_v12, %v1824_v11  ;;  %v4039_v11 = vld [vmem:[%s5529_s14] ss:$0 sm:$0xff] }
 0x629   :  { %v1545_v14 = vpop.permute.xlu1 %1544 }
 0x62a   :  { %v1565_v21 = vsel %vm218_vm2, %v546_v55, %v1545_v14  ;;  %v1826_v14 = vld [vmem:[%s5527_s12 + $0x30] sm:$0xff] }
 0x62d   :  { %v1551_v15 = vpop.permute.xlu0 %1550 }
 0x62e   :  { %v1567_v17 = vsel %vm1566_vm3, %v1564_v16, %v1551_v15  ;;  %v1827_v15 = vld [vmem:[%s5527_s12 + $0x38] sm:$0xff] }
 0x62f   :  { %v4565_v16 = vpack.c.bf16 %v1827_v15, %v1826_v14  ;;  %v4040_v15 = vld [vmem:[%s5530_s15] ss:$0 sm:$0xff] }
 0x65e   :  { %v1553_v18 = vpop.permute.xlu1 %1552 }
 0x65f   :  { %v1568_v22 = vsel %vm1566_vm3, %v1565_v21, %v1553_v18 }
 0x662   :  { %v1559_v19 = vpop.permute.xlu0 %1558 }
 0x663   :  { %v1570_v20 = vsel %vm1569_vm4, %v1567_v17, %v1559_v19  ;;  %v4033_v17 = vld [vmem:[%s5526_s11] ss:$0 sm:$0xff] }
 0x664   :  { %4342 = vmatprep.mubr.msk.f32.mxu0 %vm70_vm0, %v1570_v20 }
 0x666   :  { %v1561_v23 = vpop.permute.xlu1 %1560 }
 0x667   :  { %v1571_v24 = vsel %vm1569_vm4, %v1568_v22, %v1561_v23 }
 0x668   :  { %4343 = vmatmul.mubr.msk.f32.vlgmr.msra.gmra.mrb[16].mxu0 %vm70_vm0, %v1571_v24 }
 0x669   :  { %4556 = vmatpush3.bf16.msra.mxu0 %v4553_v7 }
 0x66a   :  { %4558 = vmatprep.subr.bf16.mxu0 %v4557_v10 }
 0x66d   :  { %4560 = vmatpush3.bf16.msra.mxu0 %v4557_v10 }
 0x66e   :  { %4562 = vmatprep.subr.bf16.mxu0 %v4561_v13 }
 0x671   :  { %4564 = vmatpush3.bf16.msra.mxu0 %v4561_v13 }
 0x672   :  { %4566 = vmatprep.subr.bf16.mxu0 %v4565_v16 }
 0x675   :  { %4568 = vmatpush3.bf16.msra.mxu0 %v4565_v16 }
 0x676   :  { %4396 = vmatprep.subr.mxu0 %v4757_v36 }
 0x73b   :  { %v4344_v39 = vpop.f32.mrb[16].mxu0 }
 0x73c   :  { %v1661_v25 = vadd.f32 %v4344_v39, %v4028_v41  ;;  %v1655_v26 = vpop.f32.mrb[17].mxu0 }
 0x73d   :  { %v1656_v27 = vadd.f32 %v4028_v41, %v1655_v26 }
 0x73e   :  { %v1665_v28 = vadd.f32 %v1661_v25, %v4912_v35 }
 0x73f   :  { %v1664_v29 = vadd.f32 %v1656_v27, %v4908_v33  ;;  %v1710_v33 = vld [vmem:[%s5525_s10] sm:$0xff] }
 0x740   :  { %v1671_v30 = vsel %vm70_vm0, %v1665_v28, 0.0  ;;  %v4545_v47 = vpack.c.bf16 %v1711_v46, %v1710_v33 }
 0x741   :  { %1672 = vadd.xlane.f32.xlu1 %v1671_v30  ;;  %v1668_v31 = vsel %vm70_vm0, %v1664_v29, 0.0 }
 0x742   :  { %1669 = vadd.xlane.f32.xlu0 %v1668_v31  ;;  %4546 = vmatprep.subr.bf16.mxu1 %v4545_v47 }
 0x743   :  { %4548 = vmatpush3.bf16.msra.mxu1 %v4545_v47 }
 0x744   :  { %4550 = vmatprep.subr.bf16.mxu1 %v4549_v50 }
 0x747   :  { %4552 = vmatpush3.bf16.msra.mxu1 %v4549_v50 }
 0x7ce   :  { %v1673_v32 = vpop.xlane.xlu1 %1672 }
 0x7cf   :  { %v1675_v34 = vmul.f32 0.03125, %v1673_v32  ;;  %v1670_v37 = vpop.xlane.xlu0 %1669 }
 0x7d0   :  { %v1674_v38 = vmul.f32 0.03125, %v1670_v37 }
 0x7d1   :  { %v1677_v40 = vsub.f32 %v1665_v28, %v1675_v34 }
 0x7d2   :  { %v1676_v42 = vsub.f32 %v1664_v29, %v1674_v38 }
 0x7d3   :  { %v1679_v45 = vmul.f32 %v1677_v40, %v1677_v40 }
 0x7d4   :  { %v1678_v43 = vmul.f32 %v1676_v42, %v1676_v42 }
 0x7d5   :  { %v1683_v35 = vsel %vm70_vm0, %v1679_v45, 0.0 }
 0x7d6   :  { %v1680_v44 = vsel %vm70_vm0, %v1678_v43, 0.0  ;;  %v4036_v43 = vld [vmem:[%s5528_s13] ss:$0 sm:$0xff] }
 0x7d7   :  { %1681 = vadd.xlane.f32.xlu0 %v1680_v44 }
 0x7db   :  { %1684 = vadd.xlane.f32.xlu0 %v1683_v35 }
 0x864   :  { %v1682_v51 = vpop.xlane.xlu0 %1681 }
 0x865   :  { %v1686_v52 = vmul.f32 0.03125, %v1682_v51 }
 0x867   :  { %v1688_v53 = vadd.f32 1e-12, %v1686_v52 }
 0x868   :  { %v1685_v54 = vpop.xlane.xlu0 %1684 }
 0x869   :  { %4675 = vrsqrt.f32 %v1688_v53  ;;  %v1687_v55 = vmul.f32 0.03125, %v1685_v54 }
 0x86b   :  { %v1689_v56 = vadd.f32 1e-12, %v1687_v55 }
 0x86d   :  { %4677 = vrsqrt.f32 %v1689_v56 }
 0x873   :  { %v4676_v57 = vpop.eup %4675 }
 0x874   :  { %v1692_v59 = vmul.f32 %v4676_v57, %v1676_v42 }
 0x876   :  { %v1700_v61 = vmul.f32 %v4031_v58, %v1692_v59 }
 0x877   :  { %v4678_v62 = vpop.eup %4677 }
 0x878   :  { %v1693_v63 = vmul.f32 %v4678_v62, %v1677_v40  ;;  %v1708_v0 = vadd.f32 %v4032_v60, %v1700_v61  ;;  %v4042_v61 = vld [vmem:[%s5564_s26 + $0x28] sm:$0xff] }
 0x87a   :  { %v1701_v3 = vmul.f32 %v4031_v58, %v1693_v63  ;;  %4353 = vmatprep.mubr.msk.f32.mxu1 %vm70_vm0, %v1708_v0  ;;  %v4043_v63 = vld [vmem:[%s5564_s26 + $0x30] sm:$0xff] }
 0x87c   :  { %v1709_v4 = vadd.f32 %v4032_v60, %v1701_v3  ;;  %v4041_v60 = vld [vmem:[%s5564_s26 + $0x20] sm:$0xff] }
 0x87d   :  { %v4569_v62 = vpack.c.bf16 %v4042_v61, %v4041_v60 }
 0x87e   :  { %4354 = vmatmul.mubr.msk.f32.vlgmr.msra.gmra.mrb[18].mxu1 %vm70_vm0, %v1709_v4 }
 0x87f   :  { %4570 = vmatprep.subr.bf16.mxu1 %v4569_v62 }
 0x880   :  { %4572 = vmatpush3.bf16.msra.mxu1 %v4569_v62 }
 0x951   :  { %v4355_v18 = vpop.f32.mrb[18].mxu1 }
 0x952   :  { %v1799_v19 = vadd.f32 %v4355_v18, %v4033_v17  ;;  %v1793_v20 = vpop.f32.mrb[19].mxu1 }
 0x953   :  { %v1794_v21 = vadd.f32 %v4033_v17, %v1793_v20  ;;  %v4046_v20 = vld [vmem:[%s5520_s5 + $0x1] ss:$0 sm:$0xff]  ;;  %s5568_s5 = smov 112  }
 0x954   :  { %v1805_v22 = vmul.f32 0.044715, %v1799_v19  ;;  %v1803_v38 = vmul.f32 0.5, %v1799_v19 }
 0x955   :  { %v1804_v23 = vmul.f32 0.044715, %v1794_v21  ;;  %v1802_v34 = vmul.f32 0.5, %v1794_v21 }
 0x956   :  { %v1807_v24 = vmul.f32 %v1805_v22, %v1799_v19 }
 0x957   :  { %v1806_v41 = vmul.f32 %v1804_v23, %v1794_v21 }
 0x958   :  { %v1809_v39 = vmul.f32 %v1807_v24, %v1799_v19 }
 0x959   :  { %v1808_v25 = vmul.f32 %v1806_v41, %v1794_v21 }
 0x95a   :  { %v1811_v26 = vadd.f32 %v1809_v39, %v1799_v19 }
 0x95b   :  { %v1810_v27 = vadd.f32 %v1808_v25, %v1794_v21 }
 0x95c   :  { %v1813_v28 = vmul.f32 0.7978846, %v1811_v26 }
 0x95d   :  { %v1812_v29 = vmul.f32 0.7978846, %v1810_v27 }
 0x95e   :  { %4679 = vtanh.f32 %v1813_v28 }
 0x95f   :  { %4681 = vtanh.f32 %v1812_v29 }
 0x968   :  { %v4680_v30 = vpop.eup %4679 }
 0x969   :  { %v4682_v31 = vpop.eup %4681  ;;  %v1817_v32 = vadd.f32 1.0, %v4680_v30 }
 0x96a   :  { %v1816_v37 = vadd.f32 1.0, %v4682_v31 }
 0x96b   :  { %v1819_v42 = vmul.f32 %v1817_v32, %v1803_v38 }
 0x96c   :  { %v1818_v40 = vmul.f32 %v1816_v37, %v1802_v34 }
 0x96e   :  { %4372 = vmatprep.mubr.msk.f32.mxu0 %vm1835_vm5, %v1818_v40 }
 0x96f   :  { %4373 = vmatmul.mubr.msk.f32.vlgmr.msra.gmra.mrb[18].mxu0 %vm1835_vm5, %v1819_v42 }
 0x970   :  { %4398 = vmatprep.mubr.msk.f32.mxu0 %vm4758_vm1, %v4757_v36 }
 0xa42   :  { %v4374_v44 = vpop.f32.mrb[18].mxu0 }
 0xa43   :  { %v1914_v45 = vadd.f32 %v4374_v44, %v4036_v43  ;;  %v1908_v35 = vpop.f32.mrb[19].mxu0 }
 0xa44   :  { %v1909_v33 = vadd.f32 %v4036_v43, %v1908_v35 }
 0xa45   :  { %v1918_v46 = vadd.f32 %v1914_v45, %v1709_v4 }
 0xa46   :  { %v1917_v47 = vadd.f32 %v1909_v33, %v1708_v0  ;;  %v4044_v0 = vld [vmem:[%s5564_s26 + $0x38] sm:$0xff] }
 0xa47   :  { %v1924_v48 = vsel %vm70_vm0, %v1918_v46, 0.0  ;;  %v4573_v3 = vpack.c.bf16 %v4044_v0, %v4043_v63 }
 0xa48   :  { %1925 = vadd.xlane.f32.xlu1 %v1924_v48  ;;  %v1921_v49 = vsel %vm70_vm0, %v1917_v47, 0.0 }
 0xa49   :  { %1922 = vadd.xlane.f32.xlu0 %v1921_v49  ;;  %4574 = vmatprep.subr.bf16.mxu1 %v4573_v3 }
 0xa4a   :  { %4576 = vmatpush3.bf16.msra.mxu1 %v4573_v3 }
 0xa4b   :  { %4386 = vmatprep.subr.mxu1 %v4757_v36 }
 0xad5   :  { %v1926_v50 = vpop.xlane.xlu1 %1925 }
 0xad6   :  { %v1928_v51 = vmul.f32 0.03125, %v1926_v50  ;;  %v1923_v52 = vpop.xlane.xlu0 %1922 }
 0xad7   :  { %v1927_v53 = vmul.f32 0.03125, %v1923_v52 }
 0xad8   :  { %v1930_v54 = vsub.f32 %v1918_v46, %v1928_v51 }
 0xad9   :  { %v1929_v55 = vsub.f32 %v1917_v47, %v1927_v53 }
 0xada   :  { %v1932_v56 = vmul.f32 %v1930_v54, %v1930_v54 }
 0xadb   :  { %v1931_v57 = vmul.f32 %v1929_v55, %v1929_v55 }
 0xadc   :  { %v1936_v58 = vsel %vm70_vm0, %v1932_v56, 0.0 }
 0xadd   :  { %1937 = vadd.xlane.f32.xlu1 %v1936_v58  ;;  %v1933_v59 = vsel %vm70_vm0, %v1931_v57, 0.0 }
 0xade   :  { %1934 = vadd.xlane.f32.xlu0 %v1933_v59 }
 0xb6a   :  { %v1938_v4 = vpop.xlane.xlu1 %1937 }
 0xb6b   :  { %v1940_v5 = vmul.f32 0.03125, %v1938_v4  ;;  %v1935_v6 = vpop.xlane.xlu0 %1934 }
 0xb6c   :  { %v1939_v7 = vmul.f32 0.03125, %v1935_v6 }
 0xb6d   :  { %v1942_v8 = vadd.f32 1e-12, %v1940_v5 }
 0xb6e   :  { %v1941_v9 = vadd.f32 1e-12, %v1939_v7 }
 0xb6f   :  { %4683 = vrsqrt.f32 %v1942_v8 }
 0xb70   :  { %4685 = vrsqrt.f32 %v1941_v9 }
 0xb79   :  { %v4684_v10 = vpop.eup %4683 }
 0xb7a   :  { %v4686_v12 = vpop.eup %4685  ;;  %v1946_v13 = vmul.f32 %v4684_v10, %v1930_v54 }
 0xb7b   :  { %v1945_v14 = vmul.f32 %v4686_v12, %v1929_v55 }
 0xb7c   :  { %v1954_v16 = vmul.f32 %v4039_v11, %v1946_v13 }
 0xb7d   :  { %v1953_v17 = vmul.f32 %v4039_v11, %v1945_v14 }
 0xb7e   :  { %v5205_v19 = vadd.f32 %v4040_v15, %v1954_v16 }
 0xb7f   :  { %v5203_v18 = vadd.f32 %v4040_v15, %v1953_v17 }
 0xb81   :  { %4383 = vmatprep.mubr.msk.f32.mxu1 %vm70_vm0, %v5203_v18 }
 0xb82   :  { %4384 = vmatmul.mubr.msk.f32.vlgmr.msra.gmra.mrb[20].mxu1 %vm70_vm0, %v5205_v19 }
 0xb83   :  { %4388 = vmatprep.mubr.msk.f32.mxu1 %vm4758_vm1, %v4757_v36 }
 0xc55   :  { %v4385_v21 = vpop.f32.mrb[20].mxu1 }
 0xc56   :  { %v5216_v22 = vadd.f32 %v4385_v21, %v4046_v20  ;;  %v2048_v23 = vpop.f32.mrb[21].mxu1 }
 0xc57   :  { %v5218_v24 = vadd.f32 %v4046_v20, %v2048_v23 }
 0xc58   :  { %2225 = vrot.lane.b32.xlu1 %v5216_v22, %s4759_s27  ;;  %v2058_v39 = vmul.f32 0.35355338, %v5216_v22 }
 0xc59   :  { %2060 = vrot.lane.b32.xlu0 %v5218_v24, %s4759_s27  ;;  %v2057_v41 = vmul.f32 0.35355338, %v5218_v24  ;;  %s5569_s27 = smov 72  }
 0xc5c   :  { %2391 = vrot.lane.b32.xlu1 %v5218_v24, %s4760_s28 }
 0xc5d   :  { %2556 = vrot.lane.b32.xlu0 %v5216_v22, %s4760_s28  ;;  %s5570_s28 = smov 104  }
 0xc60   :  { %2389 = vrot.lane.b32.xlu1 %v2057_v41, %s4761_s4 }
 0xc61   :  { %2721 = vrot.lane.b32.xlu0 %v5218_v24, %s4762_s29 }
 0xc64   :  { %2554 = vrot.lane.b32.xlu1 %v2058_v39, %s4761_s4  ;;  %s5571_s4 = smov 64  }
 0xc65   :  { %2886 = vrot.lane.b32.xlu0 %v5216_v22, %s4762_s29  ;;  %s5572_s29 = smov 56  }
 0xc68   :  { %2719 = vrot.lane.b32.xlu1 %v2057_v41, %s5568_s5 }
 0xc69   :  { %3051 = vrot.lane.b32.xlu0 %v5218_v24, %s5569_s27 }
 0xc6c   :  { %2884 = vrot.lane.b32.xlu1 %v2058_v39, %s5568_s5 }
 0xc6d   :  { %3216 = vrot.lane.b32.xlu0 %v5216_v22, %s5569_s27  ;;  %s5577_s27 = smov 24  }
 0xc70   :  { %3049 = vrot.lane.b32.xlu1 %v2057_v41, %s5570_s28 }
 0xc74   :  { %3214 = vrot.lane.b32.xlu1 %v2058_v39, %s5570_s28 }
 0xcca   :  { %v2226_v25 = vpop.permute.xlu1 %2225 }
 0xccb   :  { %4397 = vmatpush3.xpose.msk.msra.mxu0 %vm218_vm2, %v2226_v25  ;;  %v2061_v26 = vpop.permute.xlu0 %2060 }
 0xccc   :  { %4387 = vmatpush3.xpose.msk.msra.mxu1 %vm218_vm2, %v2061_v26  ;;  %4406 = vmatprep.subr.mxu0 %v4757_v36 }
 0xccd   :  { %4391 = vmatprep.subr.mxu1 %v4757_v36 }
 0xcce   :  { %4399 = vmatmul.mubr.msk.f32.vlgmr.msra.gmra.mrb[20].mxu0 %vm218_vm2, %v2058_v39  ;;  %v2392_v27 = vpop.permute.xlu1 %2391 }
 0xccf   :  { %4407 = vmatpush3.xpose.msk.msra.mxu0 %vm218_vm2, %v2392_v27  ;;  %v2557_v28 = vpop.permute.xlu0 %2556  ;;  %4389 = vmatmul.mubr.msk.f32.vlgmr.msra.gmra.mrb[22].mxu1 %vm218_vm2, %v2057_v41 }
 0xcd0   :  { %4408 = vmatprep.mubr.msk.f32.mxu0 %vm4758_vm1, %v4757_v36  ;;  %4416 = vmatprep.subr.mxu0 %v4757_v36 }
 0xcd1   :  { %4393 = vmatprep.mubr.msk.f32.mxu1 %vm4758_vm1, %v4757_v36 }
 0xcd2   :  { %v2390_v29 = vpop.permute.xlu1 %2389 }
 0xcd3   :  { %v2722_v30 = vpop.permute.xlu0 %2721  ;;  %4409 = vmatmul.mubr.msk.f32.vlgmr.msra.gmra.mrb[22].mxu0 %vm218_vm2, %v2390_v29 }
 0xcd4   :  { %4417 = vmatpush3.xpose.msk.msra.mxu0 %vm218_vm2, %v2557_v28  ;;  %4418 = vmatprep.mubr.msk.f32.mxu0 %vm4758_vm1, %v4757_v36 }
 0xcd5   :  { %4426 = vmatprep.subr.mxu0 %v4757_v36 }
 0xcd6   :  { %v2555_v31 = vpop.permute.xlu1 %2554 }
 0xcd7   :  { %v2887_v32 = vpop.permute.xlu0 %2886  ;;  %4419 = vmatmul.mubr.msk.f32.vlgmr.msra.gmra.mrb[24].mxu0 %vm218_vm2, %v2555_v31 }
 0xcd8   :  { %4427 = vmatpush3.xpose.msk.msra.mxu0 %vm218_vm2, %v2722_v30  ;;  %4428 = vmatprep.mubr.msk.f32.mxu0 %vm4758_vm1, %v4757_v36 }
 0xcd9   :  { %4436 = vmatprep.subr.mxu0 %v4757_v36 }
 0xcda   :  { %v2720_v34 = vpop.permute.xlu1 %2719 }
 0xcdb   :  { %4429 = vmatmul.mubr.msk.f32.vlgmr.msra.gmra.mrb[26].mxu0 %vm218_vm2, %v2720_v34  ;;  %v3052_v37 = vpop.permute.xlu0 %3051 }
 0xcdc   :  { %4437 = vmatpush3.xpose.msk.msra.mxu0 %vm218_vm2, %v2887_v32  ;;  %4438 = vmatprep.mubr.msk.f32.mxu0 %vm4758_vm1, %v4757_v36 }
 0xcdd   :  { %4446 = vmatprep.subr.mxu0 %v4757_v36 }
 0xcde   :  { %v2885_v38 = vpop.permute.xlu1 %2884 }
 0xcdf   :  { %4439 = vmatmul.mubr.msk.f32.vlgmr.msra.gmra.mrb[28].mxu0 %vm218_vm2, %v2885_v38  ;;  %v3217_v42 = vpop.permute.xlu0 %3216 }
 0xce0   :  { %4447 = vmatpush3.xpose.msk.msra.mxu0 %vm218_vm2, %v3052_v37  ;;  %4448 = vmatprep.mubr.msk.f32.mxu0 %vm4758_vm1, %v4757_v36 }
 0xce1   :  { %4456 = vmatprep.subr.mxu0 %v4757_v36 }
 0xce2   :  { %v3050_v40 = vpop.permute.xlu1 %3049 }
 0xce3   :  { %4449 = vmatmul.mubr.msk.f32.vlgmr.msra.gmra.mrb[30].mxu0 %vm218_vm2, %v3050_v40 }
 0xce4   :  { %4457 = vmatpush3.xpose.msk.msra.mxu0 %vm218_vm2, %v3217_v42  ;;  %4458 = vmatprep.mubr.msk.f32.mxu0 %vm4758_vm1, %v4757_v36 }
 0xce6   :  { %v3215_v43 = vpop.permute.xlu1 %3214 }
 0xce7   :  { %4459 = vmatmul.mubr.msk.f32.vlgmr.msra.gmra.mrb[32].mxu0 %vm218_vm2, %v3215_v43 }
 0xda1   :  { %v2298_v44 = vpop.f32.mrb[20].mxu0 }
 0xda2   :  { %v2299_v45 = vadd.f32 %v2298_v44, %v4993_v1  ;;  %v2133_v35 = vpop.f32.mrb[22].mxu1  ;;  %v4400_v33 = vpop.f32.mrb[21].mxu0 }
 0xda3   :  { %v2134_v46 = vadd.f32 %v2133_v35, %v4995_v2  ;;  %v4390_v47 = vpop.f32.mrb[23].mxu1 }
 0xda4   :  { %v2302_v48 = vsel %vm218_vm2, %v2299_v45, -inf }
 0xda5   :  { %2303 = vmax.xlane.f32.xlu1 %v2302_v48  ;;  %v2137_v49 = vsel %vm218_vm2, %v2134_v46, -inf }
 0xda6   :  { %v2463_v50 = vpop.f32.mrb[22].mxu0  ;;  %2138 = vmax.xlane.f32.xlu0 %v2137_v49 }
 0xda7   :  { %v2464_v51 = vadd.f32 %v2463_v50, %v4995_v2  ;;  %v4410_v52 = vpop.f32.mrb[23].mxu0 }
 0xda9   :  { %v2467_v53 = vsel %vm218_vm2, %v2464_v51, -inf }
 0xdaa   :  { %v2628_v54 = vpop.f32.mrb[24].mxu0  ;;  %2468 = vmax.xlane.f32.xlu0 %v2467_v53 }
 0xdab   :  { %v2629_v55 = vadd.f32 %v2628_v54, %v4993_v1  ;;  %v4420_v56 = vpop.f32.mrb[25].mxu0 }
 0xdad   :  { %v2632_v57 = vsel %vm218_vm2, %v2629_v55, -inf }
 0xdae   :  { %v2793_v58 = vpop.f32.mrb[26].mxu0  ;;  %2633 = vmax.xlane.f32.xlu0 %v2632_v57 }
 0xdaf   :  { %v2794_v59 = vadd.f32 %v2793_v58, %v4995_v2  ;;  %v4430_v60 = vpop.f32.mrb[27].mxu0 }
 0xdb1   :  { %v2797_v61 = vsel %vm218_vm2, %v2794_v59, -inf }
 0xdb2   :  { %v2958_v62 = vpop.f32.mrb[28].mxu0  ;;  %2798 = vmax.xlane.f32.xlu0 %v2797_v61 }
 0xdb3   :  { %v5292_v63 = vadd.f32 %v2958_v62, %v4993_v1  ;;  %v4440_v0 = vpop.f32.mrb[29].mxu0 }
 0xdb5   :  { %v2962_v3 = vsel %vm218_vm2, %v5292_v63, -inf }
 0xdb6   :  { %2963 = vmax.xlane.f32.xlu1 %v2962_v3  ;;  %v3123_v4 = vpop.f32.mrb[30].mxu0 }
 0xdb7   :  { %v3124_v5 = vadd.f32 %v3123_v4, %v4995_v2  ;;  %v4450_v6 = vpop.f32.mrb[31].mxu0 }
 0xdb9   :  { %v3127_v7 = vsel %vm218_vm2, %v3124_v5, -inf }
 0xdba   :  { %v3288_v8 = vpop.f32.mrb[32].mxu0  ;;  %3128 = vmax.xlane.f32.xlu0 %v3127_v7 }
 0xdbb   :  { %v4460_v9 = vpop.f32.mrb[33].mxu0  ;;  %v3289_v10 = vadd.f32 %v3288_v8, %v4993_v1 }
 0xdbd   :  { %v3292_v11 = vsel %vm218_vm2, %v3289_v10, -inf }
 0xdc7   :  { %2148 = vrot.lane.b32.xlu1 %v5218_v24, %s5571_s4 }
 0xdeb   :  { %3293 = vmax.xlane.f32.xlu1 %v3292_v11 }
 0xe32   :  { %v2304_v12 = vpop.xlane.xlu1 %2303 }
 0xe33   :  { %v2305_v13 = vsub.f32 %v2299_v45, %v2304_v12  ;;  %v2139_v14 = vpop.xlane.xlu0 %2138 }
 0xe34   :  { %v2140_v15 = vsub.f32 %v2134_v46, %v2139_v14 }
 0xe35   :  { %v2306_v16 = vmul.f32 1.442695, %v2305_v13 }
 0xe36   :  { %v2141_v2 = vmul.f32 1.442695, %v2140_v15 }
 0xe37   :  { %4687 = vpow2.f32 %v2306_v16  ;;  %v2469_v39 = vpop.xlane.xlu0 %2468 }
 0xe38   :  { %4689 = vpow2.f32 %v2141_v2  ;;  %v2470_v26 = vsub.f32 %v2464_v51, %v2469_v39 }
 0xe3a   :  { %v2471_v28 = vmul.f32 1.442695, %v2470_v26 }
 0xe3b   :  { %v2634_v25 = vpop.xlane.xlu0 %2633 }
 0xe3c   :  { %v2635_v31 = vsub.f32 %v2629_v55, %v2634_v25  ;;  %4691 = vpow2.f32 %v2471_v28 }
 0xe3e   :  { %v2636_v37 = vmul.f32 1.442695, %v2635_v31 }
 0xe3f   :  { %v2799_v27 = vpop.xlane.xlu0 %2798 }
 0xe40   :  { %v2800_v29 = vsub.f32 %v2794_v59, %v2799_v27 }
 0xe41   :  { %v5302_v17 = vpop.eup %4687 }
 0xe42   :  { %v4690_v20 = vpop.eup %4689  ;;  %v2308_v21 = vsel %vm218_vm2, %v5302_v17, 0.0  ;;  %v2801_v32 = vmul.f32 1.442695, %v2800_v29 }
 0xe43   :  { %2309 = vadd.xlane.f32.xlu1 %v2308_v21  ;;  %v2964_v23 = vpop.xlane.xlu1 %2963  ;;  %v2143_v1 = vsel %vm218_vm2, %v4690_v20, 0.0 }
 0xe44   :  { %2144 = vadd.xlane.f32.xlu0 %v2143_v1  ;;  %4693 = vpow2.f32 %v2801_v32  ;;  %v2965_v52 = vsub.f32 %v5292_v63, %v2964_v23 }
 0xe45   :  { %4695 = vpow2.f32 %v2636_v37  ;;  %v4074_v37 = vld [vmem:[%s5521_s6 + $0x28] sm:$0xff] }
 0xe46   :  { %v4692_v40 = vpop.eup %4691  ;;  %v2966_v53 = vmul.f32 1.442695, %v2965_v52 }
 0xe47   :  { %v2149_v41 = vpop.permute.xlu1 %2148  ;;  %v3129_v30 = vpop.xlane.xlu0 %3128  ;;  %v2473_v43 = vsel %vm218_vm2, %v4692_v40, 0.0 }
 0xe48   :  { %4392 = vmatpush3.msra.mxu1 %v2149_v41  ;;  %v3130_v34 = vsub.f32 %v3124_v5, %v3129_v30 }
 0xe49   :  { %4401 = vmatprep.subr.mxu1 %v4757_v36 }
 0xe4a   :  { %v3131_v38 = vmul.f32 1.442695, %v3130_v34  ;;  %v4073_v34 = vld [vmem:[%s5521_s6 + $0x20] sm:$0xff] }
 0xe4c   :  { %4697 = vpow2.f32 %v3131_v38  ;;  %v4577_v38 = vpack.c.bf16 %v4074_v37, %v4073_v34 }
 0xe4e   :  { %v5317_v44 = vpop.eup %4693  ;;  %4578 = vmatprep.subr.bf16.mxu0 %v4577_v38 }
 0xe4f   :  { %v4696_v33 = vpop.eup %4695  ;;  %v2803_v46 = vsel %vm218_vm2, %v5317_v44, 0.0  ;;  %4580 = vmatpush3.bf16.msra.mxu0 %v4577_v38  ;;  %v4093_v38 = vld [vmem:[%s5527_s12 + $0x40] sm:$0xff] }
 0xe50   :  { %v2638_v48 = vsel %vm218_vm2, %v4696_v33, 0.0 }
 0xe54   :  { %2478 = vrot.lane.b32.xlu1 %v5218_v24, %s5572_s29 }
 0xe56   :  { %v5321_v47 = vpop.eup %4697 }
 0xe57   :  { %v3133_v49 = vsel %vm218_vm2, %v5321_v47, 0.0 }
 0xe58   :  { %2643 = vrot.lane.b32.xlu1 %v5216_v22, %s5572_s29 }
 0xe5a   :  { %2313 = vrot.lane.b32.xlu0 %v5216_v22, %s5571_s4 }
 0xe5c   :  { %2808 = vrot.lane.b32.xlu1 %v5218_v24, %s5573_s21 }
 0xe78   :  { %v3294_v42 = vpop.xlane.xlu1 %3293 }
 0xe79   :  { %v3295_v45 = vsub.f32 %v3289_v10, %v3294_v42  ;;  %2474 = vadd.xlane.f32.xlu0 %v2473_v43  ;;  %v4076_v42 = vld [vmem:[%s5521_s6 + $0x38] sm:$0xff] }
 0xe7b   :  { %v3296_v35 = vmul.f32 1.442695, %v3295_v45 }
 0xe7d   :  { %4699 = vpow2.f32 %v3296_v35  ;;  %2804 = vadd.xlane.f32.xlu0 %v2803_v46 }
 0xe7e   :  { %4701 = vpow2.f32 %v2966_v53 }
 0xe80   :  { %2639 = vadd.xlane.f32.xlu1 %v2638_v48 }
 0xe81   :  { %3134 = vadd.xlane.f32.xlu0 %v3133_v49 }
 0xe87   :  { %v5326_v50 = vpop.eup %4699 }
 0xe88   :  { %v3298_v51 = vsel %vm218_vm2, %v5326_v50, 0.0  ;;  %v4702_v54 = vpop.eup %4701 }
 0xe89   :  { %3299 = vadd.xlane.f32.xlu0 %v3298_v51  ;;  %v2968_v55 = vsel %vm218_vm2, %v4702_v54, 0.0 }
 0xe91   :  { %2973 = vrot.lane.b32.xlu1 %v5216_v22, %s5573_s21 }
 0xe9f   :  { %3138 = vrot.lane.b32.xlu0 %v5218_v24, %s5574_s24 }
 0xeb5   :  { %2969 = vadd.xlane.f32.xlu1 %v2968_v55 }
 0xec6   :  { %3303 = vrot.lane.b32.xlu1 %v5216_v22, %s5574_s24 }
 0xed0   :  { %v2310_v56 = vpop.xlane.xlu1 %2309 }
 0xed1   :  { %v2145_v57 = vpop.xlane.xlu0 %2144 }
 0xed2   :  { %4703 = vrcp.f32 %v2145_v57 }
 0xed3   :  { %4705 = vrcp.f32 %v2310_v56 }
 0xed4   :  { %v2479_v62 = vpop.permute.xlu1 %2478 }
 0xed5   :  { %v2314_v61 = vpop.permute.xlu0 %2313 }
 0xed8   :  { %v2644_v22 = vpop.permute.xlu1 %2643 }
 0xedc   :  { %v4704_v58 = vpop.eup %4703  ;;  %v2809_v0 = vpop.permute.xlu1 %2808 }
 0xedd   :  { %v2147_v59 = vmul.f32 %v4704_v58, %v4690_v20  ;;  %v4706_v60 = vpop.eup %4705 }
 0xede   :  { %v2312_v24 = vmul.f32 %v4706_v60, %v5302_v17  ;;  %v4078_v60 = vld [vmem:[%s5522_s7 + $0x1] ss:$0 sm:$0xff] }
 0xedf   :  { %4394 = vmatmul.mubr.msk.f32.vlgmr.msra.gmra.mrb[24].mxu1 %vm218_vm2, %v2147_v59 }
 0xee0   :  { %4402 = vmatpush3.msra.mxu1 %v2314_v61  ;;  %4403 = vmatprep.mubr.msk.f32.mxu1 %vm4758_vm1, %v4757_v36 }
 0xee1   :  { %4411 = vmatprep.subr.mxu1 %v4757_v36 }
 0xee3   :  { %4404 = vmatmul.mubr.msk.f32.vlgmr.msra.gmra.mrb[26].mxu1 %vm218_vm2, %v2312_v24 }
 0xee4   :  { %4412 = vmatpush3.msra.mxu1 %v2479_v62  ;;  %4413 = vmatprep.mubr.msk.f32.mxu1 %vm4758_vm1, %v4757_v36 }
 0xee5   :  { %4421 = vmatprep.subr.mxu1 %v4757_v36 }
 0xf06   :  { %v2475_v63 = vpop.xlane.xlu0 %2474 }
 0xf07   :  { %4707 = vrcp.f32 %v2475_v63 }
 0xf0a   :  { %v2805_v3 = vpop.xlane.xlu0 %2804 }
 0xf0d   :  { %v2640_v4 = vpop.xlane.xlu1 %2639 }
 0xf0e   :  { %4709 = vrcp.f32 %v2640_v4  ;;  %v3135_v12 = vpop.xlane.xlu0 %3134 }
 0xf0f   :  { %4711 = vrcp.f32 %v2805_v3 }
 0xf11   :  { %v4708_v5 = vpop.eup %4707  ;;  %v2974_v11 = vpop.permute.xlu1 %2973 }
 0xf12   :  { %v2477_v6 = vmul.f32 %v4708_v5, %v4692_v40  ;;  %v4075_v40 = vld [vmem:[%s5521_s6 + $0x30] sm:$0xff] }
 0xf13   :  { %v4581_v43 = vpack.c.bf16 %v4076_v42, %v4075_v40  ;;  %v4094_v40 = vld [vmem:[%s5527_s12 + $0x48] sm:$0xff] }
 0xf14   :  { %4414 = vmatmul.mubr.msk.f32.vlgmr.msra.gmra.mrb[28].mxu1 %vm218_vm2, %v2477_v6  ;;  %v4593_v42 = vpack.c.bf16 %v4094_v40, %v4093_v38 }
 0xf15   :  { %4422 = vmatpush3.msra.mxu1 %v2644_v22  ;;  %4423 = vmatprep.mubr.msk.f32.mxu1 %vm4758_vm1, %v4757_v36 }
 0xf16   :  { %4431 = vmatprep.subr.mxu1 %v4757_v36  ;;  %v3300_v14 = vpop.xlane.xlu0 %3299  ;;  %4582 = vmatprep.subr.bf16.mxu0 %v4581_v43 }
 0xf17   :  { %4584 = vmatpush3.bf16.msra.mxu0 %v4581_v43  ;;  %v4095_v43 = vld [vmem:[%s5527_s12 + $0x50] sm:$0xff] }
 0xf18   :  { %v4710_v7 = vpop.eup %4709  ;;  %4594 = vmatprep.subr.bf16.mxu0 %v4593_v42 }
 0xf19   :  { %v2642_v8 = vmul.f32 %v4710_v7, %v4696_v33  ;;  %v4712_v9 = vpop.eup %4711 }
 0xf1a   :  { %v2807_v10 = vmul.f32 %v4712_v9, %v5317_v44  ;;  %v3139_v17 = vpop.permute.xlu0 %3138 }
 0xf1b   :  { %4424 = vmatmul.mubr.msk.f32.vlgmr.msra.gmra.mrb[30].mxu1 %vm218_vm2, %v2642_v8 }
 0xf1c   :  { %4432 = vmatpush3.msra.mxu1 %v2809_v0  ;;  %4433 = vmatprep.mubr.msk.f32.mxu1 %vm4758_vm1, %v4757_v36 }
 0xf1d   :  { %4441 = vmatprep.subr.mxu1 %v4757_v36 }
 0xf1f   :  { %4434 = vmatmul.mubr.msk.f32.vlgmr.msra.gmra.mrb[32].mxu1 %vm218_vm2, %v2807_v10 }
 0xf20   :  { %4442 = vmatpush3.msra.mxu1 %v2974_v11  ;;  %4443 = vmatprep.mubr.msk.f32.mxu1 %vm4758_vm1, %v4757_v36 }
 0xf21   :  { %4451 = vmatprep.subr.mxu1 %v4757_v36 }
 0xf42   :  { %v2970_v13 = vpop.xlane.xlu1 %2969 }
 0xf43   :  { %4713 = vrcp.f32 %v2970_v13 }
 0xf44   :  { %4715 = vrcp.f32 %v3135_v12 }
 0xf45   :  { %4717 = vrcp.f32 %v3300_v14  ;;  %v4086_v14 = vld [vmem:[%s5525_s10 + $0x28] sm:$0xff] }
 0xf46   :  { %v3304_v23 = vpop.permute.xlu1 %3303 }
 0xf4d   :  { %v4714_v15 = vpop.eup %4713 }
 0xf4e   :  { %v2972_v16 = vmul.f32 %v4714_v15, %v4702_v54  ;;  %v4716_v2 = vpop.eup %4715 }
 0xf4f   :  { %v3137_v20 = vmul.f32 %v4716_v2, %v5321_v47  ;;  %v4718_v21 = vpop.eup %4717  ;;  %v4088_v2 = vld [vmem:[%s5525_s10 + $0x38] sm:$0xff] }
 0xf50   :  { %4444 = vmatmul.mubr.msk.f32.vlgmr.msra.gmra.mrb[34].mxu1 %vm218_vm2, %v2972_v16  ;;  %v3302_v1 = vmul.f32 %v4718_v21, %v5326_v50  ;;  %v4087_v16 = vld [vmem:[%s5525_s10 + $0x30] sm:$0xff] }
 0xf51   :  { %4452 = vmatpush3.msra.mxu1 %v3139_v17  ;;  %4453 = vmatprep.mubr.msk.f32.mxu1 %vm4758_vm1, %v4757_v36  ;;  %v4589_v17 = vpack.c.bf16 %v4088_v2, %v4087_v16 }
 0xf52   :  { %4461 = vmatprep.subr.mxu1 %v4757_v36 }
 0xf54   :  { %4454 = vmatmul.mubr.msk.f32.vlgmr.msra.gmra.mrb[36].mxu1 %vm218_vm2, %v3137_v20 }
 0xf55   :  { %4462 = vmatpush3.msra.mxu1 %v3304_v23  ;;  %4463 = vmatprep.mubr.msk.f32.mxu1 %vm4758_vm1, %v4757_v36 }
 0xf58   :  { %4464 = vmatmul.mubr.msk.f32.vlgmr.msra.gmra.mrb[38].mxu1 %vm218_vm2, %v3302_v1 }
 0xfb2   :  { %v2220_v41 = vpop.f32.mrb[24].mxu1 }
 0xfb3   :  { %v4395_v39 = vpop.f32.mrb[25].mxu1 }
 0xfb6   :  { %v2385_v25 = vpop.f32.mrb[26].mxu1 }
 0xfb7   :  { %v4405_v26 = vpop.f32.mrb[27].mxu1 }
 0xfb8   :  { %v4083_v26 = vld [vmem:[%s5523_s8 + $0x1] ss:$0 sm:$0xff] }
 0xfe7   :  { %v2550_v27 = vpop.f32.mrb[28].mxu1 }
 0xfe8   :  { %3381 = vrot.lane.b32.xlu0 %v2550_v27, %s5575_s25  ;;  %v4415_v28 = vpop.f32.mrb[29].mxu1 }
 0xfe9   :  { %v4084_v28 = vld [vmem:[%s5524_s9 + $0x1] ss:$0 sm:$0xff] }
 0xfee   :  { %v2715_v29 = vpop.f32.mrb[30].mxu1 }
 0xfef   :  { %3383 = vrot.lane.b32.xlu1 %v2715_v29, %s5575_s25  ;;  %v4425_v30 = vpop.f32.mrb[31].mxu1 }
 0xff2   :  { %v2880_v31 = vpop.f32.mrb[32].mxu1 }
 0xff3   :  { %3389 = vrot.lane.b32.xlu0 %v2880_v31, %s5576_s30  ;;  %v4435_v32 = vpop.f32.mrb[33].mxu1 }
0x1023   :  { %v3045_v44 = vpop.f32.mrb[34].mxu1 }
0x1024   :  { %3391 = vrot.lane.b32.xlu1 %v3045_v44, %s5576_s30  ;;  %v4445_v45 = vpop.f32.mrb[35].mxu1  ;;  %v4096_v44 = vld [vmem:[%s5527_s12 + $0x58] sm:$0xff] }
0x1025   :  { %v4597_v45 = vpack.c.bf16 %v4096_v44, %v4095_v43 }
0x1027   :  { %v3210_v35 = vpop.f32.mrb[36].mxu1 }
0x1028   :  { %3397 = vrot.lane.b32.xlu0 %v3210_v35, %s5577_s27  ;;  %v4455_v33 = vpop.f32.mrb[37].mxu1  ;;  %v4097_v35 = vld [vmem:[%s5527_s12 + $0x60] sm:$0xff] }
0x1029   :  { %v4098_v33 = vld [vmem:[%s5527_s12 + $0x68] sm:$0xff] }
0x102b   :  { %v3375_v46 = vpop.f32.mrb[38].mxu1 }
0x102c   :  { %3399 = vrot.lane.b32.xlu1 %v3375_v46, %s5577_s27  ;;  %v4465_v47 = vpop.f32.mrb[39].mxu1  ;;  %v4601_v46 = vpack.c.bf16 %v4098_v33, %v4097_v35 }
0x102d   :  { %v4099_v47 = vld [vmem:[%s5527_s12 + $0x70] sm:$0xff] }
0x105a   :  { %v3382_v48 = vpop.permute.xlu0 %3381 }
0x105b   :  { %v3403_v51 = vsel %vm218_vm2, %v2220_v41, %v3382_v48  ;;  %v4100_v48 = vld [vmem:[%s5527_s12 + $0x78] sm:$0xff] }
0x1061   :  { %v3384_v49 = vpop.permute.xlu1 %3383 }
0x1062   :  { %v3404_v56 = vsel %vm218_vm2, %v2385_v25, %v3384_v49  ;;  %v4605_v49 = vpack.c.bf16 %v4100_v48, %v4099_v47  ;;  %v4108_v47 = vld [vmem:[%s5530_s15 + $0x1] ss:$0 sm:$0xff] }
0x1065   :  { %v3390_v50 = vpop.permute.xlu0 %3389 }
0x1066   :  { %v3405_v52 = vsel %vm1566_vm3, %v3403_v51, %v3390_v50  ;;  %v4090_v50 = vld [vmem:[%s5526_s11 + $0x1] ss:$0 sm:$0xff] }
0x1096   :  { %v3392_v53 = vpop.permute.xlu1 %3391 }
0x1097   :  { %v3406_v57 = vsel %vm1566_vm3, %v3404_v56, %v3392_v53 }
0x109a   :  { %v3398_v54 = vpop.permute.xlu0 %3397 }
0x109b   :  { %v3407_v55 = vsel %vm1569_vm4, %v3405_v52, %v3398_v54 }
0x109c   :  { %4474 = vmatprep.mubr.msk.f32.mxu0 %vm70_vm0, %v3407_v55 }
0x109e   :  { %v3400_v58 = vpop.permute.xlu1 %3399 }
0x109f   :  { %v3408_v59 = vsel %vm1569_vm4, %v3406_v57, %v3400_v58 }
0x10a0   :  { %4475 = vmatmul.mubr.msk.f32.vlgmr.msra.gmra.mrb[34].mxu0 %vm70_vm0, %v3408_v59 }
0x10a1   :  { %4596 = vmatpush3.bf16.msra.mxu0 %v4593_v42 }
0x10a2   :  { %4598 = vmatprep.subr.bf16.mxu0 %v4597_v45 }
0x10a5   :  { %4600 = vmatpush3.bf16.msra.mxu0 %v4597_v45  ;;  %v4107_v45 = vld [vmem:[%s5529_s14 + $0x1] ss:$0 sm:$0xff] }
0x10a6   :  { %4602 = vmatprep.subr.bf16.mxu0 %v4601_v46 }
0x10a9   :  { %4604 = vmatpush3.bf16.msra.mxu0 %v4601_v46 }
0x10aa   :  { %4606 = vmatprep.subr.bf16.mxu0 %v4605_v49 }
0x10ad   :  { %4608 = vmatpush3.bf16.msra.mxu0 %v4605_v49 }
0x1173   :  { %v4476_v61 = vpop.f32.mrb[34].mxu0 }
0x1174   :  { %v3500_v24 = vadd.f32 %v4476_v61, %v4078_v60  ;;  %v3494_v62 = vpop.f32.mrb[35].mxu0 }
0x1175   :  { %v3495_v22 = vadd.f32 %v4078_v60, %v3494_v62 }
0x1176   :  { %v3504_v63 = vadd.f32 %v3500_v24, %v5205_v19 }
0x1177   :  { %v3503_v0 = vadd.f32 %v3495_v22, %v5203_v18  ;;  %v4085_v18 = vld [vmem:[%s5525_s10 + $0x20] sm:$0xff] }
0x1178   :  { %v3512_v3 = vsel %vm70_vm0, %v3504_v63, 0.0  ;;  %v4585_v15 = vpack.c.bf16 %v4086_v14, %v4085_v18 }
0x1179   :  { %3513 = vadd.xlane.f32.xlu1 %v3512_v3  ;;  %v3509_v4 = vsel %vm70_vm0, %v3503_v0, 0.0 }
0x117a   :  { %3510 = vadd.xlane.f32.xlu0 %v3509_v4  ;;  %4586 = vmatprep.subr.bf16.mxu1 %v4585_v15 }
0x117b   :  { %4588 = vmatpush3.bf16.msra.mxu1 %v4585_v15 }
0x117c   :  { %4590 = vmatprep.subr.bf16.mxu1 %v4589_v17 }
0x117f   :  { %4592 = vmatpush3.bf16.msra.mxu1 %v4589_v17 }
0x1206   :  { %v3514_v5 = vpop.xlane.xlu1 %3513 }
0x1207   :  { %v3516_v6 = vmul.f32 0.03125, %v3514_v5  ;;  %v3511_v7 = vpop.xlane.xlu0 %3510 }
0x1208   :  { %v3515_v8 = vmul.f32 0.03125, %v3511_v7 }
0x1209   :  { %v3518_v9 = vsub.f32 %v3504_v63, %v3516_v6 }
0x120a   :  { %v3517_v10 = vsub.f32 %v3503_v0, %v3515_v8 }
0x120b   :  { %v3520_v13 = vmul.f32 %v3518_v9, %v3518_v9 }
0x120c   :  { %v3519_v11 = vmul.f32 %v3517_v10, %v3517_v10 }
0x120d   :  { %v3524_v19 = vsel %vm70_vm0, %v3520_v13, 0.0 }
0x120e   :  { %v3521_v12 = vsel %vm70_vm0, %v3519_v11, 0.0 }
0x120f   :  { %3522 = vadd.xlane.f32.xlu0 %v3521_v12 }
0x1213   :  { %3525 = vadd.xlane.f32.xlu0 %v3524_v19 }
0x129c   :  { %v3523_v20 = vpop.xlane.xlu0 %3522 }
0x129d   :  { %v3527_v21 = vmul.f32 0.03125, %v3523_v20 }
0x129f   :  { %v3529_v23 = vadd.f32 1e-12, %v3527_v21 }
0x12a0   :  { %v3526_v1 = vpop.xlane.xlu0 %3525 }
0x12a1   :  { %4719 = vrsqrt.f32 %v3529_v23  ;;  %v3528_v41 = vmul.f32 0.03125, %v3526_v1 }
0x12a3   :  { %v3530_v39 = vadd.f32 1e-12, %v3528_v41 }
0x12a5   :  { %4721 = vrsqrt.f32 %v3530_v39 }
0x12ab   :  { %v4720_v25 = vpop.eup %4719 }
0x12ac   :  { %v3533_v27 = vmul.f32 %v4720_v25, %v3517_v10 }
0x12ae   :  { %v3541_v29 = vmul.f32 %v4083_v26, %v3533_v27  ;;  %v3815_v27 = vld [vmem:[%s5531_s16 + $0x8] sm:$0xff] }
0x12af   :  { %v4722_v30 = vpop.eup %4721 }
0x12b0   :  { %v3534_v31 = vmul.f32 %v4722_v30, %v3518_v9  ;;  %v3549_v32 = vadd.f32 %v4084_v28, %v3541_v29  ;;  %v4102_v9 = vld [vmem:[%s5528_s13 + $0x1] ss:$0 sm:$0xff]  ;;  %v3816_v29 = vld [vmem:[%s5531_s16 + $0x10] sm:$0xff]  ;;  %v3817_v30 = vld [vmem:[%s5531_s16 + $0x18] sm:$0xff] }
0x12b2   :  { %v3542_v34 = vmul.f32 %v4083_v26, %v3534_v31  ;;  %4485 = vmatprep.mubr.msk.f32.mxu1 %vm70_vm0, %v3549_v32  ;;  %v3814_v26 = vld [vmem:[%s5531_s16] sm:$0xff]  ;;  %v4773_v31 = vmov 0.0|0.0  }
0x12b3   :  { %4609 = vmatprep.subr.bf16.mxu1 %v4773_v31 }
0x12b4   :  { %v3550_v37 = vadd.f32 %v4084_v28, %v3542_v34  ;;  %v4610_v28 = vpack.c.bf16 %v3815_v27, %v3814_v26 }
0x12b6   :  { %4486 = vmatmul.mubr.msk.f32.vlgmr.msra.gmra.mrb[40].mxu1 %vm70_vm0, %v3550_v37 }
0x12b7   :  { %4515 = vmatprep.mubr.msk.f32.mxu1 %vm4758_vm1, %v4757_v36  ;;  %4611 = vmatpush3.bf16.msra.mxu1 %v4610_v28 }
0x12b8   :  { %4612 = vmatprep.subr.bf16.mxu1 %v4773_v31 }
0x1389   :  { %v4487_v51 = vpop.f32.mrb[40].mxu1 }
0x138a   :  { %v3642_v52 = vadd.f32 %v4487_v51, %v4090_v50  ;;  %v3636_v53 = vpop.f32.mrb[41].mxu1 }
0x138b   :  { %v3637_v54 = vadd.f32 %v4090_v50, %v3636_v53 }
0x138c   :  { %v3648_v55 = vmul.f32 0.044715, %v3642_v52  ;;  %v3646_v6 = vmul.f32 0.5, %v3642_v52 }
0x138d   :  { %v3647_v56 = vmul.f32 0.044715, %v3637_v54  ;;  %v3645_v4 = vmul.f32 0.5, %v3637_v54 }
0x138e   :  { %v3650_v57 = vmul.f32 %v3648_v55, %v3642_v52  ;;  %v3900_v55 = vld [vmem:[%s5533_s18 + $0x8] sm:$0xff] }
0x138f   :  { %v3649_v58 = vmul.f32 %v3647_v56, %v3637_v54  ;;  %v3901_v56 = vld [vmem:[%s5533_s18 + $0x10] sm:$0xff] }
0x1390   :  { %v3652_v59 = vmul.f32 %v3650_v57, %v3642_v52 }
0x1391   :  { %v3651_v60 = vmul.f32 %v3649_v58, %v3637_v54  ;;  %v3902_v58 = vld [vmem:[%s5533_s18 + $0x18] sm:$0xff] }
0x1392   :  { %v3654_v61 = vadd.f32 %v3652_v59, %v3642_v52  ;;  %v4619_v59 = vpack.c.bf16 %v3902_v58, %v3901_v56 }
0x1393   :  { %v3653_v24 = vadd.f32 %v3651_v60, %v3637_v54  ;;  %v3899_v54 = vld [vmem:[%s5533_s18] sm:$0xff]  ;;  %s4774_s18 = smov [#allocation2]  }
0x1394   :  { %v3656_v62 = vmul.f32 0.7978846, %v3654_v61  ;;  %v4616_v57 = vpack.c.bf16 %v3900_v55, %v3899_v54  ;;  %s3991_s3 = sshll.u32 %s4774_s18, 4  ;;  %s3992_s3 = int_to_ptr.vmem [resolvable:$true] %s3991_s3 }
0x1395   :  { %v3655_v22 = vmul.f32 0.7978846, %v3653_v24  ;;  %p4738_p1 = scmp.lt.s32.totalorder %s3992_s3, %s3992_s3 }
0x1396   :  { %4723 = vtanh.f32 %v3656_v62 }
0x1397   :  { %4725 = vtanh.f32 %v3655_v22  ;;  %v4111_v22 = vld [vmem:[%s5534_s19] ss:$0 sm:$0xff] }
0x13a0   :  { %v4724_v63 = vpop.eup %4723 }
0x13a1   :  { %v4726_v0 = vpop.eup %4725  ;;  %v3660_v3 = vadd.f32 1.0, %v4724_v63 }
0x13a2   :  { %v3659_v5 = vadd.f32 1.0, %v4726_v0 }
0x13a3   :  { %v3662_v8 = vmul.f32 %v3660_v3, %v3646_v6 }
0x13a4   :  { %v3661_v7 = vmul.f32 %v3659_v5, %v3645_v4 }
0x13a6   :  { %4504 = vmatprep.mubr.msk.f32.mxu0 %vm1835_vm5, %v3661_v7 }
0x13a7   :  { %4505 = vmatmul.mubr.msk.f32.vlgmr.msra.gmra.mrb[36].mxu0 %vm1835_vm5, %v3662_v8 }
0x147a   :  { %v4506_v10 = vpop.f32.mrb[36].mxu0 }
0x147b   :  { %v3758_v11 = vadd.f32 %v4506_v10, %v4102_v9  ;;  %v3752_v12 = vpop.f32.mrb[37].mxu0 }
0x147c   :  { %v3753_v13 = vadd.f32 %v4102_v9, %v3752_v12 }
0x147d   :  { %v3762_v19 = vadd.f32 %v3758_v11, %v3550_v37 }
0x147e   :  { %v3761_v18 = vadd.f32 %v3753_v13, %v3549_v32  ;;  %v4613_v32 = vpack.c.bf16 %v3817_v30, %v3816_v29 }
0x147f   :  { %v3770_v14 = vsel %vm70_vm0, %v3762_v19, 0.0 }
0x1480   :  { %3771 = vadd.xlane.f32.xlu0 %v3770_v14  ;;  %v3767_v15 = vsel %vm70_vm0, %v3761_v18, 0.0  ;;  %4614 = vmatpush3.bf16.msra.mxu1 %v4613_v32 }
0x1481   :  { %3768 = vadd.xlane.f32.xlu1 %v3767_v15  ;;  %4615 = vmatprep.subr.bf16.mxu1 %v4773_v31 }
0x150d   :  { %v3772_v16 = vpop.xlane.xlu0 %3771 }
0x150e   :  { %v3774_v2 = vmul.f32 0.03125, %v3772_v16  ;;  %v3769_v17 = vpop.xlane.xlu1 %3768 }
0x150f   :  { %v3773_v20 = vmul.f32 0.03125, %v3769_v17 }
0x1510   :  { %v3776_v21 = vsub.f32 %v3762_v19, %v3774_v2 }
0x1511   :  { %v3775_v23 = vsub.f32 %v3761_v18, %v3773_v20 }
0x1512   :  { %v3778_v1 = vmul.f32 %v3776_v21, %v3776_v21 }
0x1513   :  { %v3777_v41 = vmul.f32 %v3775_v23, %v3775_v23 }
0x1514   :  { %v3782_v39 = vsel %vm70_vm0, %v3778_v1, 0.0 }
0x1515   :  { %3783 = vadd.xlane.f32.xlu0 %v3782_v39  ;;  %v3779_v25 = vsel %vm70_vm0, %v3777_v41, 0.0 }
0x1516   :  { %3780 = vadd.xlane.f32.xlu1 %v3779_v25 }
0x15a2   :  { %v3784_v34 = vpop.xlane.xlu0 %3783 }
0x15a3   :  { %v3786_v37 = vmul.f32 0.03125, %v3784_v34  ;;  %v3781_v38 = vpop.xlane.xlu1 %3780 }
0x15a4   :  { %v3785_v40 = vmul.f32 0.03125, %v3781_v38 }
0x15a5   :  { %v3788_v42 = vadd.f32 1e-12, %v3786_v37 }
0x15a6   :  { %v3787_v43 = vadd.f32 1e-12, %v3785_v40 }
0x15a7   :  { %4727 = vrsqrt.f32 %v3788_v42 }
0x15a8   :  { %4729 = vrsqrt.f32 %v3787_v43 }
0x15b1   :  { %v4728_v44 = vpop.eup %4727 }
0x15b2   :  { %v4730_v35 = vpop.eup %4729  ;;  %v3792_v33 = vmul.f32 %v4728_v44, %v3776_v21 }
0x15b3   :  { %v3791_v46 = vmul.f32 %v4730_v35, %v3775_v23 }
0x15b4   :  { %v3800_v48 = vmul.f32 %v4107_v45, %v3792_v33 }
0x15b5   :  { %v3799_v49 = vmul.f32 %v4107_v45, %v3791_v46 }
0x15b6   :  { %v3808_v50 = vadd.f32 %v4108_v47, %v3800_v48 }
0x15b7   :  { %v3807_v51 = vadd.f32 %v4108_v47, %v3799_v49 }
0x15b8   :  { %v3810_v52 = vrot.slane %v3808_v50, 7 }
0x15ba   :  { %v3813_v53 = vsel %vm3812_vm6, %v3807_v51, %v3810_v52 }
0x15bb   :  { %4516 = vmatmul.mubr.msk.f32.vlgmr.msra.gmra.mrb[42].mxu1 %vm70_vm0, %v3813_v53 }
0x15bc   :  { %4526 = vmatprep.mubr.msk.f32.mxu1 %vm4758_vm1, %v4757_v36  ;;  %4617 = vmatpush3.bf16.msra.mxu1 %v4616_v57  ;;  %v4109_v36 = vld [vmem:[%s5532_s17] ss:$0 sm:$0xff]  ;;  %s4733_s17 = scalar_lea.vmem %s3992_s3, 32 }
0x15bd   :  { %4618 = vmatprep.subr.bf16.mxu1 %v4773_v31  ;;  %p4734_p0 = scmp.ne.s32.totalorder %s3992_s3, %s4733_s17  ;;  %p4739_p2 = scmp.lt.s32.totalorder %s4733_s17, %s4733_s17 }
0x15bf   :  { %p4740_p3 = por %p4739_p2, %p4738_p1 }
0x15c0   :  { %4620 = vmatpush3.bf16.msra.mxu1 %v4619_v59 }
0x15c1   :  { %p4741_p4 = pnand %p4740_p3, %p4734_p0 }
0x168e   :  { %v3894_v60 = vpop.f32.mrb[42].mxu1 }
0x168f   :  { %v3895_v61 = vadd.f32 %v4109_v36, %v3894_v60  ;;  %v4517_v24 = vpop.f32.mrb[43].mxu1 }
0x1691   :  { %4731 = vtanh.f32 %v3895_v61 }
0x169b   :  { %v4732_v62 = vpop.eup %4731 }
0x169c   :  { %4527 = vmatmul.mubr.msk.f32.vlgmr.msra.gmra.mrb[44].mxu1 %vm70_vm0, %v4732_v62 }
0x176f   :  { %v3979_v63 = vpop.f32.mrb[44].mxu1 }
0x1770   :  { %v3980_v0 = vadd.f32 %v4111_v22, %v3979_v63  ;;  %v4528_v3 = vpop.f32.mrb[45].mxu1 }
0x1772   :  { %3984 = vst.msk [vmem:[#allocation2] sm:$0x3] %vm3983_vm7, %v3980_v0 }
0x1773   :  { %4744 = shalt.err (!%p4741_p4)
}
0x1774   :  { %s4745_s13 = scalar_lea.hbm %s5535_s20, 32 }
0x1775   :  { %p4746_p5 = scmp.ne.s32.totalorder %s5535_s20, %s4745_s13  ;;  %p4749_p6 = scmp.lt.u32.totalorder %s4745_s13, %s5535_s20 }
0x1777   :  { %p4751_p7 = pnand %p4749_p6, %p4746_p5 }
0x1779   :  { %4754 = shalt.err (!%p4751_p7)
}
0x177a   :  { %3994 = dma.vmem_to_hbm [thread:$0]  %s3992_s3, 32, %s5535_s20, [#allocation3]  }
0x177b   :  { %4755 = dma.done.wait [#allocation3], 32  }
0x177c   :  { %4756 = vsyncadd [#allocation3], 4294967264 }
0x177d   :  { %3998 = vsyncpa [#allocation3], 1 }

</bundles_post_ra>
